<compile_context>
chip_gen: v7x
topology: tpu7x:2x2x1
jax: 0.10.0
libtpu: 0.0.40
codegen_flags: <defaults>
</compile_context>

<pallas_src>
import math
import jax
import jax.numpy as jnp
from jax import lax
from jax.experimental import pallas as pl

# ----------------------------- small synthetic config -----------------------------
VOCAB       = 128
HIDDEN      = 128          # lane-dense (multiple of 128)
NUM_HEADS   = 4
HEAD_DIM    = HIDDEN // NUM_HEADS
INTER       = 256          # lane-dense
NUM_LAYERS  = 2
MAX_POS     = 32
NUM_LABELS  = 2
SEQ         = 16
BATCH       = 2
BS          = BATCH * SEQ  # flattened rows
PAD_ID      = 1            # Roberta pad token id
CLS_ID      = 0            # <s>
SEP_ID      = 2            # </s>
LN_EPS      = 1e-5


# ----------------------------- in-kernel helpers -----------------------------
def _layer_norm(x, g, b):
    mu = jnp.mean(x, axis=-1, keepdims=True)
    var = jnp.mean((x - mu) ** 2, axis=-1, keepdims=True)
    return (x - mu) * lax.rsqrt(var + LN_EPS) * g + b


def _gelu(x):
    # TODO(synk): HF Roberta uses exact erf-based GELU; tanh approximation used here for
    # guaranteed EUP lowering on TPU (numerically ~1e-3 close).
    return jax.nn.gelu(x, approximate=True)


# ----------------------------- fused Pallas kernel -----------------------------
def fused_forward_kernel(e_ref, bias_ref, eg_ref, eb_ref,
                         wqkv_ref, bqkv_ref, wo_ref, bo_ref, ln1g_ref, ln1b_ref,
                         w1_ref, b1_ref, w2_ref, b2_ref, ln2g_ref, ln2b_ref,
                         wd_ref, bd_ref, wc_ref, bc_ref,
                         logits_ref):
    scale = 1.0 / math.sqrt(HEAD_DIM)
    bias = bias_ref[...]                                   # (BS, BS), hoisted out of all loops

    # embedding LayerNorm
    x = _layer_norm(e_ref[...], eg_ref[...], eb_ref[...])  # (BS, H) f32

    for l in range(NUM_LAYERS):                            # static unroll over layers
        x_bf = x.astype(jnp.bfloat16)

        # fused Q/K/V projection: one (BS,H) x (H,3H) matmul
        qkv = jnp.dot(x_bf, wqkv_ref[l], preferred_element_type=jnp.float32) + bqkv_ref[l]
        q = qkv[:, :HIDDEN]
        k = qkv[:, HIDDEN:2 * HIDDEN]
        v = qkv[:, 2 * HIDDEN:]
        wo_l = wo_ref[l]                                   # (H, H) bf16

        # multi-head attention; each head folds straight into the output projection
        attn = jnp.zeros((BS, HIDDEN), jnp.float32) + bo_ref[l]
        for h in range(NUM_HEADS):                         # static unroll over heads
            lo, hi = h * HEAD_DIM, (h + 1) * HEAD_DIM
            qh = q[:, lo:hi].astype(jnp.bfloat16)
            kh = k[:, lo:hi].astype(jnp.bfloat16)
            vh = v[:, lo:hi].astype(jnp.bfloat16)
            # q @ k^T without an explicit transpose: contract the head dims directly.
            s = lax.dot_general(qh, kh, (((1,), (1,)), ((), ())),
                                preferred_element_type=jnp.float32)
            s = s * scale + bias                           # block-diagonal + padding mask
            s = s - jnp.max(s, axis=-1, keepdims=True)
            p = jnp.exp(s)
            p = p * pl.reciprocal(jnp.sum(p, axis=-1, keepdims=True), approx=True)
            ctx_h = jnp.dot(p.astype(jnp.bfloat16), vh,
                            preferred_element_type=jnp.float32)           # (BS, HD)
            # ctx @ Wo == sum_h ctx_h @ Wo[lo:hi, :]  -> no concatenate / scratch needed
            attn = attn + jnp.dot(ctx_h.astype(jnp.bfloat16), wo_l[lo:hi, :],
                                  preferred_element_type=jnp.float32)

        h1 = _layer_norm(x + attn, ln1g_ref[l], ln1b_ref[l])

        inter = _gelu(jnp.dot(h1.astype(jnp.bfloat16), w1_ref[l],
                              preferred_element_type=jnp.float32) + b1_ref[l])
        ffn = jnp.dot(inter.astype(jnp.bfloat16), w2_ref[l],
                      preferred_element_type=jnp.float32) + b2_ref[l]
        x = _layer_norm(h1 + ffn, ln2g_ref[l], ln2b_ref[l])

    # classification head on the <s> token of each sequence (row b*SEQ of the flat batch)
    cls = jnp.concatenate([x[b * SEQ:b * SEQ + 1, :] for b in range(BATCH)], axis=0)  # (B, H)
    hd = jnp.tanh(jnp.dot(cls.astype(jnp.bfloat16), wd_ref[...],
                          preferred_element_type=jnp.float32) + bd_ref[...])
    logits_ref[...] = jnp.dot(hd.astype(jnp.bfloat16), wc_ref[...],
                              preferred_element_type=jnp.float32) + bc_ref[...]


# ----------------------------- parameter init (deterministic) -----------------------------
def _linear(key, din, dout):
    w = 0.02 * jax.random.normal(key, (din, dout), jnp.float32)   # stored (in, out)
    b = jnp.zeros((1, dout), jnp.float32)
    return w, b


def init_params(key):
    keys = jax.random.split(key, 3 + NUM_LAYERS * 6 + 2)
    p = {}
    word = 0.02 * jax.random.normal(keys[0], (VOCAB, HIDDEN), jnp.float32)
    pos = 0.02 * jax.random.normal(keys[1], (MAX_POS, HIDDEN), jnp.float32)
    # padding_idx=1 rows are zero (Roberta convention)
    p["word_emb"] = word.at[PAD_ID].set(0.0)
    p["pos_emb"] = pos.at[PAD_ID].set(0.0)
    p["type_emb"] = 0.02 * jax.random.normal(keys[2], (1, HIDDEN), jnp.float32)
    p["emb_ln_g"] = jnp.ones((1, HIDDEN), jnp.float32)
    p["emb_ln_b"] = jnp.zeros((1, HIDDEN), jnp.float32)

    wqkv, bqkv, wo, bo = [], [], [], []
    ln1g, ln1b, w1, b1, w2, b2, ln2g, ln2b = ([] for _ in range(8))
    ki = 3
    for _ in range(NUM_LAYERS):
        wq_, bq_ = _linear(keys[ki + 0], HIDDEN, HIDDEN)
        wk_, bk_ = _linear(keys[ki + 1], HIDDEN, HIDDEN)
        wv_, bv_ = _linear(keys[ki + 2], HIDDEN, HIDDEN)
        wo_, bo_ = _linear(keys[ki + 3], HIDDEN, HIDDEN)
        w1_, b1_ = _linear(keys[ki + 4], HIDDEN, INTER)
        w2_, b2_ = _linear(keys[ki + 5], INTER, HIDDEN)
        wqkv.append(jnp.concatenate([wq_, wk_, wv_], axis=1))   # (H, 3H)
        bqkv.append(jnp.concatenate([bq_, bk_, bv_], axis=1))   # (1, 3H)
        wo.append(wo_); bo.append(bo_)
        ln1g.append(jnp.ones((1, HIDDEN), jnp.float32))
        ln1b.append(jnp.zeros((1, HIDDEN), jnp.float32))
        w1.append(w1_); b1.append(b1_); w2.append(w2_); b2.append(b2_)
        ln2g.append(jnp.ones((1, HIDDEN), jnp.float32))
        ln2b.append(jnp.zeros((1, HIDDEN), jnp.float32))
        ki += 6

    # matmul weights stored bf16 (f32 accumulation in-kernel); biases / LN params stay f32
    p["wqkv"] = jnp.stack(wqkv).astype(jnp.bfloat16)
    p["bqkv"] = jnp.stack(bqkv)
    p["wo"] = jnp.stack(wo).astype(jnp.bfloat16)
    p["bo"] = jnp.stack(bo)
    p["ln1_g"] = jnp.stack(ln1g); p["ln1_b"] = jnp.stack(ln1b)
    p["w1"] = jnp.stack(w1).astype(jnp.bfloat16); p["b1"] = jnp.stack(b1)
    p["w2"] = jnp.stack(w2).astype(jnp.bfloat16); p["b2"] = jnp.stack(b2)
    p["ln2_g"] = jnp.stack(ln2g); p["ln2_b"] = jnp.stack(ln2b)

    wd_, bd_ = _linear(keys[ki], HIDDEN, HIDDEN)
    wc_, bc_ = _linear(keys[ki + 1], HIDDEN, NUM_LABELS)
    p["cls_dense_w"] = wd_.astype(jnp.bfloat16); p["cls_dense_b"] = bd_
    p["cls_out_w"] = wc_.astype(jnp.bfloat16);   p["cls_out_b"] = bc_
    return p


# ----------------------------- forward (glue in plain JAX) -----------------------------
def graphcodebert_forward(input_ids, params, labels=None):
    mask_i = (input_ids != PAD_ID).astype(jnp.int32)              # attention_mask = ids.ne(pad)
    # Roberta position ids: cumsum over non-pad positions, offset by padding_idx
    pos_ids = jnp.cumsum(mask_i, axis=1) * mask_i + PAD_ID

    word = jnp.take(params["word_emb"], input_ids, axis=0)
    pos = jnp.take(params["pos_emb"], pos_ids, axis=0)
    e = (word + pos + params["type_emb"][0]).astype(jnp.float32)  # (B, S, H)
    e = e.reshape(BS, HIDDEN)                                     # flatten batch for one block

    # Block-diagonal additive attention bias combining per-sequence masking + padding mask:
    # 0 where (same sequence AND key is not pad), -1e9 otherwise.
    key_ok = mask_i.reshape(-1).astype(jnp.float32)               # (BS,)
    seq_id = jnp.arange(BS, dtype=jnp.int32) // SEQ
    same_seq = (seq_id[:, None] == seq_id[None, :]).astype(jnp.float32)
    attn_bias = (same_seq * key_ok[None, :] - 1.0) * 1e9          # (BS, BS)

    logits = pl.pallas_call(
        fused_forward_kernel,
        out_shape=jax.ShapeDtypeStruct((BATCH, NUM_LABELS), jnp.float32),
    )(e, attn_bias,
      params["emb_ln_g"], params["emb_ln_b"],
      params["wqkv"], params["bqkv"], params["wo"], params["bo"],
      params["ln1_g"], params["ln1_b"],
      params["w1"], params["b1"], params["w2"], params["b2"],
      params["ln2_g"], params["ln2_b"],
      params["cls_dense_w"], params["cls_dense_b"],
      params["cls_out_w"], params["cls_out_b"])

    if labels is not None:
        logp = jax.nn.log_softmax(logits, axis=-1)
        nll = -jnp.take_along_axis(logp, labels[:, None], axis=1)[:, 0]
        return logits, jnp.mean(nll)                              # CrossEntropyLoss (mean)
    return logits


# ----------------------------- main -----------------------------
if __name__ == "__main__":
    key = jax.random.PRNGKey(0)
    k_ids, k_par = jax.random.split(key)

    params = init_params(k_par)

    # Deterministic synthetic "tokenized, cut-and-padded" ids (stand-in for tokenizer output).
    ids = jax.random.randint(k_ids, (BATCH, SEQ), 4, VOCAB, dtype=jnp.int32)
    ids = ids.at[:, 0].set(CLS_ID)                 # <s>
    ids = ids.at[0, 11].set(SEP_ID)                # seq 0: length 12, then padding
    ids = ids.at[0, 12:].set(PAD_ID)
    ids = ids.at[1, SEQ - 1].set(SEP_ID)           # seq 1: full length

    labels = jnp.array([0, 1], dtype=jnp.int32)

    fwd = jax.jit(lambda i, p, y: graphcodebert_forward(i, p, y))
    logits, loss = fwd(ids, params, labels)
    jax.block_until_ready((logits, loss))
    assert logits.shape == (BATCH, NUM_LABELS)
    assert bool(jnp.isfinite(loss))
    print("KERNEL_OK")
</pallas_src>

<mosaic_0001>
module attributes {stable_mosaic.version = 11 : i64} {
  func.func @fused_forward_kernel(%arg0: memref<32x128xf32, #tpu.memory_space<vmem>>, %arg1: memref<32x32xf32, #tpu.memory_space<vmem>>, %arg2: memref<1x128xf32, #tpu.memory_space<vmem>>, %arg3: memref<1x128xf32, #tpu.memory_space<vmem>>, %arg4: memref<2x128x384xbf16, #tpu.memory_space<vmem>>, %arg5: memref<2x1x384xf32, #tpu.memory_space<vmem>>, %arg6: memref<2x128x128xbf16, #tpu.memory_space<vmem>>, %arg7: memref<2x1x128xf32, #tpu.memory_space<vmem>>, %arg8: memref<2x1x128xf32, #tpu.memory_space<vmem>>, %arg9: memref<2x1x128xf32, #tpu.memory_space<vmem>>, %arg10: memref<2x128x256xbf16, #tpu.memory_space<vmem>>, %arg11: memref<2x1x256xf32, #tpu.memory_space<vmem>>, %arg12: memref<2x256x128xbf16, #tpu.memory_space<vmem>>, %arg13: memref<2x1x128xf32, #tpu.memory_space<vmem>>, %arg14: memref<2x1x128xf32, #tpu.memory_space<vmem>>, %arg15: memref<2x1x128xf32, #tpu.memory_space<vmem>>, %arg16: memref<128x128xbf16, #tpu.memory_space<vmem>>, %arg17: memref<1x128xf32, #tpu.memory_space<vmem>>, %arg18: memref<128x2xbf16, #tpu.memory_space<vmem>>, %arg19: memref<1x2xf32, #tpu.memory_space<vmem>>, %arg20: memref<2x2xf32, #tpu.memory_space<vmem>>) attributes {dimension_semantics = [], scalar_prefetch = 0 : i64, scratch_operands = 0 : i64, tpu.core_type = #tpu.core_type<tc>} {
    %c0 = arith.constant 0 : index
    %c0_0 = arith.constant 0 : index
    %0 = vector.load %arg1[%c0, %c0_0] : memref<32x32xf32, #tpu.memory_space<vmem>>, vector<32x32xf32>
    %c0_1 = arith.constant 0 : index
    %c0_2 = arith.constant 0 : index
    %1 = vector.load %arg0[%c0_1, %c0_2] : memref<32x128xf32, #tpu.memory_space<vmem>>, vector<32x128xf32>
    %c0_3 = arith.constant 0 : index
    %c0_4 = arith.constant 0 : index
    %2 = vector.load %arg2[%c0_3, %c0_4] : memref<1x128xf32, #tpu.memory_space<vmem>>, vector<1x128xf32>
    %c0_5 = arith.constant 0 : index
    %c0_6 = arith.constant 0 : index
    %3 = vector.load %arg3[%c0_5, %c0_6] : memref<1x128xf32, #tpu.memory_space<vmem>>, vector<1x128xf32>
    %cst = arith.constant dense<0.000000e+00> : vector<32xf32>
    %4 = vector.multi_reduction <add>, %1, %cst [1] : vector<32x128xf32> to vector<32xf32>
    %5 = vector.shape_cast %4 : vector<32xf32> to vector<32x1xf32>
    %cst_7 = arith.constant 1.280000e+02 : f32
    %6 = vector.broadcast %cst_7 : f32 to vector<32x1xf32>
    %7 = arith.divf %5, %6 : vector<32x1xf32>
    %8 = vector.broadcast %7 : vector<32x1xf32> to vector<32x128xf32>
    %9 = arith.subf %1, %8 : vector<32x128xf32>
    %10 = arith.mulf %9, %9 : vector<32x128xf32>
    %cst_8 = arith.constant dense<0.000000e+00> : vector<32xf32>
    %11 = vector.multi_reduction <add>, %10, %cst_8 [1] : vector<32x128xf32> to vector<32xf32>
    %12 = vector.shape_cast %11 : vector<32xf32> to vector<32x1xf32>
    %cst_9 = arith.constant 1.280000e+02 : f32
    %13 = vector.broadcast %cst_9 : f32 to vector<32x1xf32>
    %14 = arith.divf %12, %13 : vector<32x1xf32>
    %15 = vector.broadcast %7 : vector<32x1xf32> to vector<32x128xf32>
    %16 = arith.subf %1, %15 : vector<32x128xf32>
    %cst_10 = arith.constant 9.99999974E-6 : f32
    %17 = vector.broadcast %cst_10 : f32 to vector<32x1xf32>
    %18 = arith.addf %14, %17 : vector<32x1xf32>
    %19 = math.rsqrt %18 : vector<32x1xf32>
    %20 = vector.broadcast %19 : vector<32x1xf32> to vector<32x128xf32>
    %21 = arith.mulf %16, %20 : vector<32x128xf32>
    %22 = vector.broadcast %2 : vector<1x128xf32> to vector<32x128xf32>
    %23 = arith.mulf %21, %22 : vector<32x128xf32>
    %24 = vector.broadcast %3 : vector<1x128xf32> to vector<32x128xf32>
    %25 = arith.addf %23, %24 : vector<32x128xf32>
    %26 = arith.truncf %25 : vector<32x128xf32> to vector<32x128xbf16>
    %c0_11 = arith.constant 0 : index
    %c0_12 = arith.constant 0 : index
    %c0_13 = arith.constant 0 : index
    %27 = vector.load %arg4[%c0_11, %c0_12, %c0_13] : memref<2x128x384xbf16, #tpu.memory_space<vmem>>, vector<1x128x384xbf16>
    %28 = vector.shape_cast %27 : vector<1x128x384xbf16> to vector<128x384xbf16>
    %cst_14 = arith.constant dense<0.000000e+00> : vector<32x384xf32>
    %29 = tpu.matmul %26, %28, %cst_14 {dimension_numbers = #tpu.dot_dimension_numbers<[1], [0], [0], [1], [0, 0, 1, 1], [], []>} : vector<32x128xbf16>, vector<128x384xbf16>, vector<32x384xf32> -> vector<32x384xf32>
    %c0_15 = arith.constant 0 : index
    %c0_16 = arith.constant 0 : index
    %c0_17 = arith.constant 0 : index
    %30 = vector.load %arg5[%c0_15, %c0_16, %c0_17] : memref<2x1x384xf32, #tpu.memory_space<vmem>>, vector<1x1x384xf32>
    %31 = vector.shape_cast %30 : vector<1x1x384xf32> to vector<1x384xf32>
    %32 = vector.broadcast %31 : vector<1x384xf32> to vector<32x384xf32>
    %33 = arith.addf %29, %32 : vector<32x384xf32>
    %34 = vector.extract_strided_slice %33 {offsets = [0, 0], sizes = [32, 128], strides = [1, 1]} : vector<32x384xf32> to vector<32x128xf32>
    %35 = vector.extract_strided_slice %33 {offsets = [0, 128], sizes = [32, 128], strides = [1, 1]} : vector<32x384xf32> to vector<32x128xf32>
    %36 = vector.extract_strided_slice %33 {offsets = [0, 256], sizes = [32, 128], strides = [1, 1]} : vector<32x384xf32> to vector<32x128xf32>
    %c0_18 = arith.constant 0 : index
    %c0_19 = arith.constant 0 : index
    %c0_20 = arith.constant 0 : index
    %37 = vector.load %arg6[%c0_18, %c0_19, %c0_20] : memref<2x128x128xbf16, #tpu.memory_space<vmem>>, vector<1x128x128xbf16>
    %38 = vector.shape_cast %37 : vector<1x128x128xbf16> to vector<128x128xbf16>
    %cst_21 = arith.constant 0.000000e+00 : f32
    %39 = vector.broadcast %cst_21 : f32 to vector<32x128xf32>
    %c0_22 = arith.constant 0 : index
    %c0_23 = arith.constant 0 : index
    %c0_24 = arith.constant 0 : index
    %40 = vector.load %arg7[%c0_22, %c0_23, %c0_24] : memref<2x1x128xf32, #tpu.memory_space<vmem>>, vector<1x1x128xf32>
    %41 = vector.shape_cast %40 : vector<1x1x128xf32> to vector<1x128xf32>
    %42 = vector.broadcast %41 : vector<1x128xf32> to vector<32x128xf32>
    %43 = arith.addf %39, %42 : vector<32x128xf32>
    %44 = vector.extract_strided_slice %34 {offsets = [0, 0], sizes = [32, 32], strides = [1, 1]} : vector<32x128xf32> to vector<32x32xf32>
    %45 = arith.truncf %44 : vector<32x32xf32> to vector<32x32xbf16>
    %46 = vector.extract_strided_slice %35 {offsets = [0, 0], sizes = [32, 32], strides = [1, 1]} : vector<32x128xf32> to vector<32x32xf32>
    %47 = arith.truncf %46 : vector<32x32xf32> to vector<32x32xbf16>
    %48 = vector.extract_strided_slice %36 {offsets = [0, 0], sizes = [32, 32], strides = [1, 1]} : vector<32x128xf32> to vector<32x32xf32>
    %49 = arith.truncf %48 : vector<32x32xf32> to vector<32x32xbf16>
    %cst_25 = arith.constant dense<0.000000e+00> : vector<32x32xf32>
    %50 = tpu.matmul %45, %47, %cst_25 {dimension_numbers = #tpu.dot_dimension_numbers<[1], [1], [0], [0], [0, 0, 1, 0], [], []>} : vector<32x32xbf16>, vector<32x32xbf16>, vector<32x32xf32> -> vector<32x32xf32>
    %cst_26 = arith.constant 0.176776692 : f32
    %51 = vector.broadcast %cst_26 : f32 to vector<32x32xf32>
    %52 = arith.mulf %50, %51 : vector<32x32xf32>
    %53 = arith.addf %52, %0 : vector<32x32xf32>
    %cst_27 = arith.constant dense<0xFF800000> : vector<32xf32>
    %54 = vector.multi_reduction <maximumf>, %53, %cst_27 [1] : vector<32x32xf32> to vector<32xf32>
    %55 = vector.shape_cast %54 : vector<32xf32> to vector<32x1xf32>
    %56 = vector.broadcast %55 : vector<32x1xf32> to vector<32x32xf32>
    %57 = arith.subf %53, %56 : vector<32x32xf32>
    %58 = math.exp %57 : vector<32x32xf32>
    %cst_28 = arith.constant dense<0.000000e+00> : vector<32xf32>
    %59 = vector.multi_reduction <add>, %58, %cst_28 [1] : vector<32x32xf32> to vector<32xf32>
    %60 = vector.shape_cast %59 : vector<32xf32> to vector<32x1xf32>
    %61 = tpu.reciprocal %60 {approx = true} : vector<32x1xf32> -> vector<32x1xf32>
    %62 = vector.broadcast %61 : vector<32x1xf32> to vector<32x32xf32>
    %63 = arith.mulf %58, %62 : vector<32x32xf32>
    %64 = arith.truncf %63 : vector<32x32xf32> to vector<32x32xbf16>
    %cst_29 = arith.constant dense<0.000000e+00> : vector<32x32xf32>
    %65 = tpu.matmul %64, %49, %cst_29 {dimension_numbers = #tpu.dot_dimension_numbers<[1], [0], [0], [1], [0, 0, 1, 1], [], []>} : vector<32x32xbf16>, vector<32x32xbf16>, vector<32x32xf32> -> vector<32x32xf32>
    %66 = arith.truncf %65 : vector<32x32xf32> to vector<32x32xbf16>
    %67 = vector.extract_strided_slice %38 {offsets = [0, 0], sizes = [32, 128], strides = [1, 1]} : vector<128x128xbf16> to vector<32x128xbf16>
    %cst_30 = arith.constant dense<0.000000e+00> : vector<32x128xf32>
    %68 = tpu.matmul %66, %67, %cst_30 {dimension_numbers = #tpu.dot_dimension_numbers<[1], [0], [0], [1], [0, 0, 1, 1], [], []>} : vector<32x32xbf16>, vector<32x128xbf16>, vector<32x128xf32> -> vector<32x128xf32>
    %69 = arith.addf %43, %68 : vector<32x128xf32>
    %70 = vector.extract_strided_slice %34 {offsets = [0, 32], sizes = [32, 32], strides = [1, 1]} : vector<32x128xf32> to vector<32x32xf32>
    %71 = arith.truncf %70 : vector<32x32xf32> to vector<32x32xbf16>
    %72 = vector.extract_strided_slice %35 {offsets = [0, 32], sizes = [32, 32], strides = [1, 1]} : vector<32x128xf32> to vector<32x32xf32>
    %73 = arith.truncf %72 : vector<32x32xf32> to vector<32x32xbf16>
    %74 = vector.extract_strided_slice %36 {offsets = [0, 32], sizes = [32, 32], strides = [1, 1]} : vector<32x128xf32> to vector<32x32xf32>
    %75 = arith.truncf %74 : vector<32x32xf32> to vector<32x32xbf16>
    %cst_31 = arith.constant dense<0.000000e+00> : vector<32x32xf32>
    %76 = tpu.matmul %71, %73, %cst_31 {dimension_numbers = #tpu.dot_dimension_numbers<[1], [1], [0], [0], [0, 0, 1, 0], [], []>} : vector<32x32xbf16>, vector<32x32xbf16>, vector<32x32xf32> -> vector<32x32xf32>
    %cst_32 = arith.constant 0.176776692 : f32
    %77 = vector.broadcast %cst_32 : f32 to vector<32x32xf32>
    %78 = arith.mulf %76, %77 : vector<32x32xf32>
    %79 = arith.addf %78, %0 : vector<32x32xf32>
    %cst_33 = arith.constant dense<0xFF800000> : vector<32xf32>
    %80 = vector.multi_reduction <maximumf>, %79, %cst_33 [1] : vector<32x32xf32> to vector<32xf32>
    %81 = vector.shape_cast %80 : vector<32xf32> to vector<32x1xf32>
    %82 = vector.broadcast %81 : vector<32x1xf32> to vector<32x32xf32>
    %83 = arith.subf %79, %82 : vector<32x32xf32>
    %84 = math.exp %83 : vector<32x32xf32>
    %cst_34 = arith.constant dense<0.000000e+00> : vector<32xf32>
    %85 = vector.multi_reduction <add>, %84, %cst_34 [1] : vector<32x32xf32> to vector<32xf32>
    %86 = vector.shape_cast %85 : vector<32xf32> to vector<32x1xf32>
    %87 = tpu.reciprocal %86 {approx = true} : vector<32x1xf32> -> vector<32x1xf32>
    %88 = vector.broadcast %87 : vector<32x1xf32> to vector<32x32xf32>
    %89 = arith.mulf %84, %88 : vector<32x32xf32>
    %90 = arith.truncf %89 : vector<32x32xf32> to vector<32x32xbf16>
    %cst_35 = arith.constant dense<0.000000e+00> : vector<32x32xf32>
    %91 = tpu.matmul %90, %75, %cst_35 {dimension_numbers = #tpu.dot_dimension_numbers<[1], [0], [0], [1], [0, 0, 1, 1], [], []>} : vector<32x32xbf16>, vector<32x32xbf16>, vector<32x32xf32> -> vector<32x32xf32>
    %92 = arith.truncf %91 : vector<32x32xf32> to vector<32x32xbf16>
    %93 = vector.extract_strided_slice %38 {offsets = [32, 0], sizes = [32, 128], strides = [1, 1]} : vector<128x128xbf16> to vector<32x128xbf16>
    %cst_36 = arith.constant dense<0.000000e+00> : vector<32x128xf32>
    %94 = tpu.matmul %92, %93, %cst_36 {dimension_numbers = #tpu.dot_dimension_numbers<[1], [0], [0], [1], [0, 0, 1, 1], [], []>} : vector<32x32xbf16>, vector<32x128xbf16>, vector<32x128xf32> -> vector<32x128xf32>
    %95 = arith.addf %69, %94 : vector<32x128xf32>
    %96 = vector.extract_strided_slice %34 {offsets = [0, 64], sizes = [32, 32], strides = [1, 1]} : vector<32x128xf32> to vector<32x32xf32>
    %97 = arith.truncf %96 : vector<32x32xf32> to vector<32x32xbf16>
    %98 = vector.extract_strided_slice %35 {offsets = [0, 64], sizes = [32, 32], strides = [1, 1]} : vector<32x128xf32> to vector<32x32xf32>
    %99 = arith.truncf %98 : vector<32x32xf32> to vector<32x32xbf16>
    %100 = vector.extract_strided_slice %36 {offsets = [0, 64], sizes = [32, 32], strides = [1, 1]} : vector<32x128xf32> to vector<32x32xf32>
    %101 = arith.truncf %100 : vector<32x32xf32> to vector<32x32xbf16>
    %cst_37 = arith.constant dense<0.000000e+00> : vector<32x32xf32>
    %102 = tpu.matmul %97, %99, %cst_37 {dimension_numbers = #tpu.dot_dimension_numbers<[1], [1], [0], [0], [0, 0, 1, 0], [], []>} : vector<32x32xbf16>, vector<32x32xbf16>, vector<32x32xf32> -> vector<32x32xf32>
    %cst_38 = arith.constant 0.176776692 : f32
    %103 = vector.broadcast %cst_38 : f32 to vector<32x32xf32>
    %104 = arith.mulf %102, %103 : vector<32x32xf32>
    %105 = arith.addf %104, %0 : vector<32x32xf32>
    %cst_39 = arith.constant dense<0xFF800000> : vector<32xf32>
    %106 = vector.multi_reduction <maximumf>, %105, %cst_39 [1] : vector<32x32xf32> to vector<32xf32>
    %107 = vector.shape_cast %106 : vector<32xf32> to vector<32x1xf32>
    %108 = vector.broadcast %107 : vector<32x1xf32> to vector<32x32xf32>
    %109 = arith.subf %105, %108 : vector<32x32xf32>
    %110 = math.exp %109 : vector<32x32xf32>
    %cst_40 = arith.constant dense<0.000000e+00> : vector<32xf32>
    %111 = vector.multi_reduction <add>, %110, %cst_40 [1] : vector<32x32xf32> to vector<32xf32>
    %112 = vector.shape_cast %111 : vector<32xf32> to vector<32x1xf32>
    %113 = tpu.reciprocal %112 {approx = true} : vector<32x1xf32> -> vector<32x1xf32>
    %114 = vector.broadcast %113 : vector<32x1xf32> to vector<32x32xf32>
    %115 = arith.mulf %110, %114 : vector<32x32xf32>
    %116 = arith.truncf %115 : vector<32x32xf32> to vector<32x32xbf16>
    %cst_41 = arith.constant dense<0.000000e+00> : vector<32x32xf32>
    %117 = tpu.matmul %116, %101, %cst_41 {dimension_numbers = #tpu.dot_dimension_numbers<[1], [0], [0], [1], [0, 0, 1, 1], [], []>} : vector<32x32xbf16>, vector<32x32xbf16>, vector<32x32xf32> -> vector<32x32xf32>
    %118 = arith.truncf %117 : vector<32x32xf32> to vector<32x32xbf16>
    %119 = vector.extract_strided_slice %38 {offsets = [64, 0], sizes = [32, 128], strides = [1, 1]} : vector<128x128xbf16> to vector<32x128xbf16>
    %cst_42 = arith.constant dense<0.000000e+00> : vector<32x128xf32>
    %120 = tpu.matmul %118, %119, %cst_42 {dimension_numbers = #tpu.dot_dimension_numbers<[1], [0], [0], [1], [0, 0, 1, 1], [], []>} : vector<32x32xbf16>, vector<32x128xbf16>, vector<32x128xf32> -> vector<32x128xf32>
    %121 = arith.addf %95, %120 : vector<32x128xf32>
    %122 = vector.extract_strided_slice %34 {offsets = [0, 96], sizes = [32, 32], strides = [1, 1]} : vector<32x128xf32> to vector<32x32xf32>
    %123 = arith.truncf %122 : vector<32x32xf32> to vector<32x32xbf16>
    %124 = vector.extract_strided_slice %35 {offsets = [0, 96], sizes = [32, 32], strides = [1, 1]} : vector<32x128xf32> to vector<32x32xf32>
    %125 = arith.truncf %124 : vector<32x32xf32> to vector<32x32xbf16>
    %126 = vector.extract_strided_slice %36 {offsets = [0, 96], sizes = [32, 32], strides = [1, 1]} : vector<32x128xf32> to vector<32x32xf32>
    %127 = arith.truncf %126 : vector<32x32xf32> to vector<32x32xbf16>
    %cst_43 = arith.constant dense<0.000000e+00> : vector<32x32xf32>
    %128 = tpu.matmul %123, %125, %cst_43 {dimension_numbers = #tpu.dot_dimension_numbers<[1], [1], [0], [0], [0, 0, 1, 0], [], []>} : vector<32x32xbf16>, vector<32x32xbf16>, vector<32x32xf32> -> vector<32x32xf32>
    %cst_44 = arith.constant 0.176776692 : f32
    %129 = vector.broadcast %cst_44 : f32 to vector<32x32xf32>
    %130 = arith.mulf %128, %129 : vector<32x32xf32>
    %131 = arith.addf %130, %0 : vector<32x32xf32>
    %cst_45 = arith.constant dense<0xFF800000> : vector<32xf32>
    %132 = vector.multi_reduction <maximumf>, %131, %cst_45 [1] : vector<32x32xf32> to vector<32xf32>
    %133 = vector.shape_cast %132 : vector<32xf32> to vector<32x1xf32>
    %134 = vector.broadcast %133 : vector<32x1xf32> to vector<32x32xf32>
    %135 = arith.subf %131, %134 : vector<32x32xf32>
    %136 = math.exp %135 : vector<32x32xf32>
    %cst_46 = arith.constant dense<0.000000e+00> : vector<32xf32>
    %137 = vector.multi_reduction <add>, %136, %cst_46 [1] : vector<32x32xf32> to vector<32xf32>
    %138 = vector.shape_cast %137 : vector<32xf32> to vector<32x1xf32>
    %139 = tpu.reciprocal %138 {approx = true} : vector<32x1xf32> -> vector<32x1xf32>
    %140 = vector.broadcast %139 : vector<32x1xf32> to vector<32x32xf32>
    %141 = arith.mulf %136, %140 : vector<32x32xf32>
    %142 = arith.truncf %141 : vector<32x32xf32> to vector<32x32xbf16>
    %cst_47 = arith.constant dense<0.000000e+00> : vector<32x32xf32>
    %143 = tpu.matmul %142, %127, %cst_47 {dimension_numbers = #tpu.dot_dimension_numbers<[1], [0], [0], [1], [0, 0, 1, 1], [], []>} : vector<32x32xbf16>, vector<32x32xbf16>, vector<32x32xf32> -> vector<32x32xf32>
    %144 = arith.truncf %143 : vector<32x32xf32> to vector<32x32xbf16>
    %145 = vector.extract_strided_slice %38 {offsets = [96, 0], sizes = [32, 128], strides = [1, 1]} : vector<128x128xbf16> to vector<32x128xbf16>
    %cst_48 = arith.constant dense<0.000000e+00> : vector<32x128xf32>
    %146 = tpu.matmul %144, %145, %cst_48 {dimension_numbers = #tpu.dot_dimension_numbers<[1], [0], [0], [1], [0, 0, 1, 1], [], []>} : vector<32x32xbf16>, vector<32x128xbf16>, vector<32x128xf32> -> vector<32x128xf32>
    %147 = arith.addf %121, %146 : vector<32x128xf32>
    %148 = arith.addf %25, %147 : vector<32x128xf32>
    %c0_49 = arith.constant 0 : index
    %c0_50 = arith.constant 0 : index
    %c0_51 = arith.constant 0 : index
    %149 = vector.load %arg8[%c0_49, %c0_50, %c0_51] : memref<2x1x128xf32, #tpu.memory_space<vmem>>, vector<1x1x128xf32>
    %150 = vector.shape_cast %149 : vector<1x1x128xf32> to vector<1x128xf32>
    %c0_52 = arith.constant 0 : index
    %c0_53 = arith.constant 0 : index
    %c0_54 = arith.constant 0 : index
    %151 = vector.load %arg9[%c0_52, %c0_53, %c0_54] : memref<2x1x128xf32, #tpu.memory_space<vmem>>, vector<1x1x128xf32>
    %152 = vector.shape_cast %151 : vector<1x1x128xf32> to vector<1x128xf32>
    %cst_55 = arith.constant dense<0.000000e+00> : vector<32xf32>
    %153 = vector.multi_reduction <add>, %148, %cst_55 [1] : vector<32x128xf32> to vector<32xf32>
    %154 = vector.shape_cast %153 : vector<32xf32> to vector<32x1xf32>
    %cst_56 = arith.constant 1.280000e+02 : f32
    %155 = vector.broadcast %cst_56 : f32 to vector<32x1xf32>
    %156 = arith.divf %154, %155 : vector<32x1xf32>
    %157 = vector.broadcast %156 : vector<32x1xf32> to vector<32x128xf32>
    %158 = arith.subf %148, %157 : vector<32x128xf32>
    %159 = arith.mulf %158, %158 : vector<32x128xf32>
    %cst_57 = arith.constant dense<0.000000e+00> : vector<32xf32>
    %160 = vector.multi_reduction <add>, %159, %cst_57 [1] : vector<32x128xf32> to vector<32xf32>
    %161 = vector.shape_cast %160 : vector<32xf32> to vector<32x1xf32>
    %cst_58 = arith.constant 1.280000e+02 : f32
    %162 = vector.broadcast %cst_58 : f32 to vector<32x1xf32>
    %163 = arith.divf %161, %162 : vector<32x1xf32>
    %164 = vector.broadcast %156 : vector<32x1xf32> to vector<32x128xf32>
    %165 = arith.subf %148, %164 : vector<32x128xf32>
    %cst_59 = arith.constant 9.99999974E-6 : f32
    %166 = vector.broadcast %cst_59 : f32 to vector<32x1xf32>
    %167 = arith.addf %163, %166 : vector<32x1xf32>
    %168 = math.rsqrt %167 : vector<32x1xf32>
    %169 = vector.broadcast %168 : vector<32x1xf32> to vector<32x128xf32>
    %170 = arith.mulf %165, %169 : vector<32x128xf32>
    %171 = vector.broadcast %150 : vector<1x128xf32> to vector<32x128xf32>
    %172 = arith.mulf %170, %171 : vector<32x128xf32>
    %173 = vector.broadcast %152 : vector<1x128xf32> to vector<32x128xf32>
    %174 = arith.addf %172, %173 : vector<32x128xf32>
    %175 = arith.truncf %174 : vector<32x128xf32> to vector<32x128xbf16>
    %c0_60 = arith.constant 0 : index
    %c0_61 = arith.constant 0 : index
    %c0_62 = arith.constant 0 : index
    %176 = vector.load %arg10[%c0_60, %c0_61, %c0_62] : memref<2x128x256xbf16, #tpu.memory_space<vmem>>, vector<1x128x256xbf16>
    %177 = vector.shape_cast %176 : vector<1x128x256xbf16> to vector<128x256xbf16>
    %cst_63 = arith.constant dense<0.000000e+00> : vector<32x256xf32>
    %178 = tpu.matmul %175, %177, %cst_63 {dimension_numbers = #tpu.dot_dimension_numbers<[1], [0], [0], [1], [0, 0, 1, 1], [], []>} : vector<32x128xbf16>, vector<128x256xbf16>, vector<32x256xf32> -> vector<32x256xf32>
    %c0_64 = arith.constant 0 : index
    %c0_65 = arith.constant 0 : index
    %c0_66 = arith.constant 0 : index
    %179 = vector.load %arg11[%c0_64, %c0_65, %c0_66] : memref<2x1x256xf32, #tpu.memory_space<vmem>>, vector<1x1x256xf32>
    %180 = vector.shape_cast %179 : vector<1x1x256xf32> to vector<1x256xf32>
    %181 = vector.broadcast %180 : vector<1x256xf32> to vector<32x256xf32>
    %182 = arith.addf %178, %181 : vector<32x256xf32>
    %183 = arith.mulf %182, %182 : vector<32x256xf32>
    %184 = arith.mulf %182, %183 : vector<32x256xf32>
    %cst_67 = arith.constant 4.471500e-02 : f32
    %185 = vector.broadcast %cst_67 : f32 to vector<32x256xf32>
    %186 = arith.mulf %185, %184 : vector<32x256xf32>
    %187 = arith.addf %182, %186 : vector<32x256xf32>
    %cst_68 = arith.constant 0.797884583 : f32
    %188 = vector.broadcast %cst_68 : f32 to vector<32x256xf32>
    %189 = arith.mulf %188, %187 : vector<32x256xf32>
    %190 = math.tanh %189 : vector<32x256xf32>
    %cst_69 = arith.constant 1.000000e+00 : f32
    %191 = vector.broadcast %cst_69 : f32 to vector<32x256xf32>
    %192 = arith.addf %191, %190 : vector<32x256xf32>
    %cst_70 = arith.constant 5.000000e-01 : f32
    %193 = vector.broadcast %cst_70 : f32 to vector<32x256xf32>
    %194 = arith.mulf %193, %192 : vector<32x256xf32>
    %195 = arith.mulf %182, %194 : vector<32x256xf32>
    %196 = arith.truncf %195 : vector<32x256xf32> to vector<32x256xbf16>
    %c0_71 = arith.constant 0 : index
    %c0_72 = arith.constant 0 : index
    %c0_73 = arith.constant 0 : index
    %197 = vector.load %arg12[%c0_71, %c0_72, %c0_73] : memref<2x256x128xbf16, #tpu.memory_space<vmem>>, vector<1x256x128xbf16>
    %198 = vector.shape_cast %197 : vector<1x256x128xbf16> to vector<256x128xbf16>
    %cst_74 = arith.constant dense<0.000000e+00> : vector<32x128xf32>
    %199 = tpu.matmul %196, %198, %cst_74 {dimension_numbers = #tpu.dot_dimension_numbers<[1], [0], [0], [1], [0, 0, 1, 1], [], []>} : vector<32x256xbf16>, vector<256x128xbf16>, vector<32x128xf32> -> vector<32x128xf32>
    %c0_75 = arith.constant 0 : index
    %c0_76 = arith.constant 0 : index
    %c0_77 = arith.constant 0 : index
    %200 = vector.load %arg13[%c0_75, %c0_76, %c0_77] : memref<2x1x128xf32, #tpu.memory_space<vmem>>, vector<1x1x128xf32>
    %201 = vector.shape_cast %200 : vector<1x1x128xf32> to vector<1x128xf32>
    %202 = vector.broadcast %201 : vector<1x128xf32> to vector<32x128xf32>
    %203 = arith.addf %199, %202 : vector<32x128xf32>
    %204 = arith.addf %174, %203 : vector<32x128xf32>
    %c0_78 = arith.constant 0 : index
    %c0_79 = arith.constant 0 : index
    %c0_80 = arith.constant 0 : index
    %205 = vector.load %arg14[%c0_78, %c0_79, %c0_80] : memref<2x1x128xf32, #tpu.memory_space<vmem>>, vector<1x1x128xf32>
    %206 = vector.shape_cast %205 : vector<1x1x128xf32> to vector<1x128xf32>
    %c0_81 = arith.constant 0 : index
    %c0_82 = arith.constant 0 : index
    %c0_83 = arith.constant 0 : index
    %207 = vector.load %arg15[%c0_81, %c0_82, %c0_83] : memref<2x1x128xf32, #tpu.memory_space<vmem>>, vector<1x1x128xf32>
    %208 = vector.shape_cast %207 : vector<1x1x128xf32> to vector<1x128xf32>
    %cst_84 = arith.constant dense<0.000000e+00> : vector<32xf32>
    %209 = vector.multi_reduction <add>, %204, %cst_84 [1] : vector<32x128xf32> to vector<32xf32>
    %210 = vector.shape_cast %209 : vector<32xf32> to vector<32x1xf32>
    %cst_85 = arith.constant 1.280000e+02 : f32
    %211 = vector.broadcast %cst_85 : f32 to vector<32x1xf32>
    %212 = arith.divf %210, %211 : vector<32x1xf32>
    %213 = vector.broadcast %212 : vector<32x1xf32> to vector<32x128xf32>
    %214 = arith.subf %204, %213 : vector<32x128xf32>
    %215 = arith.mulf %214, %214 : vector<32x128xf32>
    %cst_86 = arith.constant dense<0.000000e+00> : vector<32xf32>
    %216 = vector.multi_reduction <add>, %215, %cst_86 [1] : vector<32x128xf32> to vector<32xf32>
    %217 = vector.shape_cast %216 : vector<32xf32> to vector<32x1xf32>
    %cst_87 = arith.constant 1.280000e+02 : f32
    %218 = vector.broadcast %cst_87 : f32 to vector<32x1xf32>
    %219 = arith.divf %217, %218 : vector<32x1xf32>
    %220 = vector.broadcast %212 : vector<32x1xf32> to vector<32x128xf32>
    %221 = arith.subf %204, %220 : vector<32x128xf32>
    %cst_88 = arith.constant 9.99999974E-6 : f32
    %222 = vector.broadcast %cst_88 : f32 to vector<32x1xf32>
    %223 = arith.addf %219, %222 : vector<32x1xf32>
    %224 = math.rsqrt %223 : vector<32x1xf32>
    %225 = vector.broadcast %224 : vector<32x1xf32> to vector<32x128xf32>
    %226 = arith.mulf %221, %225 : vector<32x128xf32>
    %227 = vector.broadcast %206 : vector<1x128xf32> to vector<32x128xf32>
    %228 = arith.mulf %226, %227 : vector<32x128xf32>
    %229 = vector.broadcast %208 : vector<1x128xf32> to vector<32x128xf32>
    %230 = arith.addf %228, %229 : vector<32x128xf32>
    %231 = arith.truncf %230 : vector<32x128xf32> to vector<32x128xbf16>
    %c1 = arith.constant 1 : index
    %c0_89 = arith.constant 0 : index
    %c0_90 = arith.constant 0 : index
    %232 = vector.load %arg4[%c1, %c0_89, %c0_90] : memref<2x128x384xbf16, #tpu.memory_space<vmem>>, vector<1x128x384xbf16>
    %233 = vector.shape_cast %232 : vector<1x128x384xbf16> to vector<128x384xbf16>
    %cst_91 = arith.constant dense<0.000000e+00> : vector<32x384xf32>
    %234 = tpu.matmul %231, %233, %cst_91 {dimension_numbers = #tpu.dot_dimension_numbers<[1], [0], [0], [1], [0, 0, 1, 1], [], []>} : vector<32x128xbf16>, vector<128x384xbf16>, vector<32x384xf32> -> vector<32x384xf32>
    %c1_92 = arith.constant 1 : index
    %c0_93 = arith.constant 0 : index
    %c0_94 = arith.constant 0 : index
    %235 = vector.load %arg5[%c1_92, %c0_93, %c0_94] : memref<2x1x384xf32, #tpu.memory_space<vmem>>, vector<1x1x384xf32>
    %236 = vector.shape_cast %235 : vector<1x1x384xf32> to vector<1x384xf32>
    %237 = vector.broadcast %236 : vector<1x384xf32> to vector<32x384xf32>
    %238 = arith.addf %234, %237 : vector<32x384xf32>
    %239 = vector.extract_strided_slice %238 {offsets = [0, 0], sizes = [32, 128], strides = [1, 1]} : vector<32x384xf32> to vector<32x128xf32>
    %240 = vector.extract_strided_slice %238 {offsets = [0, 128], sizes = [32, 128], strides = [1, 1]} : vector<32x384xf32> to vector<32x128xf32>
    %241 = vector.extract_strided_slice %238 {offsets = [0, 256], sizes = [32, 128], strides = [1, 1]} : vector<32x384xf32> to vector<32x128xf32>
    %c1_95 = arith.constant 1 : index
    %c0_96 = arith.constant 0 : index
    %c0_97 = arith.constant 0 : index
    %242 = vector.load %arg6[%c1_95, %c0_96, %c0_97] : memref<2x128x128xbf16, #tpu.memory_space<vmem>>, vector<1x128x128xbf16>
    %243 = vector.shape_cast %242 : vector<1x128x128xbf16> to vector<128x128xbf16>
    %cst_98 = arith.constant 0.000000e+00 : f32
    %244 = vector.broadcast %cst_98 : f32 to vector<32x128xf32>
    %c1_99 = arith.constant 1 : index
    %c0_100 = arith.constant 0 : index
    %c0_101 = arith.constant 0 : index
    %245 = vector.load %arg7[%c1_99, %c0_100, %c0_101] : memref<2x1x128xf32, #tpu.memory_space<vmem>>, vector<1x1x128xf32>
    %246 = vector.shape_cast %245 : vector<1x1x128xf32> to vector<1x128xf32>
    %247 = vector.broadcast %246 : vector<1x128xf32> to vector<32x128xf32>
    %248 = arith.addf %244, %247 : vector<32x128xf32>
    %249 = vector.extract_strided_slice %239 {offsets = [0, 0], sizes = [32, 32], strides = [1, 1]} : vector<32x128xf32> to vector<32x32xf32>
    %250 = arith.truncf %249 : vector<32x32xf32> to vector<32x32xbf16>
    %251 = vector.extract_strided_slice %240 {offsets = [0, 0], sizes = [32, 32], strides = [1, 1]} : vector<32x128xf32> to vector<32x32xf32>
    %252 = arith.truncf %251 : vector<32x32xf32> to vector<32x32xbf16>
    %253 = vector.extract_strided_slice %241 {offsets = [0, 0], sizes = [32, 32], strides = [1, 1]} : vector<32x128xf32> to vector<32x32xf32>
    %254 = arith.truncf %253 : vector<32x32xf32> to vector<32x32xbf16>
    %cst_102 = arith.constant dense<0.000000e+00> : vector<32x32xf32>
    %255 = tpu.matmul %250, %252, %cst_102 {dimension_numbers = #tpu.dot_dimension_numbers<[1], [1], [0], [0], [0, 0, 1, 0], [], []>} : vector<32x32xbf16>, vector<32x32xbf16>, vector<32x32xf32> -> vector<32x32xf32>
    %cst_103 = arith.constant 0.176776692 : f32
    %256 = vector.broadcast %cst_103 : f32 to vector<32x32xf32>
    %257 = arith.mulf %255, %256 : vector<32x32xf32>
    %258 = arith.addf %257, %0 : vector<32x32xf32>
    %cst_104 = arith.constant dense<0xFF800000> : vector<32xf32>
    %259 = vector.multi_reduction <maximumf>, %258, %cst_104 [1] : vector<32x32xf32> to vector<32xf32>
    %260 = vector.shape_cast %259 : vector<32xf32> to vector<32x1xf32>
    %261 = vector.broadcast %260 : vector<32x1xf32> to vector<32x32xf32>
    %262 = arith.subf %258, %261 : vector<32x32xf32>
    %263 = math.exp %262 : vector<32x32xf32>
    %cst_105 = arith.constant dense<0.000000e+00> : vector<32xf32>
    %264 = vector.multi_reduction <add>, %263, %cst_105 [1] : vector<32x32xf32> to vector<32xf32>
    %265 = vector.shape_cast %264 : vector<32xf32> to vector<32x1xf32>
    %266 = tpu.reciprocal %265 {approx = true} : vector<32x1xf32> -> vector<32x1xf32>
    %267 = vector.broadcast %266 : vector<32x1xf32> to vector<32x32xf32>
    %268 = arith.mulf %263, %267 : vector<32x32xf32>
    %269 = arith.truncf %268 : vector<32x32xf32> to vector<32x32xbf16>
    %cst_106 = arith.constant dense<0.000000e+00> : vector<32x32xf32>
    %270 = tpu.matmul %269, %254, %cst_106 {dimension_numbers = #tpu.dot_dimension_numbers<[1], [0], [0], [1], [0, 0, 1, 1], [], []>} : vector<32x32xbf16>, vector<32x32xbf16>, vector<32x32xf32> -> vector<32x32xf32>
    %271 = arith.truncf %270 : vector<32x32xf32> to vector<32x32xbf16>
    %272 = vector.extract_strided_slice %243 {offsets = [0, 0], sizes = [32, 128], strides = [1, 1]} : vector<128x128xbf16> to vector<32x128xbf16>
    %cst_107 = arith.constant dense<0.000000e+00> : vector<32x128xf32>
    %273 = tpu.matmul %271, %272, %cst_107 {dimension_numbers = #tpu.dot_dimension_numbers<[1], [0], [0], [1], [0, 0, 1, 1], [], []>} : vector<32x32xbf16>, vector<32x128xbf16>, vector<32x128xf32> -> vector<32x128xf32>
    %274 = arith.addf %248, %273 : vector<32x128xf32>
    %275 = vector.extract_strided_slice %239 {offsets = [0, 32], sizes = [32, 32], strides = [1, 1]} : vector<32x128xf32> to vector<32x32xf32>
    %276 = arith.truncf %275 : vector<32x32xf32> to vector<32x32xbf16>
    %277 = vector.extract_strided_slice %240 {offsets = [0, 32], sizes = [32, 32], strides = [1, 1]} : vector<32x128xf32> to vector<32x32xf32>
    %278 = arith.truncf %277 : vector<32x32xf32> to vector<32x32xbf16>
    %279 = vector.extract_strided_slice %241 {offsets = [0, 32], sizes = [32, 32], strides = [1, 1]} : vector<32x128xf32> to vector<32x32xf32>
    %280 = arith.truncf %279 : vector<32x32xf32> to vector<32x32xbf16>
    %cst_108 = arith.constant dense<0.000000e+00> : vector<32x32xf32>
    %281 = tpu.matmul %276, %278, %cst_108 {dimension_numbers = #tpu.dot_dimension_numbers<[1], [1], [0], [0], [0, 0, 1, 0], [], []>} : vector<32x32xbf16>, vector<32x32xbf16>, vector<32x32xf32> -> vector<32x32xf32>
    %cst_109 = arith.constant 0.176776692 : f32
    %282 = vector.broadcast %cst_109 : f32 to vector<32x32xf32>
    %283 = arith.mulf %281, %282 : vector<32x32xf32>
    %284 = arith.addf %283, %0 : vector<32x32xf32>
    %cst_110 = arith.constant dense<0xFF800000> : vector<32xf32>
    %285 = vector.multi_reduction <maximumf>, %284, %cst_110 [1] : vector<32x32xf32> to vector<32xf32>
    %286 = vector.shape_cast %285 : vector<32xf32> to vector<32x1xf32>
    %287 = vector.broadcast %286 : vector<32x1xf32> to vector<32x32xf32>
    %288 = arith.subf %284, %287 : vector<32x32xf32>
    %289 = math.exp %288 : vector<32x32xf32>
    %cst_111 = arith.constant dense<0.000000e+00> : vector<32xf32>
    %290 = vector.multi_reduction <add>, %289, %cst_111 [1] : vector<32x32xf32> to vector<32xf32>
    %291 = vector.shape_cast %290 : vector<32xf32> to vector<32x1xf32>
    %292 = tpu.reciprocal %291 {approx = true} : vector<32x1xf32> -> vector<32x1xf32>
    %293 = vector.broadcast %292 : vector<32x1xf32> to vector<32x32xf32>
    %294 = arith.mulf %289, %293 : vector<32x32xf32>
    %295 = arith.truncf %294 : vector<32x32xf32> to vector<32x32xbf16>
    %cst_112 = arith.constant dense<0.000000e+00> : vector<32x32xf32>
    %296 = tpu.matmul %295, %280, %cst_112 {dimension_numbers = #tpu.dot_dimension_numbers<[1], [0], [0], [1], [0, 0, 1, 1], [], []>} : vector<32x32xbf16>, vector<32x32xbf16>, vector<32x32xf32> -> vector<32x32xf32>
    %297 = arith.truncf %296 : vector<32x32xf32> to vector<32x32xbf16>
    %298 = vector.extract_strided_slice %243 {offsets = [32, 0], sizes = [32, 128], strides = [1, 1]} : vector<128x128xbf16> to vector<32x128xbf16>
    %cst_113 = arith.constant dense<0.000000e+00> : vector<32x128xf32>
    %299 = tpu.matmul %297, %298, %cst_113 {dimension_numbers = #tpu.dot_dimension_numbers<[1], [0], [0], [1], [0, 0, 1, 1], [], []>} : vector<32x32xbf16>, vector<32x128xbf16>, vector<32x128xf32> -> vector<32x128xf32>
    %300 = arith.addf %274, %299 : vector<32x128xf32>
    %301 = vector.extract_strided_slice %239 {offsets = [0, 64], sizes = [32, 32], strides = [1, 1]} : vector<32x128xf32> to vector<32x32xf32>
    %302 = arith.truncf %301 : vector<32x32xf32> to vector<32x32xbf16>
    %303 = vector.extract_strided_slice %240 {offsets = [0, 64], sizes = [32, 32], strides = [1, 1]} : vector<32x128xf32> to vector<32x32xf32>
    %304 = arith.truncf %303 : vector<32x32xf32> to vector<32x32xbf16>
    %305 = vector.extract_strided_slice %241 {offsets = [0, 64], sizes = [32, 32], strides = [1, 1]} : vector<32x128xf32> to vector<32x32xf32>
    %306 = arith.truncf %305 : vector<32x32xf32> to vector<32x32xbf16>
    %cst_114 = arith.constant dense<0.000000e+00> : vector<32x32xf32>
    %307 = tpu.matmul %302, %304, %cst_114 {dimension_numbers = #tpu.dot_dimension_numbers<[1], [1], [0], [0], [0, 0, 1, 0], [], []>} : vector<32x32xbf16>, vector<32x32xbf16>, vector<32x32xf32> -> vector<32x32xf32>
    %cst_115 = arith.constant 0.176776692 : f32
    %308 = vector.broadcast %cst_115 : f32 to vector<32x32xf32>
    %309 = arith.mulf %307, %308 : vector<32x32xf32>
    %310 = arith.addf %309, %0 : vector<32x32xf32>
    %cst_116 = arith.constant dense<0xFF800000> : vector<32xf32>
    %311 = vector.multi_reduction <maximumf>, %310, %cst_116 [1] : vector<32x32xf32> to vector<32xf32>
    %312 = vector.shape_cast %311 : vector<32xf32> to vector<32x1xf32>
    %313 = vector.broadcast %312 : vector<32x1xf32> to vector<32x32xf32>
    %314 = arith.subf %310, %313 : vector<32x32xf32>
    %315 = math.exp %314 : vector<32x32xf32>
    %cst_117 = arith.constant dense<0.000000e+00> : vector<32xf32>
    %316 = vector.multi_reduction <add>, %315, %cst_117 [1] : vector<32x32xf32> to vector<32xf32>
    %317 = vector.shape_cast %316 : vector<32xf32> to vector<32x1xf32>
    %318 = tpu.reciprocal %317 {approx = true} : vector<32x1xf32> -> vector<32x1xf32>
    %319 = vector.broadcast %318 : vector<32x1xf32> to vector<32x32xf32>
    %320 = arith.mulf %315, %319 : vector<32x32xf32>
    %321 = arith.truncf %320 : vector<32x32xf32> to vector<32x32xbf16>
    %cst_118 = arith.constant dense<0.000000e+00> : vector<32x32xf32>
    %322 = tpu.matmul %321, %306, %cst_118 {dimension_numbers = #tpu.dot_dimension_numbers<[1], [0], [0], [1], [0, 0, 1, 1], [], []>} : vector<32x32xbf16>, vector<32x32xbf16>, vector<32x32xf32> -> vector<32x32xf32>
    %323 = arith.truncf %322 : vector<32x32xf32> to vector<32x32xbf16>
    %324 = vector.extract_strided_slice %243 {offsets = [64, 0], sizes = [32, 128], strides = [1, 1]} : vector<128x128xbf16> to vector<32x128xbf16>
    %cst_119 = arith.constant dense<0.000000e+00> : vector<32x128xf32>
    %325 = tpu.matmul %323, %324, %cst_119 {dimension_numbers = #tpu.dot_dimension_numbers<[1], [0], [0], [1], [0, 0, 1, 1], [], []>} : vector<32x32xbf16>, vector<32x128xbf16>, vector<32x128xf32> -> vector<32x128xf32>
    %326 = arith.addf %300, %325 : vector<32x128xf32>
    %327 = vector.extract_strided_slice %239 {offsets = [0, 96], sizes = [32, 32], strides = [1, 1]} : vector<32x128xf32> to vector<32x32xf32>
    %328 = arith.truncf %327 : vector<32x32xf32> to vector<32x32xbf16>
    %329 = vector.extract_strided_slice %240 {offsets = [0, 96], sizes = [32, 32], strides = [1, 1]} : vector<32x128xf32> to vector<32x32xf32>
    %330 = arith.truncf %329 : vector<32x32xf32> to vector<32x32xbf16>
    %331 = vector.extract_strided_slice %241 {offsets = [0, 96], sizes = [32, 32], strides = [1, 1]} : vector<32x128xf32> to vector<32x32xf32>
    %332 = arith.truncf %331 : vector<32x32xf32> to vector<32x32xbf16>
    %cst_120 = arith.constant dense<0.000000e+00> : vector<32x32xf32>
    %333 = tpu.matmul %328, %330, %cst_120 {dimension_numbers = #tpu.dot_dimension_numbers<[1], [1], [0], [0], [0, 0, 1, 0], [], []>} : vector<32x32xbf16>, vector<32x32xbf16>, vector<32x32xf32> -> vector<32x32xf32>
    %cst_121 = arith.constant 0.176776692 : f32
    %334 = vector.broadcast %cst_121 : f32 to vector<32x32xf32>
    %335 = arith.mulf %333, %334 : vector<32x32xf32>
    %336 = arith.addf %335, %0 : vector<32x32xf32>
    %cst_122 = arith.constant dense<0xFF800000> : vector<32xf32>
    %337 = vector.multi_reduction <maximumf>, %336, %cst_122 [1] : vector<32x32xf32> to vector<32xf32>
    %338 = vector.shape_cast %337 : vector<32xf32> to vector<32x1xf32>
    %339 = vector.broadcast %338 : vector<32x1xf32> to vector<32x32xf32>
    %340 = arith.subf %336, %339 : vector<32x32xf32>
    %341 = math.exp %340 : vector<32x32xf32>
    %cst_123 = arith.constant dense<0.000000e+00> : vector<32xf32>
    %342 = vector.multi_reduction <add>, %341, %cst_123 [1] : vector<32x32xf32> to vector<32xf32>
    %343 = vector.shape_cast %342 : vector<32xf32> to vector<32x1xf32>
    %344 = tpu.reciprocal %343 {approx = true} : vector<32x1xf32> -> vector<32x1xf32>
    %345 = vector.broadcast %344 : vector<32x1xf32> to vector<32x32xf32>
    %346 = arith.mulf %341, %345 : vector<32x32xf32>
    %347 = arith.truncf %346 : vector<32x32xf32> to vector<32x32xbf16>
    %cst_124 = arith.constant dense<0.000000e+00> : vector<32x32xf32>
    %348 = tpu.matmul %347, %332, %cst_124 {dimension_numbers = #tpu.dot_dimension_numbers<[1], [0], [0], [1], [0, 0, 1, 1], [], []>} : vector<32x32xbf16>, vector<32x32xbf16>, vector<32x32xf32> -> vector<32x32xf32>
    %349 = arith.truncf %348 : vector<32x32xf32> to vector<32x32xbf16>
    %350 = vector.extract_strided_slice %243 {offsets = [96, 0], sizes = [32, 128], strides = [1, 1]} : vector<128x128xbf16> to vector<32x128xbf16>
    %cst_125 = arith.constant dense<0.000000e+00> : vector<32x128xf32>
    %351 = tpu.matmul %349, %350, %cst_125 {dimension_numbers = #tpu.dot_dimension_numbers<[1], [0], [0], [1], [0, 0, 1, 1], [], []>} : vector<32x32xbf16>, vector<32x128xbf16>, vector<32x128xf32> -> vector<32x128xf32>
    %352 = arith.addf %326, %351 : vector<32x128xf32>
    %353 = arith.addf %230, %352 : vector<32x128xf32>
    %c1_126 = arith.constant 1 : index
    %c0_127 = arith.constant 0 : index
    %c0_128 = arith.constant 0 : index
    %354 = vector.load %arg8[%c1_126, %c0_127, %c0_128] : memref<2x1x128xf32, #tpu.memory_space<vmem>>, vector<1x1x128xf32>
    %355 = vector.shape_cast %354 : vector<1x1x128xf32> to vector<1x128xf32>
    %c1_129 = arith.constant 1 : index
    %c0_130 = arith.constant 0 : index
    %c0_131 = arith.constant 0 : index
    %356 = vector.load %arg9[%c1_129, %c0_130, %c0_131] : memref<2x1x128xf32, #tpu.memory_space<vmem>>, vector<1x1x128xf32>
    %357 = vector.shape_cast %356 : vector<1x1x128xf32> to vector<1x128xf32>
    %cst_132 = arith.constant dense<0.000000e+00> : vector<32xf32>
    %358 = vector.multi_reduction <add>, %353, %cst_132 [1] : vector<32x128xf32> to vector<32xf32>
    %359 = vector.shape_cast %358 : vector<32xf32> to vector<32x1xf32>
    %cst_133 = arith.constant 1.280000e+02 : f32
    %360 = vector.broadcast %cst_133 : f32 to vector<32x1xf32>
    %361 = arith.divf %359, %360 : vector<32x1xf32>
    %362 = vector.broadcast %361 : vector<32x1xf32> to vector<32x128xf32>
    %363 = arith.subf %353, %362 : vector<32x128xf32>
    %364 = arith.mulf %363, %363 : vector<32x128xf32>
    %cst_134 = arith.constant dense<0.000000e+00> : vector<32xf32>
    %365 = vector.multi_reduction <add>, %364, %cst_134 [1] : vector<32x128xf32> to vector<32xf32>
    %366 = vector.shape_cast %365 : vector<32xf32> to vector<32x1xf32>
    %cst_135 = arith.constant 1.280000e+02 : f32
    %367 = vector.broadcast %cst_135 : f32 to vector<32x1xf32>
    %368 = arith.divf %366, %367 : vector<32x1xf32>
    %369 = vector.broadcast %361 : vector<32x1xf32> to vector<32x128xf32>
    %370 = arith.subf %353, %369 : vector<32x128xf32>
    %cst_136 = arith.constant 9.99999974E-6 : f32
    %371 = vector.broadcast %cst_136 : f32 to vector<32x1xf32>
    %372 = arith.addf %368, %371 : vector<32x1xf32>
    %373 = math.rsqrt %372 : vector<32x1xf32>
    %374 = vector.broadcast %373 : vector<32x1xf32> to vector<32x128xf32>
    %375 = arith.mulf %370, %374 : vector<32x128xf32>
    %376 = vector.broadcast %355 : vector<1x128xf32> to vector<32x128xf32>
    %377 = arith.mulf %375, %376 : vector<32x128xf32>
    %378 = vector.broadcast %357 : vector<1x128xf32> to vector<32x128xf32>
    %379 = arith.addf %377, %378 : vector<32x128xf32>
    %380 = arith.truncf %379 : vector<32x128xf32> to vector<32x128xbf16>
    %c1_137 = arith.constant 1 : index
    %c0_138 = arith.constant 0 : index
    %c0_139 = arith.constant 0 : index
    %381 = vector.load %arg10[%c1_137, %c0_138, %c0_139] : memref<2x128x256xbf16, #tpu.memory_space<vmem>>, vector<1x128x256xbf16>
    %382 = vector.shape_cast %381 : vector<1x128x256xbf16> to vector<128x256xbf16>
    %cst_140 = arith.constant dense<0.000000e+00> : vector<32x256xf32>
    %383 = tpu.matmul %380, %382, %cst_140 {dimension_numbers = #tpu.dot_dimension_numbers<[1], [0], [0], [1], [0, 0, 1, 1], [], []>} : vector<32x128xbf16>, vector<128x256xbf16>, vector<32x256xf32> -> vector<32x256xf32>
    %c1_141 = arith.constant 1 : index
    %c0_142 = arith.constant 0 : index
    %c0_143 = arith.constant 0 : index
    %384 = vector.load %arg11[%c1_141, %c0_142, %c0_143] : memref<2x1x256xf32, #tpu.memory_space<vmem>>, vector<1x1x256xf32>
    %385 = vector.shape_cast %384 : vector<1x1x256xf32> to vector<1x256xf32>
    %386 = vector.broadcast %385 : vector<1x256xf32> to vector<32x256xf32>
    %387 = arith.addf %383, %386 : vector<32x256xf32>
    %388 = arith.mulf %387, %387 : vector<32x256xf32>
    %389 = arith.mulf %387, %388 : vector<32x256xf32>
    %cst_144 = arith.constant 4.471500e-02 : f32
    %390 = vector.broadcast %cst_144 : f32 to vector<32x256xf32>
    %391 = arith.mulf %390, %389 : vector<32x256xf32>
    %392 = arith.addf %387, %391 : vector<32x256xf32>
    %cst_145 = arith.constant 0.797884583 : f32
    %393 = vector.broadcast %cst_145 : f32 to vector<32x256xf32>
    %394 = arith.mulf %393, %392 : vector<32x256xf32>
    %395 = math.tanh %394 : vector<32x256xf32>
    %cst_146 = arith.constant 1.000000e+00 : f32
    %396 = vector.broadcast %cst_146 : f32 to vector<32x256xf32>
    %397 = arith.addf %396, %395 : vector<32x256xf32>
    %cst_147 = arith.constant 5.000000e-01 : f32
    %398 = vector.broadcast %cst_147 : f32 to vector<32x256xf32>
    %399 = arith.mulf %398, %397 : vector<32x256xf32>
    %400 = arith.mulf %387, %399 : vector<32x256xf32>
    %401 = arith.truncf %400 : vector<32x256xf32> to vector<32x256xbf16>
    %c1_148 = arith.constant 1 : index
    %c0_149 = arith.constant 0 : index
    %c0_150 = arith.constant 0 : index
    %402 = vector.load %arg12[%c1_148, %c0_149, %c0_150] : memref<2x256x128xbf16, #tpu.memory_space<vmem>>, vector<1x256x128xbf16>
    %403 = vector.shape_cast %402 : vector<1x256x128xbf16> to vector<256x128xbf16>
    %cst_151 = arith.constant dense<0.000000e+00> : vector<32x128xf32>
    %404 = tpu.matmul %401, %403, %cst_151 {dimension_numbers = #tpu.dot_dimension_numbers<[1], [0], [0], [1], [0, 0, 1, 1], [], []>} : vector<32x256xbf16>, vector<256x128xbf16>, vector<32x128xf32> -> vector<32x128xf32>
    %c1_152 = arith.constant 1 : index
    %c0_153 = arith.constant 0 : index
    %c0_154 = arith.constant 0 : index
    %405 = vector.load %arg13[%c1_152, %c0_153, %c0_154] : memref<2x1x128xf32, #tpu.memory_space<vmem>>, vector<1x1x128xf32>
    %406 = vector.shape_cast %405 : vector<1x1x128xf32> to vector<1x128xf32>
    %407 = vector.broadcast %406 : vector<1x128xf32> to vector<32x128xf32>
    %408 = arith.addf %404, %407 : vector<32x128xf32>
    %409 = arith.addf %379, %408 : vector<32x128xf32>
    %c1_155 = arith.constant 1 : index
    %c0_156 = arith.constant 0 : index
    %c0_157 = arith.constant 0 : index
    %410 = vector.load %arg14[%c1_155, %c0_156, %c0_157] : memref<2x1x128xf32, #tpu.memory_space<vmem>>, vector<1x1x128xf32>
    %411 = vector.shape_cast %410 : vector<1x1x128xf32> to vector<1x128xf32>
    %c1_158 = arith.constant 1 : index
    %c0_159 = arith.constant 0 : index
    %c0_160 = arith.constant 0 : index
    %412 = vector.load %arg15[%c1_158, %c0_159, %c0_160] : memref<2x1x128xf32, #tpu.memory_space<vmem>>, vector<1x1x128xf32>
    %413 = vector.shape_cast %412 : vector<1x1x128xf32> to vector<1x128xf32>
    %cst_161 = arith.constant dense<0.000000e+00> : vector<32xf32>
    %414 = vector.multi_reduction <add>, %409, %cst_161 [1] : vector<32x128xf32> to vector<32xf32>
    %415 = vector.shape_cast %414 : vector<32xf32> to vector<32x1xf32>
    %cst_162 = arith.constant 1.280000e+02 : f32
    %416 = vector.broadcast %cst_162 : f32 to vector<32x1xf32>
    %417 = arith.divf %415, %416 : vector<32x1xf32>
    %418 = vector.broadcast %417 : vector<32x1xf32> to vector<32x128xf32>
    %419 = arith.subf %409, %418 : vector<32x128xf32>
    %420 = arith.mulf %419, %419 : vector<32x128xf32>
    %cst_163 = arith.constant dense<0.000000e+00> : vector<32xf32>
    %421 = vector.multi_reduction <add>, %420, %cst_163 [1] : vector<32x128xf32> to vector<32xf32>
    %422 = vector.shape_cast %421 : vector<32xf32> to vector<32x1xf32>
    %cst_164 = arith.constant 1.280000e+02 : f32
    %423 = vector.broadcast %cst_164 : f32 to vector<32x1xf32>
    %424 = arith.divf %422, %423 : vector<32x1xf32>
    %425 = vector.broadcast %417 : vector<32x1xf32> to vector<32x128xf32>
    %426 = arith.subf %409, %425 : vector<32x128xf32>
    %cst_165 = arith.constant 9.99999974E-6 : f32
    %427 = vector.broadcast %cst_165 : f32 to vector<32x1xf32>
    %428 = arith.addf %424, %427 : vector<32x1xf32>
    %429 = math.rsqrt %428 : vector<32x1xf32>
    %430 = vector.broadcast %429 : vector<32x1xf32> to vector<32x128xf32>
    %431 = arith.mulf %426, %430 : vector<32x128xf32>
    %432 = vector.broadcast %411 : vector<1x128xf32> to vector<32x128xf32>
    %433 = arith.mulf %431, %432 : vector<32x128xf32>
    %434 = vector.broadcast %413 : vector<1x128xf32> to vector<32x128xf32>
    %435 = arith.addf %433, %434 : vector<32x128xf32>
    %436 = vector.extract_strided_slice %435 {offsets = [0, 0], sizes = [1, 128], strides = [1, 1]} : vector<32x128xf32> to vector<1x128xf32>
    %437 = vector.extract_strided_slice %435 {offsets = [16, 0], sizes = [1, 128], strides = [1, 1]} : vector<32x128xf32> to vector<1x128xf32>
    %438 = tpu.concatenate %436, %437 in 0 : vector<1x128xf32>, vector<1x128xf32> -> vector<2x128xf32>
    %439 = arith.truncf %438 : vector<2x128xf32> to vector<2x128xbf16>
    %c0_166 = arith.constant 0 : index
    %c0_167 = arith.constant 0 : index
    %440 = vector.load %arg16[%c0_166, %c0_167] : memref<128x128xbf16, #tpu.memory_space<vmem>>, vector<128x128xbf16>
    %cst_168 = arith.constant dense<0.000000e+00> : vector<2x128xf32>
    %441 = tpu.matmul %439, %440, %cst_168 {dimension_numbers = #tpu.dot_dimension_numbers<[1], [0], [0], [1], [0, 0, 1, 1], [], []>} : vector<2x128xbf16>, vector<128x128xbf16>, vector<2x128xf32> -> vector<2x128xf32>
    %c0_169 = arith.constant 0 : index
    %c0_170 = arith.constant 0 : index
    %442 = vector.load %arg17[%c0_169, %c0_170] : memref<1x128xf32, #tpu.memory_space<vmem>>, vector<1x128xf32>
    %443 = vector.broadcast %442 : vector<1x128xf32> to vector<2x128xf32>
    %444 = arith.addf %441, %443 : vector<2x128xf32>
    %445 = math.tanh %444 : vector<2x128xf32>
    %446 = arith.truncf %445 : vector<2x128xf32> to vector<2x128xbf16>
    %c0_171 = arith.constant 0 : index
    %c0_172 = arith.constant 0 : index
    %447 = vector.load %arg18[%c0_171, %c0_172] : memref<128x2xbf16, #tpu.memory_space<vmem>>, vector<128x2xbf16>
    %cst_173 = arith.constant dense<0.000000e+00> : vector<2x2xf32>
    %448 = tpu.matmul %446, %447, %cst_173 {dimension_numbers = #tpu.dot_dimension_numbers<[1], [0], [0], [1], [0, 0, 1, 1], [], []>} : vector<2x128xbf16>, vector<128x2xbf16>, vector<2x2xf32> -> vector<2x2xf32>
    %c0_174 = arith.constant 0 : index
    %c0_175 = arith.constant 0 : index
    %449 = vector.load %arg19[%c0_174, %c0_175] : memref<1x2xf32, #tpu.memory_space<vmem>>, vector<1x2xf32>
    %450 = vector.broadcast %449 : vector<1x2xf32> to vector<2x2xf32>
    %451 = arith.addf %448, %450 : vector<2x2xf32>
    %c0_176 = arith.constant 0 : index
    %c0_177 = arith.constant 0 : index
    %452 = vector.load %arg20[%c0_176, %c0_177] : memref<2x2xf32, #tpu.memory_space<vmem>>, vector<2x2xf32>
    tpu.vector_store %arg20[%c0_176, %c0_177], %451 {strides = array<i32>} : memref<2x2xf32, #tpu.memory_space<vmem>>, vector<2x2xf32>,
    return
  }
}

</mosaic_0001>

<bundles_post_ra>
// kernel: _lambda_.1
= control target key start
LH: loop header
LB: loop body
LE: loop exit
PB: predicated region body
PF: predicated region fallthrough
CT: control target
= control target key end

     0   :  { %s6512_s0 = inlined_call_operand.vmem [shape: f32[32,128], index: 0, kind: input, shape index: {}]   ;;  %s6513_s1 = inlined_call_operand.vmem [shape: f32[32,32], index: 1, kind: input, shape index: {}]   ;;  %s6514_s2 = inlined_call_operand.vmem [shape: f32[1,128], index: 2, kind: input, shape index: {}]   ;;  %s6515_s3 = inlined_call_operand.vmem [shape: f32[1,128], index: 3, kind: input, shape index: {}]   ;;  %s6516_s4 = inlined_call_operand.vmem [shape: bf16[2,128,384], index: 4, kind: input, shape index: {}]   ;;  %s6517_s5 = inlined_call_operand.vmem [shape: f32[2,1,384], index: 5, kind: input, shape index: {}]   ;;  %s6518_s6 = inlined_call_operand.vmem [shape: bf16[2,128,128], index: 6, kind: input, shape index: {}]   ;;  %s6519_s7 = inlined_call_operand.vmem [shape: f32[2,1,128], index: 7, kind: input, shape index: {}]   ;;  %s6520_s8 = inlined_call_operand.vmem [shape: f32[2,1,128], index: 8, kind: input, shape index: {}]   ;;  %s6521_s9 = inlined_call_operand.vmem [shape: f32[2,1,128], index: 9, kind: input, shape index: {}]   ;;  %s6522_s10 = inlined_call_operand.vmem [shape: bf16[2,128,256], index: 10, kind: input, shape index: {}]   ;;  %s6523_s11 = inlined_call_operand.vmem [shape: f32[2,1,256], index: 11, kind: input, shape index: {}]   ;;  %s6524_s12 = inlined_call_operand.hbm [shape: bf16[2,256,128], index: 12, kind: input, shape index: {}]   ;;  %s6525_s13 = inlined_call_operand.vmem [shape: f32[2,1,128], index: 13, kind: input, shape index: {}]   ;;  %s6526_s14 = inlined_call_operand.vmem [shape: f32[2,1,128], index: 14, kind: input, shape index: {}]   ;;  %s6527_s15 = inlined_call_operand.vmem [shape: f32[2,1,128], index: 15, kind: input, shape index: {}]   ;;  %s6528_s16 = inlined_call_operand.vmem [shape: bf16[128,128], index: 16, kind: input, shape index: {}]   ;;  %s6529_s17 = inlined_call_operand.vmem [shape: f32[1,128], index: 17, kind: input, shape index: {}]   ;;  %s6530_s18 = inlined_call_operand.vmem [shape: bf16[128,2], index: 18, kind: input, shape index: {}]   ;;  %s6531_s19 = inlined_call_operand.vmem [shape: f32[1,2], index: 19, kind: input, shape index: {}]   ;;  %s6532_s20 = inlined_call_operand.vmem [shape: f32[2,2], index: 20, kind: output, shape index: {}]  }
   0x1   :  { %6536 = sst [smem:[#allocation5_spill]] %s6512_s0 }
   0x2   :  { %6537 = sst [smem:[#allocation6_spill]] %s6513_s1 }
   0x3   :  { %6538 = sst [smem:[#allocation7_spill]] %s6514_s2 }
   0x4   :  { %6539 = sst [smem:[#allocation8_spill]] %s6515_s3 }
   0x5   :  { %6540 = sst [smem:[#allocation9_spill]] %s6516_s4 }
   0x6   :  { %25 = vsyncpa [#allocation3], 0  ;;  %s5363_s1 = smov [#allocation2]   ;;  %s5339_s2 = scalar_lea.hbm %s6524_s12, 4096 }
   0x7   :  { %s55_s22 = sshll.u32 %s5363_s1, 4  ;;  %p5340_p0 = scmp.ne.s32.totalorder %s6524_s12, %s5339_s2  ;;  %s56_s22 = int_to_ptr.vmem [resolvable:$true] %s55_s22 }
   0x8   :  { %p5343_p1 = scmp.lt.u32.totalorder %s5339_s2, %s6524_s12 }
   0xa   :  { %p5345_p2 = pnand %p5343_p1, %p5340_p0 }
   0xc   :  { %5348 = shalt.err (!%p5345_p2)
}
   0xd   :  { %s5349_s28 = scalar_lea.vmem %s56_s22, 4096  ;;  %p5354_p4 = scmp.lt.s32.totalorder %s56_s22, %s56_s22 }
   0xe   :  { %p5350_p3 = scmp.ne.s32.totalorder %s56_s22, %s5349_s28  ;;  %p5355_p5 = scmp.lt.s32.totalorder %s5349_s28, %s5349_s28 }
  0x10   :  { %p5356_p6 = por %p5355_p5, %p5354_p4 }
  0x12   :  { %p5357_p7 = pnand %p5356_p6, %p5350_p3 }
  0x14   :  { %5360 = shalt.err (!%p5357_p7)
}
  0x15   :  { %s5364_s4 = smov 64   ;;  %s5365_s29 = smov 4  }
  0x16   :  { %61 = dma.hbm_to_vmem [thread:$0]  %s6524_s12, 4096, %s56_s22, [#allocation3], %s5364_s4, %s5364_s4, %s5365_s29  }
  0x17   :  { %5361 = dma.done.wait [#allocation3], 4096  }
  0x18   :  { %5362 = vsyncadd [#allocation3], 4294963200  ;;  %s6541_s23 = sld [smem:[#allocation5_spill]]  ;;  %s6542_s28 = sld [smem:[#allocation9_spill]]  ;;  %v5366_v39 = vmov 0   ;;  %vm466_vm0 = vcmask 261120  }
  0x19   :  { %366 = vmatprep.mubr.bf16.mxu0 %v5366_v39  ;;  %s6544_s3 = sld [smem:[#allocation8_spill]]  ;;  %s5367_s12 = smov 96   ;;  %vm5370_vm1 = vmmov 0   ;;  %vm3929_vm2 = vcmask 1040384   ;;  %vm4156_vm3 = vcmask 9216  }
  0x1a   :  { %s6545_s30 = sld [smem:[#allocation6_spill]]  ;;  %s5368_s22 = smov 32  }
  0x1e   :  { %v84_v0 = vld [vmem:[%s6541_s23] sm:$0xff]  ;;  %v86_v1 = vld [vmem:[%s6541_s23 + $0x10] sm:$0xff]  ;;  %v85_v2 = vld [vmem:[%s6541_s23 + $0x8] sm:$0xff] }
  0x1f   :  { %90 = vadd.xlane.f32.xlu0 %v84_v0  ;;  %94 = vadd.xlane.f32.xlu1 %v86_v1  ;;  %v87_v3 = vld [vmem:[%s6541_s23 + $0x18] sm:$0xff]  ;;  %v4961_v4 = vld [vmem:[%s6542_s28 + $0x4] ss:$12 sps:$4 sm:$0xff]   ;;  %v4963_v5 = vld [vmem:[%s6542_s28] ss:$12 sps:$4 sm:$0xff]   ;;  %s6543_s23 = sld [smem:[#allocation7_spill]] }
  0x20   :  { %v4964_v6 = vld [vmem:[%s6542_s28 + $0x1c] ss:$12 sps:$4 sm:$0xff]   ;;  %334 = vmatprep.subr.bf16.mxu0 %v4961_v4  ;;  %v4967_v24 = vld [vmem:[%s6542_s28 + $0x18] ss:$12 sps:$4 sm:$0xff]   ;;  %v4968_v25 = vld [vmem:[%s6542_s28 + $0x34] ss:$12 sps:$4 sm:$0xff]  }
  0x21   :  { %v4966_v7 = vld [vmem:[%s6542_s28 + $0x8] ss:$12 sps:$4 sm:$0xff]   ;;  %335 = vmatpush1.bf16.msra.mxu0 %v4963_v5  ;;  %v4970_v26 = vld [vmem:[%s6542_s28 + $0x20] ss:$12 sps:$4 sm:$0xff]   ;;  %v4971_v27 = vld [vmem:[%s6542_s28 + $0x30] ss:$12 sps:$4 sm:$0xff]  }
  0x22   :  { %4633 = vmatprep.subr.bf16.mxu1 %v4966_v7  ;;  %336 = vmatprep.subr.bf16.mxu0 %v4964_v6  ;;  %v4972_v28 = vld [vmem:[%s6542_s28 + $0x4c] ss:$12 sps:$4 sm:$0xff]   ;;  %v4975_v30 = vld [vmem:[%s6542_s28 + $0x48] ss:$12 sps:$4 sm:$0xff]   ;;  %v4976_v31 = vld [vmem:[%s6542_s28 + $0x64] ss:$12 sps:$4 sm:$0xff]  }
  0x23   :  { %92 = vadd.xlane.f32.xlu0 %v85_v2  ;;  %96 = vadd.xlane.f32.xlu1 %v87_v3  ;;  %v4974_v29 = vld [vmem:[%s6542_s28 + $0x38] ss:$12 sps:$4 sm:$0xff]   ;;  %v4978_v32 = vld [vmem:[%s6542_s28 + $0x50] ss:$12 sps:$4 sm:$0xff]   ;;  %v4979_v33 = vld [vmem:[%s6542_s28 + $0x60] ss:$12 sps:$4 sm:$0xff]  }
  0x24   :  { %4634 = vmatpush3.bf16.msra.mxu1 %v4966_v7  ;;  %v4980_v34 = vld [vmem:[%s6542_s28 + $0x7c] ss:$12 sps:$4 sm:$0xff]   ;;  %v4983_v36 = vld [vmem:[%s6542_s28 + $0x78] ss:$12 sps:$4 sm:$0xff]   ;;  %v4984_v37 = vld [vmem:[%s6542_s28 + $0x94] ss:$12 sps:$4 sm:$0xff]  }
  0x25   :  { %337 = vmatpush1.bf16.msra.mxu0 %v4967_v24  ;;  %4635 = vmatprep.subr.bf16.mxu1 %v4970_v26  ;;  %v4982_v35 = vld [vmem:[%s6542_s28 + $0x68] ss:$12 sps:$4 sm:$0xff]   ;;  %v4986_v38 = vld [vmem:[%s6542_s28 + $0x80] ss:$12 sps:$4 sm:$0xff]   ;;  %v4987_v40 = vld [vmem:[%s6542_s28 + $0x90] ss:$12 sps:$4 sm:$0xff]  }
  0x26   :  { %338 = vmatprep.subr.bf16.mxu0 %v4968_v25  ;;  %v4988_v41 = vld [vmem:[%s6542_s28 + $0xac] ss:$12 sps:$4 sm:$0xff]   ;;  %v4991_v43 = vld [vmem:[%s6542_s28 + $0xa8] ss:$12 sps:$4 sm:$0xff]   ;;  %v4992_v44 = vld [vmem:[%s6542_s28 + $0xb0] ss:$12 sps:$4 sm:$0xff]  }
  0x27   :  { %v4990_v42 = vld [vmem:[%s6542_s28 + $0x98] ss:$12 sps:$4 sm:$0xff]   ;;  %v4163_v59 = vld [vmem:[%s6543_s23] ss:$0 sm:$0xff] }
  0x28   :  { %4636 = vmatpush3.bf16.msra.mxu1 %v4970_v26 }
  0x29   :  { %339 = vmatpush1.bf16.msra.mxu0 %v4971_v27  ;;  %4637 = vmatprep.subr.bf16.mxu1 %v4974_v29 }
  0x2a   :  { %340 = vmatprep.subr.bf16.mxu0 %v4972_v28 }
  0x2c   :  { %4638 = vmatpush3.bf16.msra.mxu1 %v4974_v29 }
  0x2d   :  { %341 = vmatpush1.bf16.msra.mxu0 %v4975_v30  ;;  %4639 = vmatprep.subr.bf16.mxu1 %v4978_v32 }
  0x2e   :  { %342 = vmatprep.subr.bf16.mxu0 %v4976_v31 }
  0x30   :  { %4640 = vmatpush3.bf16.msra.mxu1 %v4978_v32 }
  0x31   :  { %343 = vmatpush1.bf16.msra.mxu0 %v4979_v33  ;;  %4641 = vmatprep.subr.bf16.mxu1 %v4982_v35 }
  0x32   :  { %344 = vmatprep.subr.bf16.mxu0 %v4980_v34 }
  0x34   :  { %4642 = vmatpush3.bf16.msra.mxu1 %v4982_v35 }
  0x35   :  { %345 = vmatpush1.bf16.msra.mxu0 %v4983_v36  ;;  %4643 = vmatprep.subr.bf16.mxu1 %v4986_v38 }
  0x36   :  { %346 = vmatprep.subr.bf16.mxu0 %v4984_v37 }
  0x38   :  { %4644 = vmatpush3.bf16.msra.mxu1 %v4986_v38 }
  0x39   :  { %347 = vmatpush1.bf16.msra.mxu0 %v4987_v40  ;;  %4645 = vmatprep.subr.bf16.mxu1 %v4990_v42 }
  0x3a   :  { %348 = vmatprep.subr.bf16.mxu0 %v4988_v41 }
  0x3c   :  { %4646 = vmatpush3.bf16.msra.mxu1 %v4990_v42 }
  0x3d   :  { %349 = vmatpush1.bf16.msra.mxu0 %v4991_v43  ;;  %4647 = vmatprep.subr.bf16.mxu1 %v4992_v44 }
  0x40   :  { %4648 = vmatpush3.bf16.msra.mxu1 %v4992_v44 }
  0xac   :  { %v91_v8 = vpop.xlane.xlu0 %90  ;;  %v95_v9 = vpop.xlane.xlu1 %94 }
  0xad   :  { %v99_v10 = vmul.f32 0.0078125, %v91_v8  ;;  %v101_v11 = vmul.f32 0.0078125, %v95_v9 }
  0xaf   :  { %v5514_v12 = vsub.f32 %v84_v0, %v99_v10  ;;  %v5516_v13 = vsub.f32 %v86_v1, %v101_v11  ;;  %v4164_v0 = vld [vmem:[%s6544_s3] ss:$0 sm:$0xff] }
  0xb0   :  { %v93_v14 = vpop.xlane.xlu0 %92  ;;  %v97_v15 = vpop.xlane.xlu1 %96 }
  0xb1   :  { %v100_v16 = vmul.f32 0.0078125, %v93_v14  ;;  %v107_v17 = vmul.f32 %v5514_v12, %v5514_v12  ;;  %v102_v18 = vmul.f32 0.0078125, %v97_v15  ;;  %v109_v19 = vmul.f32 %v5516_v13, %v5516_v13 }
  0xb3   :  { %111 = vadd.xlane.f32.xlu0 %v107_v17  ;;  %v5522_v20 = vsub.f32 %v85_v2, %v100_v16  ;;  %v5524_v21 = vsub.f32 %v87_v3, %v102_v18  ;;  %v189_v16 = vld [vmem:[%s6517_s5] sm:$0x7] }
  0xb5   :  { %v108_v22 = vmul.f32 %v5522_v20, %v5522_v20  ;;  %v110_v23 = vmul.f32 %v5524_v21, %v5524_v21 }
  0xb7   :  { %115 = vadd.xlane.f32.xlu0 %v109_v19  ;;  %113 = vadd.xlane.f32.xlu1 %v108_v22 }
  0xbb   :  { %117 = vadd.xlane.f32.xlu1 %v110_v23 }
 0x140   :  { %v112_v45 = vpop.xlane.xlu0 %111 }
 0x141   :  { %v119_v46 = vmul.f32 0.0078125, %v112_v45 }
 0x143   :  { %v123_v47 = vadd.f32 1e-05, %v119_v46 }
 0x144   :  { %v114_v48 = vpop.xlane.xlu1 %113  ;;  %v116_v49 = vpop.xlane.xlu0 %115 }
 0x145   :  { %5137 = vrsqrt.f32 %v123_v47  ;;  %v120_v50 = vmul.f32 0.0078125, %v114_v48  ;;  %v121_v51 = vmul.f32 0.0078125, %v116_v49 }
 0x147   :  { %v124_v52 = vadd.f32 1e-05, %v120_v50  ;;  %v125_v53 = vadd.f32 1e-05, %v121_v51 }
 0x148   :  { %v118_v54 = vpop.xlane.xlu1 %117 }
 0x149   :  { %5139 = vrsqrt.f32 %v124_v52  ;;  %v122_v55 = vmul.f32 0.0078125, %v118_v54 }
 0x14a   :  { %5141 = vrsqrt.f32 %v125_v53 }
 0x14b   :  { %v126_v56 = vadd.f32 1e-05, %v122_v55 }
 0x14d   :  { %5143 = vrsqrt.f32 %v126_v56 }
 0x14f   :  { %v5138_v57 = vpop.eup %5137 }
 0x150   :  { %v131_v58 = vmul.f32 %v5138_v57, %v5514_v12 }
 0x152   :  { %v141_v63 = vmul.f32 %v4163_v59, %v131_v58 }
 0x153   :  { %v5140_v60 = vpop.eup %5139 }
 0x154   :  { %v5142_v61 = vpop.eup %5141  ;;  %v132_v62 = vmul.f32 %v5140_v60, %v5522_v20  ;;  %v5600_v4 = vadd.f32 %v4164_v0, %v141_v63  ;;  %v5675_v63 = vld [vmem:[%s6545_s30] sm:$0xff] }
 0x155   :  { %v133_v1 = vmul.f32 %v5142_v61, %v5516_v13  ;;  %v191_v13 = vlaneseq }
 0x156   :  { %v142_v2 = vmul.f32 %v4163_v59, %v132_v62 }
 0x157   :  { %v5144_v3 = vpop.eup %5143  ;;  %v143_v7 = vmul.f32 %v4163_v59, %v133_v1  ;;  %v5614_v14 = vshrl.u32 %v191_v13, 7 }
 0x158   :  { %v5602_v5 = vadd.f32 %v4164_v0, %v142_v2  ;;  %v134_v6 = vmul.f32 %v5144_v3, %v5524_v21 }
 0x159   :  { %v5607_v10 = vadd.f32 %v4164_v0, %v143_v7  ;;  %v5617_v15 = vsub.s32 0, %v5614_v14  ;;  %v5623_v17 = vsub.s32 1, %v5614_v14  ;;  %v201_v19 = vsub.s32 2, %v5614_v14  ;;  %v5685_v7 = vld [vmem:[%s6545_s30 + $0x10] sm:$0xff] }
 0x15a   :  { %v155_v8 = vpack.c.bf16 %v5602_v5, %v5600_v4  ;;  %v144_v9 = vmul.f32 %v4163_v59, %v134_v6  ;;  %v5680_v6 = vld [vmem:[%s6545_s30 + $0x8] sm:$0xff] }
 0x15b   :  { %v194_v18 = vrot.slane %v189_v16, %v5617_v15  ;;  %v198_v21 = vrot.slane %v189_v16, %v5623_v17  ;;  %v202_v27 = vrot.slane %v189_v16, %v201_v19 }
 0x15c   :  { %367 = vmatmul.mubr.bf16.vlgmr.msra.gmra.mrb[0].mxu0 %v155_v8  ;;  %4649 = vmatprep.mubr.bf16.mxu1 %v155_v8  ;;  %v5609_v11 = vadd.f32 %v4164_v0, %v144_v9 }
 0x15d   :  { %376 = vmatprep.mubr.bf16.mxu0 %v5366_v39 }
 0x15e   :  { %v156_v12 = vpack.c.bf16 %v5609_v11, %v5607_v10 }
 0x160   :  { %4650 = vmatmul.mubr.bf16.vlgmr.msra.gmra.mrb[0].mxu1 %v156_v12 }
 0x164   :  { %377 = vmatmul.mubr.bf16.gmra.mrb[4].mxu0 %v156_v12 }
 0x22f   :  { %v368_v20 = vpop.f32.mrb[0].mxu0 }
 0x230   :  { %v370_v22 = vpop.f32.mrb[1].mxu0  ;;  %v369_v24 = vadd.f32 %v368_v20, %v194_v18  ;;  %v5694_v20 = vld [vmem:[%s6545_s30 + $0x18] sm:$0xff] }
 0x231   :  { %v372_v23 = vpop.f32.mrb[2].mxu0  ;;  %v371_v28 = vadd.f32 %v370_v22, %v198_v21 }
 0x232   :  { %v373_v25 = vadd.f32 %v372_v23, %v194_v18  ;;  %v374_v26 = vpop.f32.mrb[3].mxu0 }
 0x233   :  { %v375_v29 = vadd.f32 %v374_v26, %v198_v21  ;;  %v4651_v30 = vpop.f32.mrb[0].mxu1 }
 0x234   :  { %v5630_v31 = vpack.c.bf16 %v373_v25, %v369_v24  ;;  %v421_v32 = vpop.f32.mrb[1].mxu1  ;;  %v430_v35 = vadd.f32 %v4651_v30, %v202_v27 }
 0x235   :  { %v5632_v33 = vpack.c.bf16 %v375_v29, %v371_v28  ;;  %v4652_v34 = vpop.f32.mrb[2].mxu1  ;;  %v422_v38 = vadd.f32 %v421_v32, %v202_v27 }
 0x236   :  { %v433_v36 = vadd.f32 %v4652_v34, %v202_v27  ;;  %v424_v37 = vpop.f32.mrb[3].mxu1  ;;  %4657 = vmatprep.mubr.msk.bf16.mxu0 %vm466_vm0, %v5630_v31 }
 0x237   :  { %v425_v40 = vadd.f32 %v424_v37, %v202_v27  ;;  %718 = vrot.lane.b32.xlu0 %v5632_v33, %s5367_s12  ;;  %v378_v41 = vpop.f32.mrb[4].mxu0  ;;  %4937 = vmatprep.subr.msk.bf16.mxu0 %vm466_vm0, %v5632_v33  ;;  %v474_v42 = vsel %vm466_vm0, %v5632_v33, 0 }
 0x238   :  { %v5642_v43 = vpack.c.bf16 %v433_v36, %v430_v35  ;;  %v380_v44 = vpop.f32.mrb[5].mxu0  ;;  %4654 = vmatpush3.bf16.xpose.msra.mxu0 %v474_v42  ;;  %v379_v47 = vadd.f32 %v378_v41, %v194_v18 }
 0x239   :  { %v5644_v45 = vpack.c.bf16 %v425_v40, %v422_v38  ;;  %v382_v46 = vpop.f32.mrb[6].mxu0  ;;  %v381_v50 = vadd.f32 %v380_v44, %v198_v21 }
 0x23a   :  { %v383_v48 = vadd.f32 %v382_v46, %v194_v18  ;;  %v384_v49 = vpop.f32.mrb[7].mxu0 }
 0x23b   :  { %v385_v51 = vadd.f32 %v384_v49, %v198_v21  ;;  %4661 = vmatprep.subr.bf16.mxu1 %v5644_v45 }
 0x23c   :  { %v5647_v52 = vpack.c.bf16 %v383_v48, %v379_v47  ;;  %4662 = vmatpush3.bf16.msra.mxu1 %v5644_v45 }
 0x23d   :  { %v5650_v53 = vpack.c.bf16 %v385_v51, %v381_v50  ;;  %4663 = vmatprep.subr.bf16.mxu1 %v5642_v43 }
 0x23f   :  { %720 = vrot.lane.b32.xlu1 %v5650_v53, %s5367_s12  ;;  %4938 = vmatprep.subr.msk.bf16.mxu0 %vm466_vm0, %v5650_v53  ;;  %v477_v54 = vsel %vm466_vm0, %v5650_v53, 0 }
 0x240   :  { %4656 = vmatpush3.bf16.xpose.msra.mxu0 %v477_v54  ;;  %4664 = vmatpush3.bf16.msra.mxu1 %v5642_v43 }
 0x243   :  { %712 = vrot.lane.b32.xlu1 %v5630_v31, %s5367_s12 }
 0x247   :  { %714 = vrot.lane.b32.xlu1 %v5647_v52, %s5367_s12  ;;  %4658 = vmatmul.mubr.msk.bf16.vlgmr.msra.gmra.mrb[8].mxu0 %vm466_vm0, %v5647_v52 }
 0x2a9   :  { %v719_v55 = vpop.permute.xlu0 %718 }
 0x2aa   :  { %4939 = vmatprep.subr.msk.bf16.mxu0 %vm466_vm0, %v719_v55  ;;  %v729_v56 = vsel %vm466_vm0, %v719_v55, 0 }
 0x2ab   :  { %4678 = vmatpush3.bf16.xpose.msra.mxu0 %v729_v56 }
 0x2b1   :  { %v721_v57 = vpop.permute.xlu1 %720 }
 0x2b2   :  { %4940 = vmatprep.subr.msk.bf16.mxu0 %vm466_vm0, %v721_v57  ;;  %v732_v58 = vsel %vm466_vm0, %v721_v57, 0 }
 0x2b3   :  { %4680 = vmatpush3.bf16.xpose.msra.mxu0 %v732_v58 }
 0x2b5   :  { %v713_v59 = vpop.permute.xlu1 %712 }
 0x2b6   :  { %4681 = vmatprep.mubr.msk.bf16.mxu0 %vm466_vm0, %v713_v59 }
 0x2b9   :  { %v715_v60 = vpop.permute.xlu1 %714 }
 0x2ba   :  { %4682 = vmatmul.mubr.msk.bf16.vlgmr.msra.gmra.mrb[12].mxu0 %vm466_vm0, %v715_v60 }
 0x31a   :  { %v4659_v61 = vpop.f32.mrb[8].mxu0 }
 0x31b   :  { %v513_v62 = vpop.f32.mrb[9].mxu0  ;;  %v530_v0 = vmul.f32 0.17677669, %v4659_v61 }
 0x31c   :  { %v528_v1 = vmul.f32 0.17677669, %v513_v62  ;;  %v4660_v2 = vpop.f32.mrb[10].mxu0 }
 0x31d   :  { %v516_v3 = vpop.f32.mrb[11].mxu0  ;;  %v531_v12 = vmul.f32 0.17677669, %v4660_v2  ;;  %v534_v18 = vadd.f32 %v530_v0, %v5685_v7 }
 0x31e   :  { %v529_v8 = vmul.f32 0.17677669, %v516_v3  ;;  %v532_v9 = vadd.f32 %v528_v1, %v5675_v63 }
 0x31f   :  { %v542_v22 = vsel %vm466_vm0, %v534_v18, -inf  ;;  %v535_v23 = vadd.f32 %v531_v12, %v5694_v20 }
 0x320   :  { %v536_v13 = vsel %vm466_vm0, %v532_v9, -inf  ;;  %v533_v16 = vadd.f32 %v529_v8, %v5680_v6 }
 0x321   :  { %537 = vmax.xlane.f32.xlu0 %v536_v13  ;;  %v545_v24 = vsel %vm466_vm0, %v535_v23, -inf }
 0x322   :  { %v539_v21 = vsel %vm466_vm0, %v533_v16, -inf }
 0x323   :  { %540 = vmax.xlane.f32.xlu1 %v539_v21 }
 0x325   :  { %543 = vmax.xlane.f32.xlu0 %v542_v22 }
 0x329   :  { %546 = vmax.xlane.f32.xlu0 %v545_v24 }
 0x38d   :  { %v4683_v25 = vpop.f32.mrb[12].mxu0 }
 0x38e   :  { %v768_v26 = vpop.f32.mrb[13].mxu0  ;;  %v785_v57 = vmul.f32 0.17677669, %v4683_v25 }
 0x38f   :  { %v4684_v27 = vpop.f32.mrb[14].mxu0  ;;  %v783_v56 = vmul.f32 0.17677669, %v768_v26 }
 0x390   :  { %v771_v28 = vpop.f32.mrb[15].mxu0  ;;  %v786_v59 = vmul.f32 0.17677669, %v4684_v27  ;;  %v789_v61 = vadd.f32 %v785_v57, %v5685_v7 }
 0x391   :  { %v787_v58 = vadd.f32 %v783_v56, %v5675_v63  ;;  %v784_v62 = vmul.f32 0.17677669, %v771_v28 }
 0x392   :  { %v797_v0 = vsel %vm466_vm0, %v789_v61, -inf  ;;  %v790_v1 = vadd.f32 %v786_v59, %v5694_v20 }
 0x393   :  { %v791_v60 = vsel %vm466_vm0, %v787_v58, -inf  ;;  %v788_v3 = vadd.f32 %v784_v62, %v5680_v6 }
 0x394   :  { %v800_v2 = vsel %vm466_vm0, %v790_v1, -inf }
 0x395   :  { %v794_v8 = vsel %vm466_vm0, %v788_v3, -inf }
 0x3ae   :  { %v538_v29 = vpop.xlane.xlu0 %537 }
 0x3af   :  { %v548_v30 = vsub.f32 %v532_v9, %v538_v29 }
 0x3b0   :  { %v541_v32 = vpop.xlane.xlu1 %540 }
 0x3b1   :  { %v552_v34 = vmul.f32 1.442695, %v548_v30  ;;  %v549_v35 = vsub.f32 %v533_v16, %v541_v32 }
 0x3b2   :  { %v544_v36 = vpop.xlane.xlu0 %543 }
 0x3b3   :  { %5145 = vpow2.f32 %v552_v34  ;;  %v554_v37 = vmul.f32 1.442695, %v549_v35  ;;  %v550_v38 = vsub.f32 %v534_v18, %v544_v36 }
 0x3b5   :  { %5147 = vpow2.f32 %v554_v37  ;;  %v556_v40 = vmul.f32 1.442695, %v550_v38 }
 0x3b6   :  { %v547_v41 = vpop.xlane.xlu0 %546 }
 0x3b7   :  { %5149 = vpow2.f32 %v556_v40  ;;  %v551_v42 = vsub.f32 %v535_v23, %v547_v41 }
 0x3b9   :  { %v558_v44 = vmul.f32 1.442695, %v551_v42 }
 0x3bb   :  { %5151 = vpow2.f32 %v558_v44 }
 0x3bd   :  { %v5146_v46 = vpop.eup %5145 }
 0x3be   :  { %v560_v47 = vsel %vm466_vm0, %v5146_v46, 0.0 }
 0x3bf   :  { %v5148_v48 = vpop.eup %5147  ;;  %561 = vadd.xlane.f32.xlu0 %v560_v47 }
 0x3c0   :  { %v563_v49 = vsel %vm466_vm0, %v5148_v48, 0.0 }
 0x3c1   :  { %v5150_v50 = vpop.eup %5149  ;;  %564 = vadd.xlane.f32.xlu1 %v563_v49 }
 0x3c2   :  { %v566_v51 = vsel %vm466_vm0, %v5150_v50, 0.0 }
 0x3c3   :  { %567 = vadd.xlane.f32.xlu0 %v566_v51 }
 0x3c5   :  { %v5152_v54 = vpop.eup %5151 }
 0x3c6   :  { %v569_v55 = vsel %vm466_vm0, %v5152_v54, 0.0 }
 0x3c7   :  { %570 = vadd.xlane.f32.xlu1 %v569_v55 }
 0x3d8   :  { %979 = vrot.lane.b32.xlu1 %v5650_v53, %s5364_s4 }
 0x3d9   :  { %977 = vrot.lane.b32.xlu0 %v5632_v33, %s5364_s4 }
 0x3dc   :  { %973 = vrot.lane.b32.xlu1 %v5630_v31, %s5364_s4 }
 0x3e0   :  { %975 = vrot.lane.b32.xlu1 %v5647_v52, %s5364_s4 }
 0x3f8   :  { %792 = vmax.xlane.f32.xlu0 %v791_v60 }
 0x3fc   :  { %798 = vmax.xlane.f32.xlu0 %v797_v0  ;;  %v4993_v0 = vld [vmem:[%s6518_s6] sm:$0xff]  }
 0x3fd   :  { %4669 = vmatprep.subr.bf16.mxu1 %v4993_v0 }
 0x400   :  { %801 = vmax.xlane.f32.xlu0 %v800_v2 }
 0x404   :  { %795 = vmax.xlane.f32.xlu1 %v794_v8 }
 0x44c   :  { %v562_v9 = vpop.xlane.xlu0 %561 }
 0x44d   :  { %5153 = vrcp.f32 %v562_v9 }
 0x44e   :  { %v565_v12 = vpop.xlane.xlu1 %564 }
 0x44f   :  { %5155 = vrcp.f32 %v565_v12 }
 0x450   :  { %v568_v13 = vpop.xlane.xlu0 %567 }
 0x451   :  { %5157 = vrcp.f32 %v568_v13 }
 0x454   :  { %v571_v16 = vpop.xlane.xlu1 %570  ;;  %v978_v18 = vpop.permute.xlu0 %977 }
 0x455   :  { %5159 = vrcp.f32 %v571_v16  ;;  %4941 = vmatprep.subr.msk.bf16.mxu0 %vm466_vm0, %v978_v18  ;;  %v988_v21 = vsel %vm466_vm0, %v978_v18, 0 }
 0x456   :  { %4702 = vmatpush3.bf16.xpose.msra.mxu0 %v988_v21 }
 0x457   :  { %v5154_v22 = vpop.eup %5153 }
 0x458   :  { %v980_v23 = vpop.permute.xlu1 %979  ;;  %v576_v25 = vmul.f32 %v5154_v22, %v5146_v46 }
 0x459   :  { %v5156_v24 = vpop.eup %5155  ;;  %4942 = vmatprep.subr.msk.bf16.mxu0 %vm466_vm0, %v980_v23  ;;  %v991_v30 = vsel %vm466_vm0, %v980_v23, 0 }
 0x45a   :  { %v577_v26 = vmul.f32 %v5156_v24, %v5148_v48 }
 0x45b   :  { %v5158_v29 = vpop.eup %5157 }
 0x45c   :  { %v974_v27 = vpop.permute.xlu1 %973  ;;  %v580_v28 = vpack.c.bf16 %v577_v26, %v576_v25  ;;  %v578_v34 = vmul.f32 %v5158_v29, %v5150_v50 }
 0x45d   :  { %4705 = vmatprep.mubr.msk.bf16.mxu0 %vm466_vm0, %v974_v27 }
 0x45e   :  { %4665 = vmatprep.mubr.msk.bf16.mxu1 %vm466_vm0, %v580_v28  ;;  %4704 = vmatpush3.bf16.xpose.msra.mxu0 %v991_v30 }
 0x45f   :  { %v5160_v32 = vpop.eup %5159 }
 0x460   :  { %v579_v35 = vmul.f32 %v5160_v32, %v5152_v54  ;;  %v976_v37 = vpop.permute.xlu1 %975 }
 0x462   :  { %v581_v36 = vpack.c.bf16 %v579_v35, %v578_v34 }
 0x464   :  { %4666 = vmatmul.mubr.msk.bf16.vlgmr.msra.gmra.mrb[4].mxu1 %vm466_vm0, %v581_v36 }
 0x465   :  { %4706 = vmatmul.mubr.msk.bf16.vlgmr.msra.gmra.mrb[16].mxu0 %vm466_vm0, %v976_v37  ;;  %4670 = vmatpush3.bf16.msra.mxu1 %v4993_v0 }
 0x485   :  { %v793_v38 = vpop.xlane.xlu0 %792 }
 0x486   :  { %v803_v40 = vsub.f32 %v787_v58, %v793_v38 }
 0x488   :  { %v807_v44 = vmul.f32 1.442695, %v803_v40 }
 0x489   :  { %v799_v41 = vpop.xlane.xlu0 %798 }
 0x48a   :  { %v805_v42 = vsub.f32 %v789_v61, %v799_v41 }
 0x48c   :  { %v811_v46 = vmul.f32 1.442695, %v805_v42 }
 0x48d   :  { %v802_v47 = vpop.xlane.xlu0 %801 }
 0x48e   :  { %5161 = vpow2.f32 %v811_v46  ;;  %v806_v48 = vsub.f32 %v790_v1, %v802_v47  ;;  %v4994_v1 = vld [vmem:[%s6518_s6 + $0x8] sm:$0xff]  }
 0x48f   :  { %5163 = vpow2.f32 %v807_v44  ;;  %4671 = vmatprep.subr.bf16.mxu1 %v4994_v1 }
 0x490   :  { %v813_v49 = vmul.f32 1.442695, %v806_v48  ;;  %4672 = vmatpush3.bf16.msra.mxu1 %v4994_v1 }
 0x491   :  { %v796_v51 = vpop.xlane.xlu1 %795 }
 0x492   :  { %5165 = vpow2.f32 %v813_v49  ;;  %v804_v50 = vsub.f32 %v788_v3, %v796_v51 }
 0x494   :  { %v809_v54 = vmul.f32 1.442695, %v804_v50 }
 0x496   :  { %5167 = vpow2.f32 %v809_v54 }
 0x498   :  { %v5728_v55 = vpop.eup %5161 }
 0x499   :  { %v821_v56 = vsel %vm466_vm0, %v5728_v55, 0.0  ;;  %v5164_v57 = vpop.eup %5163 }
 0x49a   :  { %822 = vadd.xlane.f32.xlu0 %v821_v56  ;;  %v815_v59 = vsel %vm466_vm0, %v5164_v57, 0.0 }
 0x49c   :  { %v5732_v58 = vpop.eup %5165 }
 0x49d   :  { %v824_v60 = vsel %vm466_vm0, %v5732_v58, 0.0 }
 0x49e   :  { %816 = vadd.xlane.f32.xlu0 %v815_v59  ;;  %825 = vadd.xlane.f32.xlu1 %v824_v60 }
 0x4a0   :  { %v5168_v61 = vpop.eup %5167 }
 0x4a1   :  { %v818_v62 = vsel %vm466_vm0, %v5168_v61, 0.0 }
 0x4a2   :  { %819 = vadd.xlane.f32.xlu1 %v818_v62 }
 0x4b3   :  { %841 = vrot.lane.b32.xlu1 %v5642_v43, %s5367_s12 }
 0x4b4   :  { %839 = vrot.lane.b32.xlu0 %v5644_v45, %s5367_s12 }
 0x4b7   :  { %1234 = vrot.lane.b32.xlu1 %v5632_v33, %s5368_s22 }
 0x4b8   :  { %1230 = vrot.lane.b32.xlu0 %v5630_v31, %s5368_s22 }
 0x4bb   :  { %1236 = vrot.lane.b32.xlu1 %v5650_v53, %s5368_s22 }
 0x4bf   :  { %1232 = vrot.lane.b32.xlu1 %v5647_v52, %s5368_s22 }
 0x527   :  { %v823_v2 = vpop.xlane.xlu0 %822 }
 0x52b   :  { %v826_v3 = vpop.xlane.xlu1 %825  ;;  %v817_v8 = vpop.xlane.xlu0 %816 }
 0x52c   :  { %5169 = vrcp.f32 %v817_v8 }
 0x52f   :  { %v820_v9 = vpop.xlane.xlu1 %819  ;;  %v840_v12 = vpop.permute.xlu0 %839 }
 0x530   :  { %5171 = vrcp.f32 %v820_v9  ;;  %4685 = vmatprep.subr.bf16.mxu1 %v840_v12 }
 0x531   :  { %5173 = vrcp.f32 %v826_v3 }
 0x532   :  { %5175 = vrcp.f32 %v823_v2 }
 0x533   :  { %v842_v13 = vpop.permute.xlu1 %841  ;;  %v1231_v33 = vpop.permute.xlu0 %1230 }
 0x534   :  { %4729 = vmatprep.mubr.msk.bf16.mxu0 %vm466_vm0, %v1231_v33 }
 0x536   :  { %v5170_v53 = vpop.eup %5169 }
 0x537   :  { %v4667_v31 = vpop.f32.mrb[4].mxu1  ;;  %v1235_v16 = vpop.permute.xlu1 %1234  ;;  %v831_v35 = vmul.f32 %v5170_v53, %v5164_v57 }
 0x538   :  { %v622_v18 = vpop.f32.mrb[5].mxu1  ;;  %v4707_v21 = vpop.f32.mrb[16].mxu0  ;;  %4943 = vmatprep.subr.msk.bf16.mxu0 %vm466_vm0, %v1235_v16  ;;  %v1245_v52 = vsel %vm466_vm0, %v1235_v16, 0 }
 0x539   :  { %v4668_v22 = vpop.f32.mrb[6].mxu1  ;;  %v1027_v23 = vpop.f32.mrb[17].mxu0  ;;  %4726 = vmatpush3.bf16.xpose.msra.mxu0 %v1245_v52  ;;  %v1044_v25 = vmul.f32 0.17677669, %v4707_v21 }
 0x53a   :  { %v5172_v24 = vpop.eup %5171  ;;  %v638_v26 = vpack.c.bf16 %v4668_v22, %v4667_v31  ;;  %v1042_v27 = vmul.f32 0.17677669, %v1027_v23  ;;  %v625_v28 = vpop.f32.mrb[7].mxu1 }
 0x53b   :  { %v4708_v29 = vpop.f32.mrb[18].mxu0  ;;  %v637_v30 = vpack.c.bf16 %v625_v28, %v622_v18  ;;  %v1237_v34 = vpop.permute.xlu1 %1236  ;;  %v832_v36 = vmul.f32 %v5172_v24, %v5168_v61  ;;  %v1048_v47 = vadd.f32 %v1044_v25, %v5685_v7  ;;  %v4996_v61 = vld [vmem:[%s6518_s6 + $0x18] sm:$0xff]  }
 0x53c   :  { %v1030_v32 = vpop.f32.mrb[19].mxu0  ;;  %4944 = vmatprep.subr.msk.bf16.mxu0 %vm466_vm0, %v1237_v34  ;;  %v1046_v38 = vadd.f32 %v1042_v27, %v5675_v63  ;;  %v5174_v40 = vpop.eup %5173  ;;  %v1045_v42 = vmul.f32 0.17677669, %v4708_v29  ;;  %v1248_v50 = vsel %vm466_vm0, %v1237_v34, 0 }
 0x53d   :  { %v1043_v37 = vmul.f32 0.17677669, %v1030_v32  ;;  %4673 = vmatprep.mubr.msk.bf16.mxu1 %vm466_vm0, %v637_v30  ;;  %v835_v41 = vpack.c.bf16 %v832_v36, %v831_v35  ;;  %v5176_v48 = vpop.eup %5175  ;;  %v834_v49 = vmul.f32 %v5174_v40, %v5732_v58  ;;  %v1056_v56 = vsel %vm466_vm0, %v1048_v47, -inf }
 0x53e   :  { %4674 = vmatmul.mubr.msk.bf16.vlgmr.msra.gmra.mrb[8].mxu1 %vm466_vm0, %v638_v26  ;;  %v1050_v44 = vsel %vm466_vm0, %v1046_v38, -inf  ;;  %v833_v54 = vmul.f32 %v5176_v48, %v5728_v55  ;;  %v1049_v57 = vadd.f32 %v1045_v42, %v5694_v20  ;;  %v4995_v55 = vld [vmem:[%s6518_s6 + $0x10] sm:$0xff]  }
 0x53f   :  { %v1047_v46 = vadd.f32 %v1043_v37, %v5680_v6  ;;  %4686 = vmatpush3.bf16.msra.mxu1 %v840_v12  ;;  %1051 = vmax.xlane.f32.xlu0 %v1050_v44  ;;  %v1233_v60 = vpop.permute.xlu1 %1232 }
 0x540   :  { %4687 = vmatprep.subr.bf16.mxu1 %v842_v13  ;;  %4689 = vmatprep.mubr.msk.bf16.mxu1 %vm466_vm0, %v835_v41  ;;  %v836_v59 = vpack.c.bf16 %v834_v49, %v833_v54  ;;  %v1059_v58 = vsel %vm466_vm0, %v1049_v57, -inf }
 0x541   :  { %v1053_v51 = vsel %vm466_vm0, %v1047_v46, -inf  ;;  %4728 = vmatpush3.bf16.xpose.msra.mxu0 %v1248_v50 }
 0x542   :  { %1054 = vmax.xlane.f32.xlu1 %v1053_v51 }
 0x543   :  { %4688 = vmatpush3.bf16.msra.mxu1 %v842_v13  ;;  %1057 = vmax.xlane.f32.xlu0 %v1056_v56 }
 0x544   :  { %4693 = vmatprep.subr.bf16.mxu1 %v4995_v55 }
 0x546   :  { %4690 = vmatmul.mubr.msk.bf16.vlgmr.msra.gmra.mrb[12].mxu1 %vm466_vm0, %v836_v59 }
 0x547   :  { %1060 = vmax.xlane.f32.xlu0 %v1059_v58  ;;  %4694 = vmatpush3.bf16.msra.mxu1 %v4995_v55 }
 0x548   :  { %4730 = vmatmul.mubr.msk.bf16.vlgmr.msra.gmra.mrb[20].mxu0 %vm466_vm0, %v1233_v60  ;;  %4695 = vmatprep.subr.bf16.mxu1 %v4996_v61 }
 0x549   :  { %1699 = vmatprep.mubr.bf16.mxu0 %v5366_v39 }
 0x54b   :  { %4696 = vmatpush3.bf16.msra.mxu1 %v4996_v61 }
 0x5cc   :  { %v1052_v62 = vpop.xlane.xlu0 %1051 }
 0x5cd   :  { %v1062_v0 = vsub.f32 %v1046_v38, %v1052_v62 }
 0x5cf   :  { %v1055_v1 = vpop.xlane.xlu1 %1054  ;;  %v1066_v8 = vmul.f32 1.442695, %v1062_v0 }
 0x5d0   :  { %v1058_v2 = vpop.xlane.xlu0 %1057  ;;  %v1063_v9 = vsub.f32 %v1047_v46, %v1055_v1 }
 0x5d1   :  { %v1064_v3 = vsub.f32 %v1048_v47, %v1058_v2 }
 0x5d2   :  { %v1068_v31 = vmul.f32 1.442695, %v1063_v9 }
 0x5d3   :  { %v1070_v12 = vmul.f32 1.442695, %v1064_v3 }
 0x5d4   :  { %v1061_v13 = vpop.xlane.xlu0 %1060 }
 0x5d5   :  { %5177 = vpow2.f32 %v1070_v12  ;;  %v1065_v33 = vsub.f32 %v1049_v57, %v1061_v13 }
 0x5d6   :  { %5179 = vpow2.f32 %v1066_v8 }
 0x5d7   :  { %v1072_v16 = vmul.f32 1.442695, %v1065_v33 }
 0x5d9   :  { %5181 = vpow2.f32 %v1072_v16 }
 0x5da   :  { %5183 = vpow2.f32 %v1068_v31 }
 0x5df   :  { %v5783_v53 = vpop.eup %5177 }
 0x5e0   :  { %v1080_v18 = vsel %vm466_vm0, %v5783_v53, 0.0  ;;  %v5180_v21 = vpop.eup %5179 }
 0x5e1   :  { %1081 = vadd.xlane.f32.xlu0 %v1080_v18  ;;  %v1074_v22 = vsel %vm466_vm0, %v5180_v21, 0.0 }
 0x5e3   :  { %v5182_v52 = vpop.eup %5181 }
 0x5e4   :  { %v1083_v23 = vsel %vm466_vm0, %v5182_v52, 0.0  ;;  %v5184_v24 = vpop.eup %5183 }
 0x5e5   :  { %1075 = vadd.xlane.f32.xlu0 %v1074_v22  ;;  %1084 = vadd.xlane.f32.xlu1 %v1083_v23  ;;  %v1077_v25 = vsel %vm466_vm0, %v5184_v24, 0.0 }
 0x5e9   :  { %1078 = vadd.xlane.f32.xlu1 %v1077_v25 }
 0x5fa   :  { %1098 = vrot.lane.b32.xlu1 %v5642_v43, %s5364_s4 }
 0x5fb   :  { %1096 = vrot.lane.b32.xlu0 %v5644_v45, %s5364_s4 }
 0x619   :  { %v4691_v26 = vpop.f32.mrb[12].mxu1 }
 0x61a   :  { %v885_v27 = vpop.f32.mrb[13].mxu1 }
 0x61b   :  { %v4692_v28 = vpop.f32.mrb[14].mxu1  ;;  %v4731_v29 = vpop.f32.mrb[20].mxu0 }
 0x61c   :  { %v901_v30 = vpack.c.bf16 %v4692_v28, %v4691_v26  ;;  %v888_v32 = vpop.f32.mrb[15].mxu1  ;;  %v1284_v34 = vpop.f32.mrb[21].mxu0  ;;  %v1301_v41 = vmul.f32 0.17677669, %v4731_v29 }
 0x61d   :  { %v900_v35 = vpack.c.bf16 %v888_v32, %v885_v27  ;;  %v1299_v36 = vmul.f32 0.17677669, %v1284_v34  ;;  %v4732_v37 = vpop.f32.mrb[22].mxu0  ;;  %v4997_v32 = vld [vmem:[%s6518_s6 + $0x20] sm:$0xff]   ;;  %v4998_v34 = vld [vmem:[%s6518_s6 + $0x28] sm:$0xff]  }
 0x61e   :  { %v1302_v38 = vmul.f32 0.17677669, %v4732_v37  ;;  %v1287_v40 = vpop.f32.mrb[23].mxu0  ;;  %v1305_v51 = vadd.f32 %v1301_v41, %v5685_v7 }
 0x61f   :  { %v1300_v42 = vmul.f32 0.17677669, %v1287_v40  ;;  %4697 = vmatprep.mubr.msk.bf16.mxu1 %vm466_vm0, %v900_v35  ;;  %v1303_v44 = vadd.f32 %v1299_v36, %v5675_v63 }
 0x620   :  { %4698 = vmatmul.mubr.msk.bf16.vlgmr.msra.gmra.mrb[8].mxu1 %vm466_vm0, %v901_v30  ;;  %v1306_v48 = vadd.f32 %v1302_v38, %v5694_v20  ;;  %v1313_v54 = vsel %vm466_vm0, %v1305_v51, -inf }
 0x621   :  { %v1307_v46 = vsel %vm466_vm0, %v1303_v44, -inf  ;;  %v1304_v47 = vadd.f32 %v1300_v42, %v5680_v6 }
 0x622   :  { %1308 = vmax.xlane.f32.xlu1 %v1307_v46  ;;  %v1316_v50 = vsel %vm466_vm0, %v1306_v48, -inf }
 0x623   :  { %v1310_v49 = vsel %vm466_vm0, %v1304_v47, -inf }
 0x624   :  { %1311 = vmax.xlane.f32.xlu0 %v1310_v49 }
 0x626   :  { %1317 = vmax.xlane.f32.xlu1 %v1316_v50 }
 0x628   :  { %1314 = vmax.xlane.f32.xlu0 %v1313_v54 }
 0x66e   :  { %v1082_v63 = vpop.xlane.xlu0 %1081 }
 0x672   :  { %v1085_v56 = vpop.xlane.xlu1 %1084  ;;  %v1076_v57 = vpop.xlane.xlu0 %1075 }
 0x673   :  { %5185 = vrcp.f32 %v1085_v56 }
 0x674   :  { %5187 = vrcp.f32 %v1076_v57  ;;  %v4999_v57 = vld [vmem:[%s6518_s6 + $0x30] sm:$0xff]  }
 0x675   :  { %5189 = vrcp.f32 %v1082_v63 }
 0x676   :  { %v1079_v6 = vpop.xlane.xlu1 %1078  ;;  %v1097_v20 = vpop.permute.xlu0 %1096 }
 0x677   :  { %5191 = vrcp.f32 %v1079_v6  ;;  %4709 = vmatprep.subr.bf16.mxu1 %v1097_v20 }
 0x678   :  { %4710 = vmatpush3.bf16.msra.mxu1 %v1097_v20 }
 0x67a   :  { %v1099_v59 = vpop.permute.xlu1 %1098 }
 0x67b   :  { %4711 = vmatprep.subr.bf16.mxu1 %v1099_v59 }
 0x67c   :  { %4712 = vmatpush3.bf16.msra.mxu1 %v1099_v59 }
 0x67d   :  { %v5186_v7 = vpop.eup %5185  ;;  %4717 = vmatprep.subr.bf16.mxu1 %v4997_v32 }
 0x67e   :  { %v5188_v58 = vpop.eup %5187  ;;  %v1093_v61 = vmul.f32 %v5186_v7, %v5182_v52  ;;  %v5000_v7 = vld [vmem:[%s6518_s6 + $0x38] sm:$0xff]  }
 0x67f   :  { %v5190_v60 = vpop.eup %5189  ;;  %v1090_v62 = vmul.f32 %v5188_v58, %v5180_v21 }
 0x680   :  { %v1092_v1 = vmul.f32 %v5190_v60, %v5783_v53 }
 0x681   :  { %v5192_v55 = vpop.eup %5191 }
 0x682   :  { %v1091_v0 = vmul.f32 %v5192_v55, %v5184_v24  ;;  %v1095_v3 = vpack.c.bf16 %v1093_v61, %v1092_v1  ;;  %v4189_v1 = vld [vmem:[%s6519_s7] ss:$0 sm:$0xff] }
 0x684   :  { %v1094_v2 = vpack.c.bf16 %v1091_v0, %v1090_v62 }
 0x686   :  { %4713 = vmatprep.mubr.msk.bf16.mxu1 %vm466_vm0, %v1094_v2 }
 0x687   :  { %4714 = vmatmul.mubr.msk.bf16.vlgmr.msra.gmra.mrb[16].mxu1 %vm466_vm0, %v1095_v3 }
 0x688   :  { %4718 = vmatpush3.bf16.msra.mxu1 %v4997_v32 }
 0x689   :  { %4719 = vmatprep.subr.bf16.mxu1 %v4998_v34 }
 0x68c   :  { %4720 = vmatpush3.bf16.msra.mxu1 %v4998_v34 }
 0x6af   :  { %v1309_v8 = vpop.xlane.xlu1 %1308 }
 0x6b0   :  { %v1319_v33 = vsub.f32 %v1303_v44, %v1309_v8 }
 0x6b1   :  { %v1312_v9 = vpop.xlane.xlu0 %1311 }
 0x6b2   :  { %v1320_v12 = vsub.f32 %v1304_v47, %v1312_v9  ;;  %v1323_v21 = vmul.f32 1.442695, %v1319_v33 }
 0x6b3   :  { %v1318_v13 = vpop.xlane.xlu1 %1317 }
 0x6b4   :  { %v1322_v31 = vsub.f32 %v1306_v48, %v1318_v13  ;;  %v1325_v16 = vmul.f32 1.442695, %v1320_v12 }
 0x6b5   :  { %v1315_v18 = vpop.xlane.xlu0 %1314 }
 0x6b6   :  { %v1329_v22 = vmul.f32 1.442695, %v1322_v31  ;;  %v1321_v52 = vsub.f32 %v1305_v51, %v1315_v18 }
 0x6b8   :  { %5193 = vpow2.f32 %v1329_v22  ;;  %v1327_v23 = vmul.f32 1.442695, %v1321_v52 }
 0x6b9   :  { %5195 = vpow2.f32 %v1325_v16 }
 0x6ba   :  { %5197 = vpow2.f32 %v1327_v23  ;;  %v5003_v23 = vld [vmem:[%s6522_s10 + $0x4] ss:$8 sps:$4 sm:$0xff]  }
 0x6bb   :  { %5199 = vpow2.f32 %v1323_v21  ;;  %v5001_v21 = vld [vmem:[%s6522_s10] ss:$8 sps:$4 sm:$0xff]   ;;  %1667 = vmatprep.subr.bf16.mxu0 %v5003_v23 }
 0x6bc   :  { %1668 = vmatpush1.bf16.msra.mxu0 %v5001_v21 }
 0x6c2   :  { %v5194_v53 = vpop.eup %5193 }
 0x6c3   :  { %v5196_v24 = vpop.eup %5195  ;;  %v1340_v25 = vsel %vm466_vm0, %v5194_v53, 0.0 }
 0x6c4   :  { %v5198_v26 = vpop.eup %5197  ;;  %1341 = vadd.xlane.f32.xlu1 %v1340_v25  ;;  %v1334_v29 = vsel %vm466_vm0, %v5196_v24, 0.0 }
 0x6c5   :  { %v1337_v27 = vsel %vm466_vm0, %v5198_v26, 0.0  ;;  %v5200_v28 = vpop.eup %5199 }
 0x6c6   :  { %1338 = vadd.xlane.f32.xlu0 %v1337_v27  ;;  %v1331_v30 = vsel %vm466_vm0, %v5200_v28, 0.0 }
 0x6c8   :  { %1335 = vadd.xlane.f32.xlu1 %v1334_v29 }
 0x6ca   :  { %1332 = vadd.xlane.f32.xlu0 %v1331_v30 }
 0x6d9   :  { %1355 = vrot.lane.b32.xlu1 %v5642_v43, %s5368_s22 }
 0x6e0   :  { %1353 = vrot.lane.b32.xlu0 %v5644_v45, %s5368_s22 }
 0x751   :  { %v1342_v35 = vpop.xlane.xlu1 %1341 }
 0x753   :  { %v1339_v36 = vpop.xlane.xlu0 %1338 }
 0x754   :  { %5201 = vrcp.f32 %v1339_v36 }
 0x755   :  { %v1336_v37 = vpop.xlane.xlu1 %1335 }
 0x756   :  { %5203 = vrcp.f32 %v1336_v37 }
 0x757   :  { %5205 = vrcp.f32 %v1342_v35  ;;  %v1333_v38 = vpop.xlane.xlu0 %1332 }
 0x758   :  { %5207 = vrcp.f32 %v1333_v38 }
 0x759   :  { %v1356_v50 = vpop.permute.xlu1 %1355 }
 0x75a   :  { %v4715_v40 = vpop.f32.mrb[16].mxu1 }
 0x75b   :  { %v1142_v41 = vpop.f32.mrb[17].mxu1  ;;  %v1354_v43 = vpop.permute.xlu0 %1353 }
 0x75c   :  { %v4716_v42 = vpop.f32.mrb[18].mxu1  ;;  %4733 = vmatprep.subr.bf16.mxu1 %v1354_v43 }
 0x75d   :  { %v1158_v44 = vpack.c.bf16 %v4716_v42, %v4715_v40  ;;  %v1145_v46 = vpop.f32.mrb[19].mxu1  ;;  %v5009_v40 = vld [vmem:[%s6522_s10 + $0x24] ss:$8 sps:$4 sm:$0xff]   ;;  %v5010_v42 = vld [vmem:[%s6522_s10 + $0x30] ss:$8 sps:$4 sm:$0xff]  }
 0x75e   :  { %v1157_v47 = vpack.c.bf16 %v1145_v46, %v1142_v41  ;;  %v5202_v48 = vpop.eup %5201  ;;  %v5007_v41 = vld [vmem:[%s6522_s10 + $0x20] ss:$8 sps:$4 sm:$0xff]  }
 0x75f   :  { %v1349_v54 = vmul.f32 %v5202_v48, %v5198_v26  ;;  %v5013_v46 = vld [vmem:[%s6522_s10 + $0x40] ss:$8 sps:$4 sm:$0xff]   ;;  %v5016_v48 = vld [vmem:[%s6522_s10 + $0x50] ss:$8 sps:$4 sm:$0xff]  }
 0x760   :  { %v5204_v49 = vpop.eup %5203  ;;  %4721 = vmatprep.mubr.msk.bf16.mxu1 %vm466_vm0, %v1157_v47  ;;  %v5018_v47 = vld [vmem:[%s6522_s10 + $0x54] ss:$8 sps:$4 sm:$0xff]  }
 0x761   :  { %v5206_v45 = vpop.eup %5205  ;;  %4722 = vmatmul.mubr.msk.bf16.vlgmr.msra.gmra.mrb[8].mxu1 %vm466_vm0, %v1158_v44  ;;  %v1348_v56 = vmul.f32 %v5204_v49, %v5196_v24  ;;  %v5015_v44 = vld [vmem:[%s6522_s10 + $0x44] ss:$8 sps:$4 sm:$0xff]  }
 0x762   :  { %v5208_v51 = vpop.eup %5207  ;;  %4734 = vmatpush3.bf16.msra.mxu1 %v1354_v43  ;;  %v1350_v6 = vmul.f32 %v5206_v45, %v5194_v53  ;;  %v5012_v43 = vld [vmem:[%s6522_s10 + $0x34] ss:$8 sps:$4 sm:$0xff]   ;;  %v5021_v49 = vld [vmem:[%s6522_s10 + $0x64] ss:$8 sps:$4 sm:$0xff]   ;;  %v5019_v45 = vld [vmem:[%s6522_s10 + $0x60] ss:$8 sps:$4 sm:$0xff]  }
 0x763   :  { %4735 = vmatprep.subr.bf16.mxu1 %v1356_v50  ;;  %v1347_v63 = vmul.f32 %v5208_v51, %v5200_v28  ;;  %v5024_v51 = vld [vmem:[%s6522_s10 + $0x74] ss:$8 sps:$4 sm:$0xff]  }
 0x764   :  { %v1352_v59 = vpack.c.bf16 %v1350_v6, %v1349_v54 }
 0x765   :  { %v1351_v20 = vpack.c.bf16 %v1348_v56, %v1347_v63 }
 0x766   :  { %4736 = vmatpush3.bf16.msra.mxu1 %v1356_v50  ;;  %v5022_v50 = vld [vmem:[%s6522_s10 + $0x70] ss:$8 sps:$4 sm:$0xff]  }
 0x767   :  { %4737 = vmatprep.mubr.msk.bf16.mxu1 %vm466_vm0, %v1351_v20  ;;  %4741 = vmatprep.subr.bf16.mxu1 %v4999_v57 }
 0x769   :  { %4738 = vmatmul.mubr.msk.bf16.vlgmr.msra.gmra.mrb[20].mxu1 %vm466_vm0, %v1352_v59 }
 0x76a   :  { %4742 = vmatpush3.bf16.msra.mxu1 %v4999_v57 }
 0x76b   :  { %4743 = vmatprep.subr.bf16.mxu1 %v5000_v7 }
 0x76e   :  { %4744 = vmatpush3.bf16.msra.mxu1 %v5000_v7 }
 0x83c   :  { %v4739_v58 = vpop.f32.mrb[20].mxu1 }
 0x83d   :  { %v1399_v60 = vpop.f32.mrb[21].mxu1 }
 0x83e   :  { %v4740_v55 = vpop.f32.mrb[22].mxu1 }
 0x83f   :  { %v1415_v61 = vpack.c.bf16 %v4740_v55, %v4739_v58  ;;  %v1402_v62 = vpop.f32.mrb[23].mxu1 }
 0x840   :  { %v1414_v0 = vpack.c.bf16 %v1402_v62, %v1399_v60 }
 0x842   :  { %4745 = vmatprep.mubr.msk.bf16.mxu1 %vm466_vm0, %v1414_v0  ;;  %v4222_v0 = vld [vmem:[%s6520_s8] ss:$0 sm:$0xff] }
 0x843   :  { %4746 = vmatmul.mubr.msk.bf16.vlgmr.msra.gmra.mrb[8].mxu1 %vm466_vm0, %v1415_v61 }
 0x916   :  { %v4747_v2 = vpop.f32.mrb[8].mxu1 }
 0x917   :  { %v1468_v3 = vpop.f32.mrb[9].mxu1  ;;  %v4905_v16 = vadd.f32 %v4747_v2, %v4189_v1 }
 0x918   :  { %v4906_v8 = vadd.f32 %v4189_v1, %v1468_v3  ;;  %v4748_v9 = vpop.f32.mrb[10].mxu1 }
 0x919   :  { %v1471_v12 = vpop.f32.mrb[11].mxu1  ;;  %v4907_v13 = vadd.f32 %v4748_v9, %v4189_v1  ;;  %v1489_v52 = vadd.f32 %v4905_v16, %v5607_v10  ;;  %v4223_v9 = vld [vmem:[%s6521_s9] ss:$0 sm:$0xff] }
 0x91a   :  { %v4908_v33 = vadd.f32 %v4189_v1, %v1471_v12  ;;  %v1487_v31 = vadd.f32 %v4906_v8, %v5600_v4  ;;  %v5006_v4 = vld [vmem:[%s6522_s10 + $0x14] ss:$8 sps:$4 sm:$0xff]  }
 0x91b   :  { %v1490_v22 = vadd.f32 %v4907_v13, %v5609_v11  ;;  %1669 = vmatprep.subr.bf16.mxu0 %v5006_v4 }
 0x91c   :  { %1493 = vadd.xlane.f32.xlu1 %v1487_v31  ;;  %v1488_v18 = vadd.f32 %v4908_v33, %v5602_v5  ;;  %v5004_v5 = vld [vmem:[%s6522_s10 + $0x10] ss:$8 sps:$4 sm:$0xff]  }
 0x91d   :  { %1670 = vmatpush1.bf16.msra.mxu0 %v5004_v5 }
 0x91e   :  { %1495 = vadd.xlane.f32.xlu0 %v1488_v18  ;;  %1671 = vmatprep.subr.bf16.mxu0 %v5009_v40  ;;  %v5040_v40 = vld [vmem:[#allocation2 + $0x38] sm:$0xff]  }
 0x920   :  { %1499 = vadd.xlane.f32.xlu1 %v1490_v22 }
 0x921   :  { %1672 = vmatpush1.bf16.msra.mxu0 %v5007_v41  ;;  %v1575_v41 = vld [vmem:[%s6523_s11] sm:$0x3] }
 0x922   :  { %1497 = vadd.xlane.f32.xlu0 %v1489_v52  ;;  %1673 = vmatprep.subr.bf16.mxu0 %v5012_v43  ;;  %v1580_v43 = vrot.slane %v1575_v41, %v5617_v15 }
 0x925   :  { %1674 = vmatpush1.bf16.msra.mxu0 %v5010_v42  ;;  %v1584_v42 = vrot.slane %v1575_v41, %v5623_v17 }
 0x926   :  { %1675 = vmatprep.subr.bf16.mxu0 %v5015_v44 }
 0x929   :  { %1676 = vmatpush1.bf16.msra.mxu0 %v5013_v46 }
 0x92a   :  { %1677 = vmatprep.subr.bf16.mxu0 %v5018_v47 }
 0x92d   :  { %1678 = vmatpush1.bf16.msra.mxu0 %v5016_v48 }
 0x92e   :  { %1679 = vmatprep.subr.bf16.mxu0 %v5021_v49 }
 0x931   :  { %1680 = vmatpush1.bf16.msra.mxu0 %v5019_v45 }
 0x932   :  { %1681 = vmatprep.subr.bf16.mxu0 %v5024_v51 }
 0x935   :  { %1682 = vmatpush1.bf16.msra.mxu0 %v5022_v50 }
 0x9a9   :  { %v1494_v10 = vpop.xlane.xlu1 %1493 }
 0x9aa   :  { %v1501_v11 = vmul.f32 0.0078125, %v1494_v10 }
 0x9ab   :  { %v1496_v53 = vpop.xlane.xlu0 %1495 }
 0x9ac   :  { %v1505_v24 = vsub.f32 %v1487_v31, %v1501_v11  ;;  %v1502_v25 = vmul.f32 0.0078125, %v1496_v53  ;;  %v5025_v11 = vld [vmem:[#allocation2 + $0x40] sm:$0xff]  }
 0x9ad   :  { %v1500_v26 = vpop.xlane.xlu1 %1499  ;;  %v5026_v53 = vld [vmem:[#allocation2] sm:$0xff]   ;;  %4501 = vmatprep.subr.bf16.mxu1 %v5025_v11 }
 0x9ae   :  { %v1506_v27 = vsub.f32 %v1488_v18, %v1502_v25  ;;  %v1504_v28 = vmul.f32 0.0078125, %v1500_v26  ;;  %v1509_v29 = vmul.f32 %v1505_v24, %v1505_v24  ;;  %4502 = vmatpush3.bf16.msra.mxu1 %v5026_v53  ;;  %v5028_v25 = vld [vmem:[#allocation2 + $0x8] sm:$0xff]   ;;  %v5029_v26 = vld [vmem:[#allocation2 + $0x50] sm:$0xff]  }
 0x9af   :  { %v1498_v30 = vpop.xlane.xlu0 %1497 }
 0x9b0   :  { %v1508_v32 = vsub.f32 %v1490_v22, %v1504_v28  ;;  %v1503_v34 = vmul.f32 0.0078125, %v1498_v30  ;;  %1513 = vadd.xlane.f32.xlu0 %v1509_v29  ;;  %v1510_v35 = vmul.f32 %v1506_v27, %v1506_v27  ;;  %v5031_v28 = vld [vmem:[#allocation2 + $0x58] sm:$0xff]   ;;  %v5033_v30 = vld [vmem:[#allocation2 + $0x60] sm:$0xff]  }
 0x9b1   :  { %v5032_v29 = vld [vmem:[#allocation2 + $0x18] sm:$0xff]  }
 0x9b2   :  { %v1507_v36 = vsub.f32 %v1489_v52, %v1503_v34  ;;  %1515 = vadd.xlane.f32.xlu1 %v1510_v35  ;;  %v1512_v37 = vmul.f32 %v1508_v32, %v1508_v32  ;;  %v5035_v34 = vld [vmem:[#allocation2 + $0x68] sm:$0xff]  }
 0x9b3   :  { %v5036_v35 = vld [vmem:[#allocation2 + $0x28] sm:$0xff]  }
 0x9b4   :  { %v1511_v38 = vmul.f32 %v1507_v36, %v1507_v36 }
 0x9b6   :  { %1519 = vadd.xlane.f32.xlu1 %v1512_v37  ;;  %1517 = vadd.xlane.f32.xlu0 %v1511_v38  ;;  %v5038_v37 = vld [vmem:[#allocation2 + $0x30] sm:$0xff]   ;;  %v5039_v38 = vld [vmem:[#allocation2 + $0x78] sm:$0xff]  }
 0xa3d   :  { %v1514_v54 = vpop.xlane.xlu0 %1513 }
 0xa3e   :  { %v1521_v63 = vmul.f32 0.0078125, %v1514_v54 }
 0xa3f   :  { %v1516_v56 = vpop.xlane.xlu1 %1515 }
 0xa40   :  { %v1525_v57 = vadd.f32 1e-05, %v1521_v63  ;;  %v1522_v6 = vmul.f32 0.0078125, %v1516_v56 }
 0xa42   :  { %5209 = vrsqrt.f32 %v1525_v57  ;;  %v1526_v20 = vadd.f32 1e-05, %v1522_v6 }
 0xa43   :  { %v1520_v59 = vpop.xlane.xlu1 %1519  ;;  %v1518_v7 = vpop.xlane.xlu0 %1517 }
 0xa44   :  { %5211 = vrsqrt.f32 %v1526_v20  ;;  %v1524_v58 = vmul.f32 0.0078125, %v1520_v59  ;;  %v1523_v60 = vmul.f32 0.0078125, %v1518_v7 }
 0xa46   :  { %v1528_v55 = vadd.f32 1e-05, %v1524_v58  ;;  %v1527_v61 = vadd.f32 1e-05, %v1523_v60 }
 0xa48   :  { %5213 = vrsqrt.f32 %v1528_v55 }
 0xa49   :  { %5215 = vrsqrt.f32 %v1527_v61 }
 0xa4c   :  { %v5210_v62 = vpop.eup %5209 }
 0xa4d   :  { %v1533_v1 = vmul.f32 %v5210_v62, %v1505_v24  ;;  %v5027_v24 = vld [vmem:[#allocation2 + $0x48] sm:$0xff]  }
 0xa4e   :  { %v5212_v2 = vpop.eup %5211  ;;  %4503 = vmatprep.subr.bf16.mxu1 %v5027_v24 }
 0xa4f   :  { %v1534_v3 = vmul.f32 %v5212_v2, %v1506_v27  ;;  %v1543_v8 = vmul.f32 %v4222_v0, %v1533_v1  ;;  %4504 = vmatpush3.bf16.msra.mxu1 %v5028_v25  ;;  %v5030_v27 = vld [vmem:[#allocation2 + $0x10] sm:$0xff]  }
 0xa50   :  { %4505 = vmatprep.subr.bf16.mxu1 %v5029_v26 }
 0xa51   :  { %v1544_v12 = vmul.f32 %v4222_v0, %v1534_v3  ;;  %v5894_v31 = vadd.f32 %v4223_v9, %v1543_v8 }
 0xa52   :  { %v5214_v13 = vpop.eup %5213 }
 0xa53   :  { %v5216_v33 = vpop.eup %5215  ;;  %v5896_v16 = vadd.f32 %v4223_v9, %v1544_v12  ;;  %v1536_v18 = vmul.f32 %v5214_v13, %v1508_v32  ;;  %4506 = vmatpush3.bf16.msra.mxu1 %v5030_v27  ;;  %v5034_v32 = vld [vmem:[#allocation2 + $0x20] sm:$0xff]  }
 0xa54   :  { %v1535_v22 = vmul.f32 %v5216_v33, %v1507_v36  ;;  %4507 = vmatprep.subr.bf16.mxu1 %v5031_v28  ;;  %v5037_v36 = vld [vmem:[#allocation2 + $0x70] sm:$0xff]  }
 0xa55   :  { %v1557_v52 = vpack.c.bf16 %v5896_v16, %v5894_v31  ;;  %v1546_v21 = vmul.f32 %v4222_v0, %v1536_v18 }
 0xa56   :  { %v1545_v23 = vmul.f32 %v4222_v0, %v1535_v22 }
 0xa57   :  { %1700 = vmatmul.mubr.bf16.vlgmr.msra.gmra.mrb[24].mxu0 %v1557_v52  ;;  %v5903_v5 = vadd.f32 %v4223_v9, %v1546_v21  ;;  %4508 = vmatpush3.bf16.msra.mxu1 %v5032_v29 }
 0xa58   :  { %1709 = vmatprep.mubr.bf16.mxu0 %v5366_v39  ;;  %v5901_v4 = vadd.f32 %v4223_v9, %v1545_v23  ;;  %4509 = vmatprep.subr.bf16.mxu1 %v5033_v30 }
 0xa5a   :  { %v1558_v10 = vpack.c.bf16 %v5903_v5, %v5901_v4 }
 0xa5b   :  { %4510 = vmatpush3.bf16.msra.mxu1 %v5034_v32 }
 0xa5c   :  { %4511 = vmatprep.subr.bf16.mxu1 %v5035_v34 }
 0xa5f   :  { %1710 = vmatmul.mubr.bf16.gmra.mrb[28].mxu0 %v1558_v10  ;;  %4512 = vmatpush3.bf16.msra.mxu1 %v5036_v35 }
 0xa60   :  { %2263 = vmatprep.mubr.bf16.mxu0 %v5366_v39  ;;  %4513 = vmatprep.subr.bf16.mxu1 %v5037_v36 }
 0xa63   :  { %4514 = vmatpush3.bf16.msra.mxu1 %v5038_v37 }
 0xa64   :  { %4515 = vmatprep.subr.bf16.mxu1 %v5039_v38 }
 0xa67   :  { %4516 = vmatpush3.bf16.msra.mxu1 %v5040_v40 }
 0xb2a   :  { %v1701_v44 = vpop.f32.mrb[24].mxu0 }
 0xb2b   :  { %v5913_v46 = vadd.f32 %v1701_v44, %v1580_v43  ;;  %v1703_v47 = vpop.f32.mrb[25].mxu0 }
 0xb2c   :  { %v5915_v48 = vadd.f32 %v1703_v47, %v1584_v42  ;;  %v1705_v49 = vpop.f32.mrb[26].mxu0 }
 0xb2d   :  { %v1720_v45 = vmul.f32 %v5913_v46, %v5913_v46  ;;  %v5919_v51 = vadd.f32 %v1705_v49, %v1580_v43  ;;  %v1707_v50 = vpop.f32.mrb[27].mxu0 }
 0xb2e   :  { %v1721_v54 = vmul.f32 %v5915_v48, %v5915_v48  ;;  %v5923_v63 = vadd.f32 %v1707_v50, %v1584_v42 }
 0xb2f   :  { %v1728_v56 = vmul.f32 %v1720_v45, %v5913_v46  ;;  %v1722_v57 = vmul.f32 %v5919_v51, %v5919_v51 }
 0xb30   :  { %v1729_v6 = vmul.f32 %v1721_v54, %v5915_v48  ;;  %v1723_v20 = vmul.f32 %v5923_v63, %v5923_v63 }
 0xb31   :  { %v1736_v59 = vmul.f32 0.044715, %v1728_v56  ;;  %v1730_v7 = vmul.f32 %v1722_v57, %v5919_v51 }
 0xb32   :  { %v1737_v58 = vmul.f32 0.044715, %v1729_v6  ;;  %v1731_v60 = vmul.f32 %v1723_v20, %v5923_v63  ;;  %v1711_v55 = vpop.f32.mrb[28].mxu0 }
 0xb33   :  { %v1744_v61 = vadd.f32 %v1736_v59, %v5913_v46  ;;  %v1738_v62 = vmul.f32 0.044715, %v1730_v7  ;;  %v5934_v0 = vadd.f32 %v1711_v55, %v1580_v43  ;;  %v1713_v1 = vpop.f32.mrb[29].mxu0 }
 0xb34   :  { %v1745_v2 = vadd.f32 %v1737_v58, %v5915_v48  ;;  %v1739_v3 = vmul.f32 0.044715, %v1731_v60  ;;  %v5937_v8 = vadd.f32 %v1713_v1, %v1584_v42  ;;  %v1715_v9 = vpop.f32.mrb[30].mxu0 }
 0xb35   :  { %v1752_v12 = vmul.f32 0.7978846, %v1744_v61  ;;  %v1746_v13 = vadd.f32 %v1738_v62, %v5919_v51  ;;  %v1724_v33 = vmul.f32 %v5934_v0, %v5934_v0  ;;  %v5942_v18 = vadd.f32 %v1715_v9, %v1580_v43  ;;  %v1717_v22 = vpop.f32.mrb[31].mxu0 }
 0xb36   :  { %v1753_v52 = vmul.f32 0.7978846, %v1745_v2  ;;  %v1747_v21 = vadd.f32 %v1739_v3, %v5923_v63  ;;  %v1725_v23 = vmul.f32 %v5937_v8, %v5937_v8  ;;  %v5947_v10 = vadd.f32 %v1717_v22, %v1584_v42 }
 0xb37   :  { %5217 = vtanh.f32 %v1752_v12  ;;  %v1754_v11 = vmul.f32 0.7978846, %v1746_v13  ;;  %v1732_v53 = vmul.f32 %v1724_v33, %v5934_v0  ;;  %v1726_v24 = vmul.f32 %v5942_v18, %v5942_v18 }
 0xb38   :  { %5219 = vtanh.f32 %v1753_v52  ;;  %v1755_v25 = vmul.f32 0.7978846, %v1747_v21  ;;  %v1733_v26 = vmul.f32 %v1725_v23, %v5937_v8  ;;  %v1727_v27 = vmul.f32 %v5947_v10, %v5947_v10 }
 0xb39   :  { %5221 = vtanh.f32 %v1754_v11  ;;  %v1740_v28 = vmul.f32 0.044715, %v1732_v53  ;;  %v1734_v29 = vmul.f32 %v1726_v24, %v5942_v18 }
 0xb3a   :  { %5223 = vtanh.f32 %v1755_v25  ;;  %v1741_v30 = vmul.f32 0.044715, %v1733_v26  ;;  %v1735_v32 = vmul.f32 %v1727_v27, %v5947_v10 }
 0xb3b   :  { %v1748_v34 = vadd.f32 %v1740_v28, %v5934_v0  ;;  %v1742_v35 = vmul.f32 0.044715, %v1734_v29  ;;  %v4240_v28 = vld [vmem:[%s6525_s13] ss:$0 sm:$0xff] }
 0xb3c   :  { %v1749_v36 = vadd.f32 %v1741_v30, %v5937_v8  ;;  %v1743_v37 = vmul.f32 0.044715, %v1735_v32 }
 0xb3d   :  { %v1756_v38 = vmul.f32 0.7978846, %v1748_v34  ;;  %v1750_v40 = vadd.f32 %v1742_v35, %v5942_v18 }
 0xb3e   :  { %v1757_v41 = vmul.f32 0.7978846, %v1749_v36  ;;  %v1751_v43 = vadd.f32 %v1743_v37, %v5947_v10 }
 0xb3f   :  { %5225 = vtanh.f32 %v1756_v38  ;;  %v1758_v42 = vmul.f32 0.7978846, %v1750_v40 }
 0xb40   :  { %5227 = vtanh.f32 %v1757_v41  ;;  %v1759_v44 = vmul.f32 0.7978846, %v1751_v43 }
 0xb41   :  { %v5218_v47 = vpop.eup %5217  ;;  %5229 = vtanh.f32 %v1758_v42 }
 0xb42   :  { %v5220_v49 = vpop.eup %5219  ;;  %v1768_v45 = vadd.f32 1.0, %v5218_v47  ;;  %5231 = vtanh.f32 %v1759_v44 }
 0xb43   :  { %v5222_v50 = vpop.eup %5221  ;;  %v1769_v54 = vadd.f32 1.0, %v5220_v49 }
 0xb44   :  { %v5224_v56 = vpop.eup %5223  ;;  %v1776_v57 = vmul.f32 0.5, %v1768_v45  ;;  %v1770_v6 = vadd.f32 1.0, %v5222_v50  ;;  %v5046_v45 = vld [vmem:[%s6542_s28 + $0xdc] ss:$12 sps:$4 sm:$0xff]  }
 0xb45   :  { %v1771_v20 = vadd.f32 1.0, %v5224_v56  ;;  %v1777_v59 = vmul.f32 0.5, %v1769_v54 }
 0xb46   :  { %v1778_v7 = vmul.f32 0.5, %v1770_v6  ;;  %v1784_v60 = vmul.f32 %v1776_v57, %v5913_v46 }
 0xb47   :  { %v1779_v58 = vmul.f32 0.5, %v1771_v20  ;;  %v1785_v62 = vmul.f32 %v1777_v59, %v5915_v48 }
 0xb48   :  { %v1786_v55 = vmul.f32 %v1778_v7, %v5919_v51 }
 0xb49   :  { %v5226_v61 = vpop.eup %5225  ;;  %v1787_v1 = vmul.f32 %v1779_v58, %v5923_v63 }
 0xb4a   :  { %v5228_v2 = vpop.eup %5227  ;;  %v1792_v3 = vpack.c.bf16 %v1786_v55, %v1784_v60  ;;  %v1772_v9 = vadd.f32 1.0, %v5226_v61 }
 0xb4b   :  { %v5230_v12 = vpop.eup %5229  ;;  %v1793_v13 = vpack.c.bf16 %v1787_v1, %v1785_v62  ;;  %v1773_v33 = vadd.f32 1.0, %v5228_v2 }
 0xb4c   :  { %v5232_v22 = vpop.eup %5231  ;;  %v1774_v52 = vadd.f32 1.0, %v5230_v12  ;;  %v1780_v21 = vmul.f32 0.5, %v1772_v9  ;;  %v5050_v9 = vld [vmem:[%s6542_s28 + $0xc8] ss:$12 sps:$4 sm:$0xff]   ;;  %v5047_v12 = vld [vmem:[%s6542_s28 + $0xf0] ss:$12 sps:$4 sm:$0xff]  }
 0xb4d   :  { %1963 = vmatprep.mubr.bf16.mxu1 %v1793_v13  ;;  %v1775_v23 = vadd.f32 1.0, %v5232_v22  ;;  %v1781_v11 = vmul.f32 0.5, %v1773_v33  ;;  %4749 = vmatprep.subr.bf16.mxu1 %v5050_v9  ;;  %v5053_v13 = vld [vmem:[%s6542_s28 + $0x10c] ss:$12 sps:$4 sm:$0xff]   ;;  %v5051_v22 = vld [vmem:[%s6542_s28 + $0x108] ss:$12 sps:$4 sm:$0xff]  }
 0xb4e   :  { %1964 = vmatmul.mubr.bf16.vlgmr.msra.gmra.mrb[24].mxu1 %v1792_v3  ;;  %v1782_v46 = vmul.f32 0.5, %v1774_v52  ;;  %v1788_v53 = vmul.f32 %v1780_v21, %v5934_v0  ;;  %v5049_v3 = vld [vmem:[%s6542_s28 + $0xf4] ss:$12 sps:$4 sm:$0xff]   ;;  %v5057_v52 = vld [vmem:[%s6542_s28 + $0x124] ss:$12 sps:$4 sm:$0xff]  }
 0xb4f   :  { %v1783_v51 = vmul.f32 0.5, %v1775_v23  ;;  %v1789_v63 = vmul.f32 %v1781_v11, %v5937_v8  ;;  %4750 = vmatpush3.bf16.msra.mxu1 %v5050_v9  ;;  %v5054_v33 = vld [vmem:[%s6542_s28 + $0xe0] ss:$12 sps:$4 sm:$0xff]   ;;  %v5058_v21 = vld [vmem:[%s6542_s28 + $0xf8] ss:$12 sps:$4 sm:$0xff]  }
 0xb50   :  { %v1790_v48 = vmul.f32 %v1782_v46, %v5942_v18  ;;  %4751 = vmatprep.subr.bf16.mxu1 %v5054_v33  ;;  %v5055_v23 = vld [vmem:[%s6542_s28 + $0x120] ss:$12 sps:$4 sm:$0xff]   ;;  %v5061_v11 = vld [vmem:[%s6542_s28 + $0x13c] ss:$12 sps:$4 sm:$0xff]  }
 0xb51   :  { %v1791_v24 = vmul.f32 %v1783_v51, %v5947_v10  ;;  %v5062_v46 = vld [vmem:[%s6542_s28 + $0x110] ss:$12 sps:$4 sm:$0xff]   ;;  %v5059_v51 = vld [vmem:[%s6542_s28 + $0x138] ss:$12 sps:$4 sm:$0xff]  }
 0xb52   :  { %v1794_v25 = vpack.c.bf16 %v1790_v48, %v1788_v53  ;;  %v5065_v53 = vld [vmem:[%s6542_s28 + $0x154] ss:$12 sps:$4 sm:$0xff]  }
 0xb53   :  { %v1795_v26 = vpack.c.bf16 %v1791_v24, %v1789_v63  ;;  %4752 = vmatpush3.bf16.msra.mxu1 %v5054_v33  ;;  %v5066_v48 = vld [vmem:[%s6542_s28 + $0x128] ss:$12 sps:$4 sm:$0xff]   ;;  %v5063_v63 = vld [vmem:[%s6542_s28 + $0x150] ss:$12 sps:$4 sm:$0xff]  }
 0xb54   :  { %4753 = vmatprep.subr.bf16.mxu1 %v5058_v21  ;;  %v5067_v24 = vld [vmem:[%s6542_s28 + $0x168] ss:$12 sps:$4 sm:$0xff]  }
 0xb55   :  { %1971 = vmatprep.mubr.bf16.mxu1 %v1795_v26  ;;  %v5070_v26 = vld [vmem:[%s6542_s28 + $0x140] ss:$12 sps:$4 sm:$0xff]  }
 0xb56   :  { %1972 = vmatmul.mubr.bf16.gmra.mrb[28].mxu1 %v1794_v25  ;;  %v5069_v25 = vld [vmem:[%s6542_s28 + $0x16c] ss:$12 sps:$4 sm:$0xff]  }
 0xb57   :  { %4754 = vmatpush3.bf16.msra.mxu1 %v5058_v21 }
 0xb58   :  { %4755 = vmatprep.subr.bf16.mxu1 %v5062_v46 }
 0xb5b   :  { %4756 = vmatpush3.bf16.msra.mxu1 %v5062_v46 }
 0xb5c   :  { %4757 = vmatprep.subr.bf16.mxu1 %v5066_v48 }
 0xb5f   :  { %4758 = vmatpush3.bf16.msra.mxu1 %v5066_v48 }
 0xb60   :  { %4759 = vmatprep.subr.bf16.mxu1 %v5070_v26 }
 0xb63   :  { %4760 = vmatpush3.bf16.msra.mxu1 %v5070_v26 }
 0xc21   :  { %v4517_v27 = vpop.f32.mrb[24].mxu1 }
 0xc22   :  { %v4518_v29 = vpop.f32.mrb[25].mxu1 }
 0xc23   :  { %v4519_v30 = vadd.f32 %v4518_v29, %v4517_v27  ;;  %v4520_v32 = vpop.f32.mrb[26].mxu1  ;;  %v5071_v27 = vld [vmem:[%s6542_s28 + $0x158] ss:$12 sps:$4 sm:$0xff]  }
 0xc24   :  { %v4521_v34 = vpop.f32.mrb[27].mxu1  ;;  %4761 = vmatprep.subr.bf16.mxu1 %v5071_v27 }
 0xc25   :  { %v1966_v0 = vadd.f32 %v4519_v30, %v4240_v28  ;;  %v4522_v35 = vadd.f32 %v4521_v34, %v4520_v32  ;;  %4762 = vmatpush3.bf16.msra.mxu1 %v5071_v27 }
 0xc27   :  { %v1969_v18 = vadd.f32 %v4522_v35, %v4240_v28  ;;  %v1980_v8 = vadd.f32 %v1966_v0, %v5894_v31  ;;  %v5041_v31 = vld [vmem:[%s6542_s28 + $0xc0] ss:$12 sps:$4 sm:$0xff]  }
 0xc29   :  { %1986 = vadd.xlane.f32.xlu0 %v1980_v8  ;;  %v4523_v10 = vpop.f32.mrb[28].mxu1  ;;  %v1981_v36 = vadd.f32 %v1969_v18, %v5896_v16  ;;  %v5043_v16 = vld [vmem:[%s6542_s28 + $0xc4] ss:$12 sps:$4 sm:$0xff]  }
 0xc2a   :  { %v4524_v37 = vpop.f32.mrb[29].mxu1  ;;  %2231 = vmatprep.subr.bf16.mxu0 %v5043_v16 }
 0xc2b   :  { %v4525_v38 = vadd.f32 %v4524_v37, %v4523_v10  ;;  %1988 = vadd.xlane.f32.xlu1 %v1981_v36  ;;  %v4526_v40 = vpop.f32.mrb[30].mxu1  ;;  %2232 = vmatpush1.bf16.msra.mxu0 %v5041_v31 }
 0xc2c   :  { %v4527_v41 = vpop.f32.mrb[31].mxu1  ;;  %2233 = vmatprep.subr.bf16.mxu0 %v5046_v45 }
 0xc2d   :  { %v1974_v43 = vadd.f32 %v4525_v38, %v4240_v28  ;;  %v4528_v42 = vadd.f32 %v4527_v41, %v4526_v40  ;;  %v4257_v41 = vld [vmem:[%s6526_s14] ss:$0 sm:$0xff] }
 0xc2f   :  { %v1977_v44 = vadd.f32 %v4528_v42, %v4240_v28  ;;  %v1982_v47 = vadd.f32 %v1974_v43, %v5901_v4  ;;  %v5044_v4 = vld [vmem:[%s6542_s28 + $0xd8] ss:$12 sps:$4 sm:$0xff]   ;;  %v5072_v28 = vld [vmem:[%s6542_s28 + $0x170] ss:$12 sps:$4 sm:$0xff]  }
 0xc30   :  { %2234 = vmatpush1.bf16.msra.mxu0 %v5044_v4  ;;  %4763 = vmatprep.subr.bf16.mxu1 %v5072_v28 }
 0xc31   :  { %1990 = vadd.xlane.f32.xlu0 %v1982_v47  ;;  %v1983_v49 = vadd.f32 %v1977_v44, %v5903_v5  ;;  %2235 = vmatprep.subr.bf16.mxu0 %v5049_v3 }
 0xc32   :  { %4764 = vmatpush3.bf16.msra.mxu1 %v5072_v28 }
 0xc33   :  { %1992 = vadd.xlane.f32.xlu1 %v1983_v49 }
 0xc34   :  { %2236 = vmatpush1.bf16.msra.mxu0 %v5047_v12 }
 0xc35   :  { %2237 = vmatprep.subr.bf16.mxu0 %v5053_v13 }
 0xc38   :  { %2238 = vmatpush1.bf16.msra.mxu0 %v5051_v22 }
 0xc39   :  { %2239 = vmatprep.subr.bf16.mxu0 %v5057_v52 }
 0xc3c   :  { %2240 = vmatpush1.bf16.msra.mxu0 %v5055_v23 }
 0xc3d   :  { %2241 = vmatprep.subr.bf16.mxu0 %v5061_v11 }
 0xc40   :  { %2242 = vmatpush1.bf16.msra.mxu0 %v5059_v51 }
 0xc41   :  { %2243 = vmatprep.subr.bf16.mxu0 %v5065_v53 }
 0xc44   :  { %2244 = vmatpush1.bf16.msra.mxu0 %v5063_v63 }
 0xc45   :  { %2245 = vmatprep.subr.bf16.mxu0 %v5069_v25 }
 0xc48   :  { %2246 = vmatpush1.bf16.msra.mxu0 %v5067_v24 }
 0xcb6   :  { %v1987_v5 = vpop.xlane.xlu0 %1986 }
 0xcb7   :  { %v1994_v50 = vmul.f32 0.0078125, %v1987_v5 }
 0xcb8   :  { %v1989_v54 = vpop.xlane.xlu1 %1988 }
 0xcb9   :  { %v5988_v56 = vsub.f32 %v1980_v8, %v1994_v50  ;;  %v1995_v57 = vmul.f32 0.0078125, %v1989_v54 }
 0xcbb   :  { %v5990_v6 = vsub.f32 %v1981_v36, %v1995_v57  ;;  %v2002_v20 = vmul.f32 %v5988_v56, %v5988_v56 }
 0xcbd   :  { %2006 = vadd.xlane.f32.xlu0 %v2002_v20  ;;  %v2003_v59 = vmul.f32 %v5990_v6, %v5990_v6 }
 0xcbe   :  { %v1991_v7 = vpop.xlane.xlu0 %1990 }
 0xcbf   :  { %v1996_v58 = vmul.f32 0.0078125, %v1991_v7  ;;  %2008 = vadd.xlane.f32.xlu1 %v2003_v59 }
 0xcc0   :  { %v1993_v60 = vpop.xlane.xlu1 %1992 }
 0xcc1   :  { %v5996_v55 = vsub.f32 %v1982_v47, %v1996_v58  ;;  %v1997_v61 = vmul.f32 0.0078125, %v1993_v60  ;;  %v4291_v58 = vld [vmem:[%s6517_s5 + $0x3] sm:$0x7] }
 0xcc2   :  { %v2091_v60 = vrot.slane %v4291_v58, %v5617_v15  ;;  %v2099_v52 = vrot.slane %v4291_v58, %v201_v19 }
 0xcc3   :  { %v5998_v62 = vsub.f32 %v1983_v49, %v1997_v61  ;;  %v2004_v1 = vmul.f32 %v5996_v55, %v5996_v55  ;;  %v4258_v49 = vld [vmem:[%s6527_s15] ss:$0 sm:$0xff]  ;;  %v2095_v61 = vrot.slane %v4291_v58, %v5623_v17 }
 0xcc5   :  { %2010 = vadd.xlane.f32.xlu0 %v2004_v1  ;;  %v2005_v2 = vmul.f32 %v5998_v62, %v5998_v62 }
 0xcc7   :  { %2012 = vadd.xlane.f32.xlu1 %v2005_v2 }
 0xd4a   :  { %v2007_v29 = vpop.xlane.xlu0 %2006 }
 0xd4b   :  { %v2014_v30 = vmul.f32 0.0078125, %v2007_v29 }
 0xd4c   :  { %v2009_v32 = vpop.xlane.xlu1 %2008 }
 0xd4d   :  { %v2018_v34 = vadd.f32 1e-05, %v2014_v30  ;;  %v2015_v0 = vmul.f32 0.0078125, %v2009_v32 }
 0xd4f   :  { %5233 = vrsqrt.f32 %v2018_v34  ;;  %v2019_v35 = vadd.f32 1e-05, %v2015_v0 }
 0xd51   :  { %5235 = vrsqrt.f32 %v2019_v35 }
 0xd52   :  { %v2011_v18 = vpop.xlane.xlu0 %2010 }
 0xd53   :  { %v2016_v8 = vmul.f32 0.0078125, %v2011_v18 }
 0xd54   :  { %v2013_v10 = vpop.xlane.xlu1 %2012 }
 0xd55   :  { %v2020_v36 = vadd.f32 1e-05, %v2016_v8  ;;  %v2017_v37 = vmul.f32 0.0078125, %v2013_v10 }
 0xd57   :  { %5237 = vrsqrt.f32 %v2020_v36  ;;  %v2021_v38 = vadd.f32 1e-05, %v2017_v37 }
 0xd59   :  { %v5234_v40 = vpop.eup %5233  ;;  %5239 = vrsqrt.f32 %v2021_v38 }
 0xd5a   :  { %v2026_v43 = vmul.f32 %v5234_v40, %v5988_v56 }
 0xd5b   :  { %v5236_v42 = vpop.eup %5235 }
 0xd5c   :  { %v2036_v44 = vmul.f32 %v4257_v41, %v2026_v43  ;;  %v2027_v47 = vmul.f32 %v5236_v42, %v5990_v6 }
 0xd5e   :  { %v2037_v31 = vmul.f32 %v4257_v41, %v2027_v47  ;;  %v6072_v16 = vadd.f32 %v4258_v49, %v2036_v44 }
 0xd60   :  { %v6074_v45 = vadd.f32 %v4258_v49, %v2037_v31 }
 0xd61   :  { %v5238_v4 = vpop.eup %5237 }
 0xd62   :  { %v2050_v5 = vpack.c.bf16 %v6074_v45, %v6072_v16  ;;  %v2028_v50 = vmul.f32 %v5238_v4, %v5996_v55  ;;  %v6139_v4 = vld [vmem:[%s6545_s30] sm:$0xff] }
 0xd63   :  { %v5240_v54 = vpop.eup %5239 }
 0xd64   :  { %2264 = vmatmul.mubr.bf16.vlgmr.msra.gmra.mrb[32].mxu0 %v2050_v5  ;;  %4765 = vmatprep.mubr.bf16.mxu1 %v2050_v5  ;;  %v2029_v56 = vmul.f32 %v5240_v54, %v5998_v62  ;;  %v2038_v57 = vmul.f32 %v4257_v41, %v2028_v50 }
 0xd65   :  { %2273 = vmatprep.mubr.bf16.mxu0 %v5366_v39 }
 0xd66   :  { %v2039_v6 = vmul.f32 %v4257_v41, %v2029_v56  ;;  %v6081_v20 = vadd.f32 %v4258_v49, %v2038_v57  ;;  %v6146_v56 = vld [vmem:[%s6545_s30 + $0x8] sm:$0xff] }
 0xd68   :  { %v6083_v59 = vadd.f32 %v4258_v49, %v2039_v6  ;;  %v6152_v6 = vld [vmem:[%s6545_s30 + $0x10] sm:$0xff] }
 0xd6a   :  { %v2051_v7 = vpack.c.bf16 %v6083_v59, %v6081_v20 }
 0xd6c   :  { %2274 = vmatmul.mubr.bf16.gmra.mrb[36].mxu0 %v2051_v7  ;;  %4766 = vmatmul.mubr.bf16.vlgmr.msra.gmra.mrb[32].mxu1 %v2051_v7 }
 0xe37   :  { %v2265_v55 = vpop.f32.mrb[32].mxu0 }
 0xe38   :  { %v2267_v62 = vpop.f32.mrb[33].mxu0  ;;  %v2266_v2 = vadd.f32 %v2265_v55, %v2091_v60  ;;  %v6160_v55 = vld [vmem:[%s6545_s30 + $0x18] sm:$0xff] }
 0xe39   :  { %v2269_v1 = vpop.f32.mrb[34].mxu0  ;;  %v2268_v12 = vadd.f32 %v2267_v62, %v2095_v61 }
 0xe3a   :  { %v2270_v3 = vadd.f32 %v2269_v1, %v2091_v60  ;;  %v2271_v9 = vpop.f32.mrb[35].mxu0 }
 0xe3b   :  { %v2272_v13 = vadd.f32 %v2271_v9, %v2095_v61 }
 0xe3c   :  { %v6092_v33 = vpack.c.bf16 %v2270_v3, %v2266_v2 }
 0xe3d   :  { %v6094_v22 = vpack.c.bf16 %v2272_v13, %v2268_v12 }
 0xe3e   :  { %4773 = vmatprep.mubr.msk.bf16.mxu0 %vm466_vm0, %v6092_v33 }
 0xe3f   :  { %2616 = vrot.lane.b32.xlu0 %v6094_v22, %s5367_s12  ;;  %v2275_v21 = vpop.f32.mrb[36].mxu0  ;;  %v4767_v23 = vpop.f32.mrb[32].mxu1  ;;  %4945 = vmatprep.subr.msk.bf16.mxu0 %vm466_vm0, %v6094_v22  ;;  %v2372_v11 = vsel %vm466_vm0, %v6094_v22, 0 }
 0xe40   :  { %v2277_v46 = vpop.f32.mrb[37].mxu0  ;;  %v2318_v51 = vpop.f32.mrb[33].mxu1  ;;  %4770 = vmatpush3.bf16.xpose.msra.mxu0 %v2372_v11  ;;  %v2276_v63 = vadd.f32 %v2275_v21, %v2091_v60  ;;  %v2327_v24 = vadd.f32 %v4767_v23, %v2099_v52 }
 0xe41   :  { %v2279_v53 = vpop.f32.mrb[38].mxu0  ;;  %v4768_v48 = vpop.f32.mrb[34].mxu1  ;;  %v2278_v27 = vadd.f32 %v2277_v46, %v2095_v61  ;;  %v2319_v28 = vadd.f32 %v2318_v51, %v2099_v52 }
 0xe42   :  { %v2280_v14 = vadd.f32 %v2279_v53, %v2091_v60  ;;  %v2330_v19 = vadd.f32 %v4768_v48, %v2099_v52  ;;  %v2281_v25 = vpop.f32.mrb[39].mxu0  ;;  %v2321_v26 = vpop.f32.mrb[35].mxu1 }
 0xe43   :  { %v2282_v29 = vadd.f32 %v2281_v25, %v2095_v61  ;;  %v2322_v30 = vadd.f32 %v2321_v26, %v2099_v52 }
 0xe44   :  { %v6106_v32 = vpack.c.bf16 %v2280_v14, %v2276_v63  ;;  %v6108_v34 = vpack.c.bf16 %v2330_v19, %v2327_v24 }
 0xe45   :  { %v6110_v0 = vpack.c.bf16 %v2282_v29, %v2278_v27  ;;  %v6112_v35 = vpack.c.bf16 %v2322_v30, %v2319_v28 }
 0xe47   :  { %4777 = vmatprep.subr.bf16.mxu1 %v6112_v35  ;;  %2618 = vrot.lane.b32.xlu1 %v6110_v0, %s5367_s12  ;;  %v2375_v18 = vsel %vm466_vm0, %v6110_v0, 0 }
 0xe48   :  { %4946 = vmatprep.subr.msk.bf16.mxu0 %vm466_vm0, %v6110_v0  ;;  %4778 = vmatpush3.bf16.msra.mxu1 %v6112_v35 }
 0xe49   :  { %4772 = vmatpush3.bf16.xpose.msra.mxu0 %v2375_v18  ;;  %4779 = vmatprep.subr.bf16.mxu1 %v6108_v34 }
 0xe4b   :  { %2610 = vrot.lane.b32.xlu1 %v6092_v33, %s5367_s12 }
 0xe4c   :  { %4780 = vmatpush3.bf16.msra.mxu1 %v6108_v34 }
 0xe4f   :  { %2612 = vrot.lane.b32.xlu1 %v6106_v32, %s5367_s12 }
 0xe50   :  { %4774 = vmatmul.mubr.msk.bf16.vlgmr.msra.gmra.mrb[40].mxu0 %vm466_vm0, %v6106_v32 }
 0xeb1   :  { %v2617_v8 = vpop.permute.xlu0 %2616 }
 0xeb2   :  { %v2627_v10 = vsel %vm466_vm0, %v2617_v8, 0  ;;  %4947 = vmatprep.subr.msk.bf16.mxu0 %vm466_vm0, %v2617_v8 }
 0xeb3   :  { %4794 = vmatpush3.bf16.xpose.msra.mxu0 %v2627_v10 }
 0xeb9   :  { %v2619_v36 = vpop.permute.xlu1 %2618 }
 0xeba   :  { %v2630_v37 = vsel %vm466_vm0, %v2619_v36, 0  ;;  %4948 = vmatprep.subr.msk.bf16.mxu0 %vm466_vm0, %v2619_v36 }
 0xebb   :  { %4796 = vmatpush3.bf16.xpose.msra.mxu0 %v2630_v37 }
 0xebd   :  { %v2611_v38 = vpop.permute.xlu1 %2610 }
 0xebe   :  { %4797 = vmatprep.mubr.msk.bf16.mxu0 %vm466_vm0, %v2611_v38 }
 0xec1   :  { %v2613_v40 = vpop.permute.xlu1 %2612 }
 0xec2   :  { %4798 = vmatmul.mubr.msk.bf16.vlgmr.msra.gmra.mrb[44].mxu0 %vm466_vm0, %v2613_v40 }
 0xf23   :  { %v4775_v41 = vpop.f32.mrb[40].mxu0 }
 0xf24   :  { %v2411_v43 = vpop.f32.mrb[41].mxu0  ;;  %v2428_v42 = vmul.f32 0.17677669, %v4775_v41 }
 0xf25   :  { %v2426_v44 = vmul.f32 0.17677669, %v2411_v43  ;;  %v4776_v47 = vpop.f32.mrb[42].mxu0 }
 0xf26   :  { %v2414_v49 = vpop.f32.mrb[43].mxu0  ;;  %v2429_v50 = vmul.f32 0.17677669, %v4776_v47  ;;  %v2432_v7 = vadd.f32 %v6152_v6, %v2428_v42 }
 0xf27   :  { %v2427_v31 = vmul.f32 0.17677669, %v2414_v49  ;;  %v2430_v5 = vadd.f32 %v6139_v4, %v2426_v44 }
 0xf28   :  { %v2440_v60 = vsel %vm466_vm0, %v2432_v7, -inf  ;;  %v2433_v61 = vadd.f32 %v6160_v55, %v2429_v50 }
 0xf29   :  { %v2434_v54 = vsel %vm466_vm0, %v2430_v5, -inf  ;;  %v2431_v57 = vadd.f32 %v6146_v56, %v2427_v31 }
 0xf2a   :  { %2435 = vmax.xlane.f32.xlu0 %v2434_v54  ;;  %v2443_v62 = vsel %vm466_vm0, %v2433_v61, -inf }
 0xf2b   :  { %v2437_v58 = vsel %vm466_vm0, %v2431_v57, -inf }
 0xf2c   :  { %2438 = vmax.xlane.f32.xlu1 %v2437_v58 }
 0xf2e   :  { %2441 = vmax.xlane.f32.xlu0 %v2440_v60 }
 0xf32   :  { %2444 = vmax.xlane.f32.xlu0 %v2443_v62 }
 0xf95   :  { %v4799_v1 = vpop.f32.mrb[44].mxu0 }
 0xf96   :  { %v2666_v2 = vpop.f32.mrb[45].mxu0  ;;  %v2683_v8 = vmul.f32 0.17677669, %v4799_v1 }
 0xf97   :  { %v4800_v3 = vpop.f32.mrb[46].mxu0  ;;  %v2681_v18 = vmul.f32 0.17677669, %v2666_v2 }
 0xf98   :  { %v2669_v9 = vpop.f32.mrb[47].mxu0  ;;  %v2684_v36 = vmul.f32 0.17677669, %v4800_v3  ;;  %v2687_v38 = vadd.f32 %v6152_v6, %v2683_v8 }
 0xf99   :  { %v2685_v10 = vadd.f32 %v6139_v4, %v2681_v18  ;;  %v2682_v40 = vmul.f32 0.17677669, %v2669_v9 }
 0xf9a   :  { %v2695_v41 = vsel %vm466_vm0, %v2687_v38, -inf  ;;  %v2688_v43 = vadd.f32 %v6160_v55, %v2684_v36 }
 0xf9b   :  { %v2689_v37 = vsel %vm466_vm0, %v2685_v10, -inf  ;;  %v2686_v44 = vadd.f32 %v6146_v56, %v2682_v40  ;;  %v5074_v40 = vld [vmem:[%s6518_s6 + $0x48] sm:$0xff]  }
 0xf9c   :  { %v2698_v42 = vsel %vm466_vm0, %v2688_v43, -inf }
 0xf9d   :  { %v2692_v47 = vsel %vm466_vm0, %v2686_v44, -inf }
 0xfb7   :  { %v2436_v12 = vpop.xlane.xlu0 %2435 }
 0xfb8   :  { %v2446_v13 = vsub.f32 %v2430_v5, %v2436_v12 }
 0xfb9   :  { %v2439_v52 = vpop.xlane.xlu1 %2438 }
 0xfba   :  { %v2450_v21 = vmul.f32 1.442695, %v2446_v13  ;;  %v2447_v23 = vsub.f32 %v2431_v57, %v2439_v52 }
 0xfbb   :  { %v2442_v11 = vpop.xlane.xlu0 %2441 }
 0xfbc   :  { %5241 = vpow2.f32 %v2450_v21  ;;  %v2452_v46 = vmul.f32 1.442695, %v2447_v23  ;;  %v2448_v51 = vsub.f32 %v2432_v7, %v2442_v11 }
 0xfbe   :  { %5243 = vpow2.f32 %v2452_v46  ;;  %v2454_v53 = vmul.f32 1.442695, %v2448_v51 }
 0xfbf   :  { %v2445_v48 = vpop.xlane.xlu0 %2444 }
 0xfc0   :  { %5245 = vpow2.f32 %v2454_v53  ;;  %v2449_v63 = vsub.f32 %v2433_v61, %v2445_v48 }
 0xfc2   :  { %v2456_v24 = vmul.f32 1.442695, %v2449_v63 }
 0xfc4   :  { %5247 = vpow2.f32 %v2456_v24 }
 0xfc6   :  { %v5242_v14 = vpop.eup %5241 }
 0xfc7   :  { %v2458_v19 = vsel %vm466_vm0, %v5242_v14, 0.0 }
 0xfc8   :  { %v5244_v25 = vpop.eup %5243  ;;  %2459 = vadd.xlane.f32.xlu0 %v2458_v19 }
 0xfc9   :  { %v2461_v26 = vsel %vm466_vm0, %v5244_v25, 0.0 }
 0xfca   :  { %v5246_v27 = vpop.eup %5245  ;;  %2462 = vadd.xlane.f32.xlu1 %v2461_v26 }
 0xfcb   :  { %v2464_v28 = vsel %vm466_vm0, %v5246_v27, 0.0 }
 0xfcc   :  { %2465 = vadd.xlane.f32.xlu0 %v2464_v28 }
 0xfce   :  { %v5248_v29 = vpop.eup %5247 }
 0xfcf   :  { %v2467_v30 = vsel %vm466_vm0, %v5248_v29, 0.0 }
 0xfd0   :  { %2468 = vadd.xlane.f32.xlu1 %v2467_v30 }
 0xfe1   :  { %2877 = vrot.lane.b32.xlu1 %v6110_v0, %s5364_s4 }
 0xfe2   :  { %2875 = vrot.lane.b32.xlu0 %v6094_v22, %s5364_s4 }
 0xfe5   :  { %2871 = vrot.lane.b32.xlu1 %v6092_v33, %s5364_s4 }
 0xfe9   :  { %2873 = vrot.lane.b32.xlu1 %v6106_v32, %s5364_s4 }
0x1001   :  { %2690 = vmax.xlane.f32.xlu0 %v2689_v37 }
0x1005   :  { %2696 = vmax.xlane.f32.xlu0 %v2695_v41 }
0x1009   :  { %2699 = vmax.xlane.f32.xlu0 %v2698_v42 }
0x100d   :  { %2693 = vmax.xlane.f32.xlu1 %v2692_v47 }
0x1055   :  { %v2460_v49 = vpop.xlane.xlu0 %2459 }
0x1056   :  { %5249 = vrcp.f32 %v2460_v49 }
0x1057   :  { %v2463_v31 = vpop.xlane.xlu1 %2462 }
0x1058   :  { %5251 = vrcp.f32 %v2463_v31 }
0x1059   :  { %v2466_v5 = vpop.xlane.xlu0 %2465 }
0x105a   :  { %5253 = vrcp.f32 %v2466_v5 }
0x105d   :  { %v2469_v50 = vpop.xlane.xlu1 %2468  ;;  %v2876_v54 = vpop.permute.xlu0 %2875 }
0x105e   :  { %5255 = vrcp.f32 %v2469_v50  ;;  %v2886_v57 = vsel %vm466_vm0, %v2876_v54, 0  ;;  %4949 = vmatprep.subr.msk.bf16.mxu0 %vm466_vm0, %v2876_v54 }
0x105f   :  { %4818 = vmatpush3.bf16.xpose.msra.mxu0 %v2886_v57 }
0x1060   :  { %v5250_v7 = vpop.eup %5249 }
0x1061   :  { %v2878_v58 = vpop.permute.xlu1 %2877  ;;  %v2474_v61 = vmul.f32 %v5250_v7, %v5242_v14 }
0x1062   :  { %v5252_v60 = vpop.eup %5251  ;;  %4950 = vmatprep.subr.msk.bf16.mxu0 %vm466_vm0, %v2878_v58  ;;  %v2889_v9 = vsel %vm466_vm0, %v2878_v58, 0 }
0x1063   :  { %v2475_v62 = vmul.f32 %v5252_v60, %v5244_v25 }
0x1064   :  { %v5254_v3 = vpop.eup %5253 }
0x1065   :  { %v2872_v1 = vpop.permute.xlu1 %2871  ;;  %v2478_v2 = vpack.c.bf16 %v2475_v62, %v2474_v61  ;;  %v2476_v13 = vmul.f32 %v5254_v3, %v5246_v27 }
0x1066   :  { %4821 = vmatprep.mubr.msk.bf16.mxu0 %vm466_vm0, %v2872_v1 }
0x1067   :  { %4781 = vmatprep.mubr.msk.bf16.mxu1 %vm466_vm0, %v2478_v2  ;;  %4820 = vmatpush3.bf16.xpose.msra.mxu0 %v2889_v9 }
0x1068   :  { %v5256_v12 = vpop.eup %5255 }
0x1069   :  { %v2477_v52 = vmul.f32 %v5256_v12, %v5248_v29  ;;  %v2874_v23 = vpop.permute.xlu1 %2873 }
0x106b   :  { %v2479_v21 = vpack.c.bf16 %v2477_v52, %v2476_v13 }
0x106d   :  { %4782 = vmatmul.mubr.msk.bf16.vlgmr.msra.gmra.mrb[36].mxu1 %vm466_vm0, %v2479_v21 }
0x106e   :  { %4822 = vmatmul.mubr.msk.bf16.vlgmr.msra.gmra.mrb[48].mxu0 %vm466_vm0, %v2874_v23 }
0x108e   :  { %v2691_v11 = vpop.xlane.xlu0 %2690 }
0x108f   :  { %v2701_v46 = vsub.f32 %v2685_v10, %v2691_v11 }
0x1091   :  { %v2705_v48 = vmul.f32 1.442695, %v2701_v46 }
0x1092   :  { %v2697_v51 = vpop.xlane.xlu0 %2696 }
0x1093   :  { %v2703_v53 = vsub.f32 %v2687_v38, %v2697_v51  ;;  %v5073_v38 = vld [vmem:[%s6518_s6 + $0x40] sm:$0xff]  }
0x1094   :  { %4785 = vmatprep.subr.bf16.mxu1 %v5073_v38 }
0x1095   :  { %v2709_v63 = vmul.f32 1.442695, %v2703_v53  ;;  %4786 = vmatpush3.bf16.msra.mxu1 %v5073_v38 }
0x1096   :  { %v2700_v24 = vpop.xlane.xlu0 %2699  ;;  %4787 = vmatprep.subr.bf16.mxu1 %v5074_v40 }
0x1097   :  { %5257 = vpow2.f32 %v2709_v63  ;;  %v2704_v14 = vsub.f32 %v2688_v43, %v2700_v24 }
0x1098   :  { %5259 = vpow2.f32 %v2705_v48 }
0x1099   :  { %v2711_v19 = vmul.f32 1.442695, %v2704_v14  ;;  %4788 = vmatpush3.bf16.msra.mxu1 %v5074_v40 }
0x109a   :  { %v2694_v25 = vpop.xlane.xlu1 %2693 }
0x109b   :  { %5261 = vpow2.f32 %v2711_v19  ;;  %v2702_v26 = vsub.f32 %v2686_v44, %v2694_v25 }
0x109d   :  { %v2707_v27 = vmul.f32 1.442695, %v2702_v26 }
0x109f   :  { %5263 = vpow2.f32 %v2707_v27 }
0x10a1   :  { %v6192_v28 = vpop.eup %5257 }
0x10a2   :  { %v2719_v29 = vsel %vm466_vm0, %v6192_v28, 0.0  ;;  %v5260_v30 = vpop.eup %5259 }
0x10a3   :  { %2720 = vadd.xlane.f32.xlu0 %v2719_v29  ;;  %v2713_v8 = vsel %vm466_vm0, %v5260_v30, 0.0 }
0x10a5   :  { %v6196_v18 = vpop.eup %5261 }
0x10a6   :  { %v2722_v10 = vsel %vm466_vm0, %v6196_v18, 0.0 }
0x10a7   :  { %2714 = vadd.xlane.f32.xlu0 %v2713_v8  ;;  %2723 = vadd.xlane.f32.xlu1 %v2722_v10  ;;  %v5076_v8 = vld [vmem:[%s6518_s6 + $0x58] sm:$0xff]  }
0x10a9   :  { %v5264_v36 = vpop.eup %5263 }
0x10aa   :  { %v2716_v37 = vsel %vm466_vm0, %v5264_v36, 0.0 }
0x10ab   :  { %2717 = vadd.xlane.f32.xlu1 %v2716_v37 }
0x10bc   :  { %2739 = vrot.lane.b32.xlu1 %v6108_v34, %s5367_s12 }
0x10bd   :  { %2737 = vrot.lane.b32.xlu0 %v6112_v35, %s5367_s12 }
0x10c0   :  { %3132 = vrot.lane.b32.xlu1 %v6094_v22, %s5368_s22 }
0x10c1   :  { %3128 = vrot.lane.b32.xlu0 %v6092_v33, %s5368_s22 }
0x10c4   :  { %3134 = vrot.lane.b32.xlu1 %v6110_v0, %s5368_s22 }
0x10c8   :  { %3130 = vrot.lane.b32.xlu1 %v6106_v32, %s5368_s22 }
0x1130   :  { %v2721_v41 = vpop.xlane.xlu0 %2720 }
0x1134   :  { %v2724_v43 = vpop.xlane.xlu1 %2723  ;;  %v2715_v42 = vpop.xlane.xlu0 %2714 }
0x1135   :  { %5265 = vrcp.f32 %v2715_v42 }
0x1138   :  { %v2718_v44 = vpop.xlane.xlu1 %2717  ;;  %v2738_v47 = vpop.permute.xlu0 %2737 }
0x1139   :  { %5267 = vrcp.f32 %v2718_v44  ;;  %4801 = vmatprep.subr.bf16.mxu1 %v2738_v47 }
0x113a   :  { %5269 = vrcp.f32 %v2724_v43 }
0x113b   :  { %5271 = vrcp.f32 %v2721_v41 }
0x113c   :  { %v2740_v49 = vpop.permute.xlu1 %2739  ;;  %v3129_v22 = vpop.permute.xlu0 %3128 }
0x113d   :  { %4845 = vmatprep.mubr.msk.bf16.mxu0 %vm466_vm0, %v3129_v22 }
0x113f   :  { %v5266_v0 = vpop.eup %5265 }
0x1140   :  { %v4783_v33 = vpop.f32.mrb[36].mxu1  ;;  %v3133_v31 = vpop.permute.xlu1 %3132  ;;  %v2729_v12 = vmul.f32 %v5266_v0, %v5260_v30 }
0x1141   :  { %v3143_v5 = vsel %vm466_vm0, %v3133_v31, 0  ;;  %v2520_v32 = vpop.f32.mrb[37].mxu1  ;;  %v4823_v50 = vpop.f32.mrb[48].mxu0  ;;  %4951 = vmatprep.subr.msk.bf16.mxu0 %vm466_vm0, %v3133_v31 }
0x1142   :  { %v4784_v54 = vpop.f32.mrb[38].mxu1  ;;  %v2925_v57 = vpop.f32.mrb[49].mxu0  ;;  %4842 = vmatpush3.bf16.xpose.msra.mxu0 %v3143_v5  ;;  %v2942_v58 = vmul.f32 0.17677669, %v4823_v50 }
0x1143   :  { %v5268_v7 = vpop.eup %5267  ;;  %v2536_v60 = vpack.c.bf16 %v4784_v54, %v4783_v33  ;;  %v2940_v61 = vmul.f32 0.17677669, %v2925_v57  ;;  %v2523_v62 = vpop.f32.mrb[39].mxu1 }
0x1144   :  { %v4824_v1 = vpop.f32.mrb[50].mxu0  ;;  %v2535_v2 = vpack.c.bf16 %v2523_v62, %v2520_v32  ;;  %v3135_v9 = vpop.permute.xlu1 %3134  ;;  %v2730_v13 = vmul.f32 %v5268_v7, %v5264_v36  ;;  %v2946_v46 = vadd.f32 %v6152_v6, %v2942_v58 }
0x1145   :  { %v2928_v3 = vpop.f32.mrb[51].mxu0  ;;  %v2944_v52 = vadd.f32 %v6139_v4, %v2940_v61  ;;  %4952 = vmatprep.subr.msk.bf16.mxu0 %vm466_vm0, %v3135_v9  ;;  %v5270_v23 = vpop.eup %5269  ;;  %v2943_v51 = vmul.f32 0.17677669, %v4824_v1  ;;  %v3146_v14 = vsel %vm466_vm0, %v3135_v9, 0 }
0x1146   :  { %v2941_v21 = vmul.f32 0.17677669, %v2928_v3  ;;  %4789 = vmatprep.mubr.msk.bf16.mxu1 %vm466_vm0, %v2535_v2  ;;  %v2733_v11 = vpack.c.bf16 %v2730_v13, %v2729_v12  ;;  %v5272_v63 = vpop.eup %5271  ;;  %v2732_v24 = vmul.f32 %v5270_v23, %v6196_v18  ;;  %v2954_v27 = vsel %vm466_vm0, %v2946_v46, -inf }
0x1147   :  { %4790 = vmatmul.mubr.msk.bf16.vlgmr.msra.gmra.mrb[40].mxu1 %vm466_vm0, %v2536_v60  ;;  %v2948_v48 = vsel %vm466_vm0, %v2944_v52, -inf  ;;  %v2731_v25 = vmul.f32 %v5272_v63, %v6192_v28  ;;  %v2947_v26 = vadd.f32 %v6160_v55, %v2943_v51  ;;  %v5075_v28 = vld [vmem:[%s6518_s6 + $0x50] sm:$0xff]  }
0x1148   :  { %v2945_v53 = vadd.f32 %v6146_v56, %v2941_v21  ;;  %4802 = vmatpush3.bf16.msra.mxu1 %v2738_v47  ;;  %2949 = vmax.xlane.f32.xlu0 %v2948_v48  ;;  %v3131_v18 = vpop.permute.xlu1 %3130 }
0x1149   :  { %4803 = vmatprep.subr.bf16.mxu1 %v2740_v49  ;;  %4805 = vmatprep.mubr.msk.bf16.mxu1 %vm466_vm0, %v2733_v11  ;;  %v2734_v29 = vpack.c.bf16 %v2732_v24, %v2731_v25  ;;  %v2957_v30 = vsel %vm466_vm0, %v2947_v26, -inf }
0x114a   :  { %v2951_v19 = vsel %vm466_vm0, %v2945_v53, -inf  ;;  %4844 = vmatpush3.bf16.xpose.msra.mxu0 %v3146_v14 }
0x114b   :  { %2952 = vmax.xlane.f32.xlu1 %v2951_v19 }
0x114c   :  { %4804 = vmatpush3.bf16.msra.mxu1 %v2740_v49  ;;  %2955 = vmax.xlane.f32.xlu0 %v2954_v27 }
0x114d   :  { %4809 = vmatprep.subr.bf16.mxu1 %v5075_v28 }
0x114f   :  { %4806 = vmatmul.mubr.msk.bf16.vlgmr.msra.gmra.mrb[44].mxu1 %vm466_vm0, %v2734_v29 }
0x1150   :  { %2958 = vmax.xlane.f32.xlu0 %v2957_v30  ;;  %4810 = vmatpush3.bf16.msra.mxu1 %v5075_v28 }
0x1151   :  { %4846 = vmatmul.mubr.msk.bf16.vlgmr.msra.gmra.mrb[52].mxu0 %vm466_vm0, %v3131_v18  ;;  %4811 = vmatprep.subr.bf16.mxu1 %v5076_v8 }
0x1152   :  { %3601 = vmatprep.mubr.bf16.mxu0 %v5366_v39 }
0x1154   :  { %4812 = vmatpush3.bf16.msra.mxu1 %v5076_v8 }
0x11d5   :  { %v2950_v10 = vpop.xlane.xlu0 %2949 }
0x11d6   :  { %v2960_v36 = vsub.f32 %v2944_v52, %v2950_v10 }
0x11d8   :  { %v2953_v37 = vpop.xlane.xlu1 %2952  ;;  %v2964_v41 = vmul.f32 1.442695, %v2960_v36 }
0x11d9   :  { %v2956_v38 = vpop.xlane.xlu0 %2955  ;;  %v2961_v43 = vsub.f32 %v2945_v53, %v2953_v37 }
0x11da   :  { %v2962_v40 = vsub.f32 %v2946_v46, %v2956_v38 }
0x11db   :  { %v2966_v49 = vmul.f32 1.442695, %v2961_v43 }
0x11dc   :  { %v2968_v42 = vmul.f32 1.442695, %v2962_v40 }
0x11dd   :  { %v2959_v44 = vpop.xlane.xlu0 %2958 }
0x11de   :  { %5273 = vpow2.f32 %v2968_v42  ;;  %v2963_v47 = vsub.f32 %v2947_v26, %v2959_v44 }
0x11df   :  { %5275 = vpow2.f32 %v2964_v41 }
0x11e0   :  { %v2970_v22 = vmul.f32 1.442695, %v2963_v47 }
0x11e2   :  { %5277 = vpow2.f32 %v2970_v22 }
0x11e3   :  { %5279 = vpow2.f32 %v2966_v49 }
0x11e8   :  { %v6247_v33 = vpop.eup %5273 }
0x11e9   :  { %v2978_v31 = vsel %vm466_vm0, %v6247_v33, 0.0  ;;  %v5276_v0 = vpop.eup %5275 }
0x11ea   :  { %2979 = vadd.xlane.f32.xlu0 %v2978_v31  ;;  %v2972_v32 = vsel %vm466_vm0, %v5276_v0, 0.0 }
0x11ec   :  { %v5278_v5 = vpop.eup %5277 }
0x11ed   :  { %v2981_v50 = vsel %vm466_vm0, %v5278_v5, 0.0  ;;  %v5280_v54 = vpop.eup %5279 }
0x11ee   :  { %2973 = vadd.xlane.f32.xlu0 %v2972_v32  ;;  %2982 = vadd.xlane.f32.xlu1 %v2981_v50  ;;  %v2975_v57 = vsel %vm466_vm0, %v5280_v54, 0.0 }
0x11f2   :  { %2976 = vadd.xlane.f32.xlu1 %v2975_v57 }
0x1203   :  { %2996 = vrot.lane.b32.xlu1 %v6108_v34, %s5364_s4 }
0x1204   :  { %2994 = vrot.lane.b32.xlu0 %v6112_v35, %s5364_s4 }
0x1222   :  { %v4807_v7 = vpop.f32.mrb[44].mxu1 }
0x1223   :  { %v2783_v58 = vpop.f32.mrb[45].mxu1 }
0x1224   :  { %v4808_v60 = vpop.f32.mrb[46].mxu1  ;;  %v4847_v61 = vpop.f32.mrb[52].mxu0 }
0x1225   :  { %v2799_v62 = vpack.c.bf16 %v4808_v60, %v4807_v7  ;;  %v2786_v1 = vpop.f32.mrb[47].mxu1  ;;  %v3182_v2 = vpop.f32.mrb[53].mxu0  ;;  %v3199_v21 = vmul.f32 0.17677669, %v4847_v61  ;;  %v5077_v61 = vld [vmem:[%s6518_s6 + $0x60] sm:$0xff]  }
0x1226   :  { %v2798_v3 = vpack.c.bf16 %v2786_v1, %v2783_v58  ;;  %v3197_v9 = vmul.f32 0.17677669, %v3182_v2  ;;  %v4848_v12 = vpop.f32.mrb[54].mxu0 }
0x1227   :  { %v3200_v13 = vmul.f32 0.17677669, %v4848_v12  ;;  %v3185_v52 = vpop.f32.mrb[55].mxu0  ;;  %v3203_v48 = vadd.f32 %v6152_v6, %v3199_v21 }
0x1228   :  { %v3201_v23 = vadd.f32 %v6139_v4, %v3197_v9  ;;  %v3198_v11 = vmul.f32 0.17677669, %v3185_v52  ;;  %4813 = vmatprep.mubr.msk.bf16.mxu1 %vm466_vm0, %v2798_v3 }
0x1229   :  { %4814 = vmatmul.mubr.msk.bf16.vlgmr.msra.gmra.mrb[40].mxu1 %vm466_vm0, %v2799_v62  ;;  %v3204_v46 = vadd.f32 %v6160_v55, %v3200_v13  ;;  %v3211_v4 = vsel %vm466_vm0, %v3203_v48, -inf  ;;  %v5078_v62 = vld [vmem:[%s6518_s6 + $0x68] sm:$0xff]  }
0x122a   :  { %v3202_v51 = vadd.f32 %v6146_v56, %v3198_v11  ;;  %v3205_v53 = vsel %vm466_vm0, %v3201_v23, -inf }
0x122b   :  { %3206 = vmax.xlane.f32.xlu1 %v3205_v53  ;;  %v3214_v24 = vsel %vm466_vm0, %v3204_v46, -inf }
0x122c   :  { %v3208_v63 = vsel %vm466_vm0, %v3202_v51, -inf }
0x122d   :  { %3209 = vmax.xlane.f32.xlu0 %v3208_v63 }
0x122f   :  { %3215 = vmax.xlane.f32.xlu1 %v3214_v24 }
0x1231   :  { %3212 = vmax.xlane.f32.xlu0 %v3211_v4 }
0x1277   :  { %v2980_v14 = vpop.xlane.xlu0 %2979 }
0x127b   :  { %v2983_v19 = vpop.xlane.xlu1 %2982  ;;  %v2974_v25 = vpop.xlane.xlu0 %2973 }
0x127c   :  { %5281 = vrcp.f32 %v2983_v19 }
0x127d   :  { %5283 = vrcp.f32 %v2974_v25 }
0x127e   :  { %5285 = vrcp.f32 %v2980_v14  ;;  %v5079_v14 = vld [vmem:[%s6518_s6 + $0x70] sm:$0xff]  }
0x127f   :  { %v2977_v56 = vpop.xlane.xlu1 %2976  ;;  %v2995_v55 = vpop.permute.xlu0 %2994 }
0x1280   :  { %5287 = vrcp.f32 %v2977_v56  ;;  %4825 = vmatprep.subr.bf16.mxu1 %v2995_v55 }
0x1281   :  { %4826 = vmatpush3.bf16.msra.mxu1 %v2995_v55  ;;  %v5080_v55 = vld [vmem:[%s6518_s6 + $0x78] sm:$0xff]  }
0x1283   :  { %v2997_v6 = vpop.permute.xlu1 %2996 }
0x1284   :  { %4827 = vmatprep.subr.bf16.mxu1 %v2997_v6 }
0x1285   :  { %4828 = vmatpush3.bf16.msra.mxu1 %v2997_v6 }
0x1286   :  { %v5282_v26 = vpop.eup %5281  ;;  %4833 = vmatprep.subr.bf16.mxu1 %v5077_v61 }
0x1287   :  { %v5284_v27 = vpop.eup %5283  ;;  %v2991_v18 = vmul.f32 %v5282_v26, %v5278_v5 }
0x1288   :  { %v5286_v29 = vpop.eup %5285  ;;  %v2988_v28 = vmul.f32 %v5284_v27, %v5276_v0 }
0x1289   :  { %v2990_v10 = vmul.f32 %v5286_v29, %v6247_v33 }
0x128a   :  { %v5288_v30 = vpop.eup %5287 }
0x128b   :  { %v2989_v8 = vmul.f32 %v5288_v30, %v5280_v54  ;;  %v2993_v37 = vpack.c.bf16 %v2991_v18, %v2990_v10 }
0x128d   :  { %v2992_v36 = vpack.c.bf16 %v2989_v8, %v2988_v28  ;;  %v4333_v28 = vld [vmem:[%s6519_s7 + $0x1] ss:$0 sm:$0xff] }
0x128f   :  { %4829 = vmatprep.mubr.msk.bf16.mxu1 %vm466_vm0, %v2992_v36 }
0x1290   :  { %4830 = vmatmul.mubr.msk.bf16.vlgmr.msra.gmra.mrb[48].mxu1 %vm466_vm0, %v2993_v37 }
0x1291   :  { %4834 = vmatpush3.bf16.msra.mxu1 %v5077_v61 }
0x1292   :  { %4835 = vmatprep.subr.bf16.mxu1 %v5078_v62 }
0x1295   :  { %4836 = vmatpush3.bf16.msra.mxu1 %v5078_v62 }
0x12b8   :  { %v3207_v38 = vpop.xlane.xlu1 %3206 }
0x12b9   :  { %v3217_v42 = vsub.f32 %v3201_v23, %v3207_v38 }
0x12ba   :  { %v3210_v40 = vpop.xlane.xlu0 %3209 }
0x12bb   :  { %v3218_v41 = vsub.f32 %v3202_v51, %v3210_v40  ;;  %v3221_v0 = vmul.f32 1.442695, %v3217_v42 }
0x12bc   :  { %v3216_v43 = vpop.xlane.xlu1 %3215 }
0x12bd   :  { %v3220_v44 = vsub.f32 %v3204_v46, %v3216_v43  ;;  %v3223_v47 = vmul.f32 1.442695, %v3218_v41 }
0x12be   :  { %v3213_v49 = vpop.xlane.xlu0 %3212 }
0x12bf   :  { %v3227_v22 = vmul.f32 1.442695, %v3220_v44  ;;  %v3219_v31 = vsub.f32 %v3203_v48, %v3213_v49 }
0x12c1   :  { %5289 = vpow2.f32 %v3227_v22  ;;  %v3225_v5 = vmul.f32 1.442695, %v3219_v31  ;;  %v5081_v22 = vld [vmem:[%s6522_s10 + $0x80] ss:$8 sps:$4 sm:$0xff]  }
0x12c2   :  { %5291 = vpow2.f32 %v3223_v47 }
0x12c3   :  { %5293 = vpow2.f32 %v3225_v5 }
0x12c4   :  { %5295 = vpow2.f32 %v3221_v0 }
0x12cb   :  { %v5290_v33 = vpop.eup %5289 }
0x12cc   :  { %v5292_v32 = vpop.eup %5291  ;;  %v3238_v50 = vsel %vm466_vm0, %v5290_v33, 0.0 }
0x12cd   :  { %v5294_v54 = vpop.eup %5293  ;;  %3239 = vadd.xlane.f32.xlu1 %v3238_v50  ;;  %v3232_v58 = vsel %vm466_vm0, %v5292_v32, 0.0 }
0x12ce   :  { %v3235_v57 = vsel %vm466_vm0, %v5294_v54, 0.0  ;;  %v5296_v7 = vpop.eup %5295 }
0x12cf   :  { %3236 = vadd.xlane.f32.xlu0 %v3235_v57  ;;  %v3229_v60 = vsel %vm466_vm0, %v5296_v7, 0.0 }
0x12d1   :  { %3233 = vadd.xlane.f32.xlu1 %v3232_v58 }
0x12d3   :  { %3230 = vadd.xlane.f32.xlu0 %v3229_v60 }
0x12e2   :  { %3253 = vrot.lane.b32.xlu1 %v6108_v34, %s5368_s22 }
0x12e9   :  { %3251 = vrot.lane.b32.xlu0 %v6112_v35, %s5368_s22 }
0x135a   :  { %v3240_v1 = vpop.xlane.xlu1 %3239 }
0x135c   :  { %v3237_v2 = vpop.xlane.xlu0 %3236 }
0x135d   :  { %5297 = vrcp.f32 %v3237_v2 }
0x135e   :  { %v3234_v3 = vpop.xlane.xlu1 %3233 }
0x135f   :  { %5299 = vrcp.f32 %v3234_v3  ;;  %v5089_v3 = vld [vmem:[%s6522_s10 + $0xa4] ss:$8 sps:$4 sm:$0xff]  }
0x1360   :  { %5301 = vrcp.f32 %v3240_v1  ;;  %v3231_v9 = vpop.xlane.xlu0 %3230 }
0x1361   :  { %5303 = vrcp.f32 %v3231_v9  ;;  %v5087_v9 = vld [vmem:[%s6522_s10 + $0xa0] ss:$8 sps:$4 sm:$0xff]  }
0x1362   :  { %v3254_v48 = vpop.permute.xlu1 %3253 }
0x1363   :  { %v4831_v12 = vpop.f32.mrb[48].mxu1 }
0x1364   :  { %v3040_v13 = vpop.f32.mrb[49].mxu1  ;;  %v3252_v34 = vpop.permute.xlu0 %3251 }
0x1365   :  { %v4832_v52 = vpop.f32.mrb[50].mxu1  ;;  %4849 = vmatprep.subr.bf16.mxu1 %v3252_v34 }
0x1366   :  { %v3056_v21 = vpack.c.bf16 %v4832_v52, %v4831_v12  ;;  %v3043_v23 = vpop.f32.mrb[51].mxu1  ;;  %v5092_v12 = vld [vmem:[%s6522_s10 + $0xb4] ss:$8 sps:$4 sm:$0xff]   ;;  %v5093_v52 = vld [vmem:[%s6522_s10 + $0xc0] ss:$8 sps:$4 sm:$0xff]  }
0x1367   :  { %v3055_v11 = vpack.c.bf16 %v3043_v23, %v3040_v13  ;;  %v5298_v46 = vpop.eup %5297  ;;  %v5090_v13 = vld [vmem:[%s6522_s10 + $0xb0] ss:$8 sps:$4 sm:$0xff]  }
0x1368   :  { %v3247_v63 = vmul.f32 %v5298_v46, %v5294_v54  ;;  %v5096_v23 = vld [vmem:[%s6522_s10 + $0xd0] ss:$8 sps:$4 sm:$0xff]   ;;  %v5099_v46 = vld [vmem:[%s6522_s10 + $0xe0] ss:$8 sps:$4 sm:$0xff]  }
0x1369   :  { %v5300_v51 = vpop.eup %5299  ;;  %4837 = vmatprep.mubr.msk.bf16.mxu1 %vm466_vm0, %v3055_v11  ;;  %v5101_v11 = vld [vmem:[%s6522_s10 + $0xe4] ss:$8 sps:$4 sm:$0xff]  }
0x136a   :  { %v5302_v35 = vpop.eup %5301  ;;  %4838 = vmatmul.mubr.msk.bf16.vlgmr.msra.gmra.mrb[40].mxu1 %vm466_vm0, %v3056_v21  ;;  %v3246_v4 = vmul.f32 %v5300_v51, %v5292_v32  ;;  %v5098_v21 = vld [vmem:[%s6522_s10 + $0xd4] ss:$8 sps:$4 sm:$0xff]  }
0x136b   :  { %v5304_v53 = vpop.eup %5303  ;;  %4850 = vmatpush3.bf16.msra.mxu1 %v3252_v34  ;;  %v3248_v19 = vmul.f32 %v5302_v35, %v5290_v33  ;;  %v5095_v34 = vld [vmem:[%s6522_s10 + $0xc4] ss:$8 sps:$4 sm:$0xff]   ;;  %v5104_v51 = vld [vmem:[%s6522_s10 + $0xf4] ss:$8 sps:$4 sm:$0xff]   ;;  %v5102_v35 = vld [vmem:[%s6522_s10 + $0xf0] ss:$8 sps:$4 sm:$0xff]  }
0x136c   :  { %4851 = vmatprep.subr.bf16.mxu1 %v3254_v48  ;;  %v3245_v24 = vmul.f32 %v5304_v53, %v5296_v7 }
0x136d   :  { %v3250_v56 = vpack.c.bf16 %v3248_v19, %v3247_v63 }
0x136e   :  { %v3249_v25 = vpack.c.bf16 %v3246_v4, %v3245_v24 }
0x136f   :  { %4852 = vmatpush3.bf16.msra.mxu1 %v3254_v48 }
0x1370   :  { %4853 = vmatprep.mubr.msk.bf16.mxu1 %vm466_vm0, %v3249_v25  ;;  %4857 = vmatprep.subr.bf16.mxu1 %v5079_v14 }
0x1372   :  { %4854 = vmatmul.mubr.msk.bf16.vlgmr.msra.gmra.mrb[52].mxu1 %vm466_vm0, %v3250_v56 }
0x1373   :  { %4858 = vmatpush3.bf16.msra.mxu1 %v5079_v14 }
0x1374   :  { %4859 = vmatprep.subr.bf16.mxu1 %v5080_v55 }
0x1377   :  { %4860 = vmatpush3.bf16.msra.mxu1 %v5080_v55 }
0x1445   :  { %v4855_v6 = vpop.f32.mrb[52].mxu1 }
0x1446   :  { %v3297_v26 = vpop.f32.mrb[53].mxu1 }
0x1447   :  { %v4856_v27 = vpop.f32.mrb[54].mxu1 }
0x1448   :  { %v3313_v29 = vpack.c.bf16 %v4856_v27, %v4855_v6  ;;  %v3300_v30 = vpop.f32.mrb[55].mxu1 }
0x1449   :  { %v3312_v18 = vpack.c.bf16 %v3300_v30, %v3297_v26 }
0x144b   :  { %4861 = vmatprep.mubr.msk.bf16.mxu1 %vm466_vm0, %v3312_v18 }
0x144c   :  { %4862 = vmatmul.mubr.msk.bf16.vlgmr.msra.gmra.mrb[40].mxu1 %vm466_vm0, %v3313_v29  ;;  %v4368_v29 = vld [vmem:[%s6520_s8 + $0x1] ss:$0 sm:$0xff] }
0x151f   :  { %v4863_v8 = vpop.f32.mrb[40].mxu1 }
0x1520   :  { %v3366_v10 = vpop.f32.mrb[41].mxu1  ;;  %v4909_v42 = vadd.f32 %v4863_v8, %v4333_v28 }
0x1521   :  { %v4910_v36 = vadd.f32 %v4333_v28, %v3366_v10  ;;  %v4864_v37 = vpop.f32.mrb[42].mxu1  ;;  %v4369_v10 = vld [vmem:[%s6521_s9 + $0x1] ss:$0 sm:$0xff] }
0x1522   :  { %v3369_v38 = vpop.f32.mrb[43].mxu1  ;;  %v4911_v41 = vadd.f32 %v4864_v37, %v4333_v28  ;;  %v3387_v49 = vadd.f32 %v4909_v42, %v6081_v20  ;;  %v5084_v20 = vld [vmem:[%s6522_s10 + $0x90] ss:$8 sps:$4 sm:$0xff]  }
0x1523   :  { %v3385_v40 = vadd.f32 %v4910_v36, %v6072_v16  ;;  %v4912_v43 = vadd.f32 %v4333_v28, %v3369_v38  ;;  %v5083_v16 = vld [vmem:[%s6522_s10 + $0x84] ss:$8 sps:$4 sm:$0xff]  }
0x1524   :  { %v3388_v47 = vadd.f32 %v4911_v41, %v6083_v59  ;;  %3569 = vmatprep.subr.bf16.mxu0 %v5083_v16 }
0x1525   :  { %v3386_v44 = vadd.f32 %v4912_v43, %v6074_v45  ;;  %3393 = vadd.xlane.f32.xlu1 %v3385_v40  ;;  %v5086_v45 = vld [vmem:[%s6522_s10 + $0x94] ss:$8 sps:$4 sm:$0xff]   ;;  %3570 = vmatpush1.bf16.msra.mxu0 %v5081_v22 }
0x1526   :  { %3571 = vmatprep.subr.bf16.mxu0 %v5086_v45 }
0x1527   :  { %3395 = vadd.xlane.f32.xlu0 %v3386_v44 }
0x1529   :  { %3399 = vadd.xlane.f32.xlu1 %v3388_v47  ;;  %3572 = vmatpush1.bf16.msra.mxu0 %v5084_v20  ;;  %v5105_v20 = vld [vmem:[#allocation2 + $0xc0] sm:$0xff]  }
0x152a   :  { %3573 = vmatprep.subr.bf16.mxu0 %v5089_v3  ;;  %4587 = vmatprep.subr.bf16.mxu1 %v5105_v20 }
0x152b   :  { %3397 = vadd.xlane.f32.xlu0 %v3387_v49 }
0x152d   :  { %3574 = vmatpush1.bf16.msra.mxu0 %v5087_v9 }
0x152e   :  { %3575 = vmatprep.subr.bf16.mxu0 %v5092_v12 }
0x1531   :  { %3576 = vmatpush1.bf16.msra.mxu0 %v5090_v13 }
0x1532   :  { %3577 = vmatprep.subr.bf16.mxu0 %v5095_v34 }
0x1535   :  { %3578 = vmatpush1.bf16.msra.mxu0 %v5093_v52 }
0x1536   :  { %3579 = vmatprep.subr.bf16.mxu0 %v5098_v21 }
0x1539   :  { %3580 = vmatpush1.bf16.msra.mxu0 %v5096_v23 }
0x153a   :  { %3581 = vmatprep.subr.bf16.mxu0 %v5101_v11 }
0x153d   :  { %3582 = vmatpush1.bf16.msra.mxu0 %v5099_v46 }
0x153e   :  { %3583 = vmatprep.subr.bf16.mxu0 %v5104_v51 }
0x1541   :  { %3584 = vmatpush1.bf16.msra.mxu0 %v5102_v35 }
0x15b2   :  { %v3394_v59 = vpop.xlane.xlu1 %3393 }
0x15b3   :  { %v3401_v31 = vmul.f32 0.0078125, %v3394_v59  ;;  %v5106_v59 = vld [vmem:[#allocation2 + $0x80] sm:$0xff]  }
0x15b4   :  { %v3396_v0 = vpop.xlane.xlu0 %3395  ;;  %4588 = vmatpush3.bf16.msra.mxu1 %v5106_v59 }
0x15b5   :  { %v3405_v5 = vsub.f32 %v3385_v40, %v3401_v31  ;;  %v3402_v33 = vmul.f32 0.0078125, %v3396_v0  ;;  %v5107_v31 = vld [vmem:[#allocation2 + $0xc8] sm:$0xff]  }
0x15b6   :  { %v3400_v32 = vpop.xlane.xlu1 %3399  ;;  %v5108_v0 = vld [vmem:[#allocation2 + $0x88] sm:$0xff]   ;;  %4589 = vmatprep.subr.bf16.mxu1 %v5107_v31 }
0x15b7   :  { %v3406_v50 = vsub.f32 %v3386_v44, %v3402_v33  ;;  %v3404_v54 = vmul.f32 0.0078125, %v3400_v32  ;;  %v3409_v57 = vmul.f32 %v3405_v5, %v3405_v5  ;;  %v5110_v33 = vld [vmem:[#allocation2 + $0x90] sm:$0xff]   ;;  %v5111_v32 = vld [vmem:[#allocation2 + $0xd8] sm:$0xff]  }
0x15b8   :  { %v3398_v7 = vpop.xlane.xlu0 %3397  ;;  %4590 = vmatpush3.bf16.msra.mxu1 %v5108_v0 }
0x15b9   :  { %v3408_v58 = vsub.f32 %v3388_v47, %v3404_v54  ;;  %v3403_v60 = vmul.f32 0.0078125, %v3398_v7  ;;  %3413 = vadd.xlane.f32.xlu0 %v3409_v57  ;;  %v3410_v61 = vmul.f32 %v3406_v50, %v3406_v50  ;;  %v5114_v54 = vld [vmem:[#allocation2 + $0xa0] sm:$0xff]   ;;  %v5115_v57 = vld [vmem:[#allocation2 + $0xe8] sm:$0xff]  }
0x15ba   :  { %v5116_v7 = vld [vmem:[#allocation2 + $0xa8] sm:$0xff]  }
0x15bb   :  { %v3407_v62 = vsub.f32 %v3387_v49, %v3403_v60  ;;  %3415 = vadd.xlane.f32.xlu1 %v3410_v61  ;;  %v3412_v1 = vmul.f32 %v3408_v58, %v3408_v58  ;;  %v5118_v60 = vld [vmem:[#allocation2 + $0xb0] sm:$0xff]   ;;  %v5119_v61 = vld [vmem:[#allocation2 + $0xf8] sm:$0xff]  }
0x15bd   :  { %v3411_v2 = vmul.f32 %v3407_v62, %v3407_v62 }
0x15bf   :  { %3419 = vadd.xlane.f32.xlu1 %v3412_v1  ;;  %3417 = vadd.xlane.f32.xlu0 %v3411_v2  ;;  %v4386_v1 = vld [vmem:[%s6523_s11 + $0x2] sm:$0x3] }
0x15c0   :  { %v3482_v2 = vrot.slane %v4386_v1, %v5617_v15  ;;  %v3486_v3 = vrot.slane %v4386_v1, %v5623_v17 }
0x1646   :  { %v3414_v53 = vpop.xlane.xlu0 %3413 }
0x1647   :  { %v3421_v48 = vmul.f32 0.0078125, %v3414_v53 }
0x1648   :  { %v3416_v63 = vpop.xlane.xlu1 %3415 }
0x1649   :  { %v3425_v24 = vadd.f32 1e-05, %v3421_v48  ;;  %v3422_v4 = vmul.f32 0.0078125, %v3416_v63 }
0x164b   :  { %5305 = vrsqrt.f32 %v3425_v24  ;;  %v3426_v14 = vadd.f32 1e-05, %v3422_v4 }
0x164c   :  { %v3420_v19 = vpop.xlane.xlu1 %3419  ;;  %v3418_v25 = vpop.xlane.xlu0 %3417 }
0x164d   :  { %5307 = vrsqrt.f32 %v3426_v14  ;;  %v3424_v56 = vmul.f32 0.0078125, %v3420_v19  ;;  %v3423_v55 = vmul.f32 0.0078125, %v3418_v25 }
0x164f   :  { %v3428_v6 = vadd.f32 1e-05, %v3424_v56  ;;  %v3427_v26 = vadd.f32 1e-05, %v3423_v55 }
0x1651   :  { %5309 = vrsqrt.f32 %v3428_v6 }
0x1652   :  { %5311 = vrsqrt.f32 %v3427_v26 }
0x1655   :  { %v5306_v27 = vpop.eup %5305 }
0x1656   :  { %v3433_v30 = vmul.f32 %v5306_v27, %v3405_v5  ;;  %v5109_v5 = vld [vmem:[#allocation2 + $0xd0] sm:$0xff]  }
0x1657   :  { %v5308_v18 = vpop.eup %5307  ;;  %4591 = vmatprep.subr.bf16.mxu1 %v5109_v5 }
0x1658   :  { %v3434_v28 = vmul.f32 %v5308_v18, %v3406_v50  ;;  %v3443_v8 = vmul.f32 %v4368_v29, %v3433_v30  ;;  %4592 = vmatpush3.bf16.msra.mxu1 %v5110_v33  ;;  %v5113_v50 = vld [vmem:[#allocation2 + $0xe0] sm:$0xff]  }
0x1659   :  { %4593 = vmatprep.subr.bf16.mxu1 %v5111_v32 }
0x165a   :  { %v3444_v36 = vmul.f32 %v4368_v29, %v3434_v28  ;;  %v6358_v40 = vadd.f32 %v4369_v10, %v3443_v8 }
0x165b   :  { %v5310_v37 = vpop.eup %5309 }
0x165c   :  { %v5312_v38 = vpop.eup %5311  ;;  %v3454_v41 = vadd.f32 %v4369_v10, %v3444_v36  ;;  %v3436_v43 = vmul.f32 %v5310_v37, %v3408_v58  ;;  %v5117_v58 = vld [vmem:[#allocation2 + $0xf0] sm:$0xff]  }
0x165d   :  { %v3435_v42 = vmul.f32 %v5312_v38, %v3407_v62  ;;  %v5120_v62 = vld [vmem:[#allocation2 + $0xb8] sm:$0xff]  }
0x165e   :  { %v3457_v44 = vpack.c.bf16 %v3454_v41, %v6358_v40  ;;  %v3446_v47 = vmul.f32 %v4368_v29, %v3436_v43 }
0x165f   :  { %v3445_v49 = vmul.f32 %v4368_v29, %v3435_v42 }
0x1660   :  { %3602 = vmatmul.mubr.bf16.vlgmr.msra.gmra.mrb[56].mxu0 %v3457_v44  ;;  %v3456_v16 = vadd.f32 %v4369_v10, %v3446_v47 }
0x1661   :  { %3611 = vmatprep.mubr.bf16.mxu0 %v5366_v39  ;;  %v6362_v22 = vadd.f32 %v4369_v10, %v3445_v49  ;;  %v5112_v39 = vld [vmem:[#allocation2 + $0x98] sm:$0xff]  }
0x1662   :  { %4594 = vmatpush3.bf16.msra.mxu1 %v5112_v39 }
0x1663   :  { %v3458_v45 = vpack.c.bf16 %v3456_v16, %v6362_v22  ;;  %4595 = vmatprep.subr.bf16.mxu1 %v5113_v50 }
0x1666   :  { %4596 = vmatpush3.bf16.msra.mxu1 %v5114_v54 }
0x1667   :  { %4597 = vmatprep.subr.bf16.mxu1 %v5115_v57 }
0x1668   :  { %3612 = vmatmul.mubr.bf16.gmra.mrb[60].mxu0 %v3458_v45 }
0x166a   :  { %4598 = vmatpush3.bf16.msra.mxu1 %v5116_v7 }
0x166b   :  { %4599 = vmatprep.subr.bf16.mxu1 %v5117_v58 }
0x166e   :  { %4600 = vmatpush3.bf16.msra.mxu1 %v5118_v60 }
0x166f   :  { %4601 = vmatprep.subr.bf16.mxu1 %v5119_v61 }
0x1672   :  { %4602 = vmatpush3.bf16.msra.mxu1 %v5120_v62 }
0x1733   :  { %v3603_v9 = vpop.f32.mrb[56].mxu0 }
0x1734   :  { %v6370_v12 = vadd.f32 %v3603_v9, %v3482_v2  ;;  %v3605_v13 = vpop.f32.mrb[57].mxu0 }
0x1735   :  { %v6372_v34 = vadd.f32 %v3605_v13, %v3486_v3  ;;  %v3607_v52 = vpop.f32.mrb[58].mxu0 }
0x1736   :  { %v3622_v21 = vmul.f32 %v6370_v12, %v6370_v12  ;;  %v6376_v23 = vadd.f32 %v3607_v52, %v3482_v2  ;;  %v3609_v11 = vpop.f32.mrb[59].mxu0 }
0x1737   :  { %v3623_v46 = vmul.f32 %v6372_v34, %v6372_v34  ;;  %v6380_v51 = vadd.f32 %v3609_v11, %v3486_v3 }
0x1738   :  { %v3630_v15 = vmul.f32 %v3622_v21, %v6370_v12  ;;  %v3624_v17 = vmul.f32 %v6376_v23, %v6376_v23 }
0x1739   :  { %v3631_v35 = vmul.f32 %v3623_v46, %v6372_v34  ;;  %v3625_v53 = vmul.f32 %v6380_v51, %v6380_v51 }
0x173a   :  { %v3638_v48 = vmul.f32 0.044715, %v3630_v15  ;;  %v3632_v63 = vmul.f32 %v3624_v17, %v6376_v23 }
0x173b   :  { %v3639_v24 = vmul.f32 0.044715, %v3631_v35  ;;  %v3633_v4 = vmul.f32 %v3625_v53, %v6380_v51  ;;  %v3613_v14 = vpop.f32.mrb[60].mxu0 }
0x173c   :  { %v3646_v19 = vadd.f32 %v3638_v48, %v6370_v12  ;;  %v3640_v25 = vmul.f32 0.044715, %v3632_v63  ;;  %v6391_v56 = vadd.f32 %v3613_v14, %v3482_v2  ;;  %v3615_v55 = vpop.f32.mrb[61].mxu0 }
0x173d   :  { %v3647_v6 = vadd.f32 %v3639_v24, %v6372_v34  ;;  %v3641_v26 = vmul.f32 0.044715, %v3633_v4  ;;  %v6394_v27 = vadd.f32 %v3615_v55, %v3486_v3  ;;  %v3617_v29 = vpop.f32.mrb[62].mxu0 }
0x173e   :  { %v3654_v30 = vmul.f32 0.7978846, %v3646_v19  ;;  %v3648_v18 = vadd.f32 %v3640_v25, %v6376_v23  ;;  %v3626_v28 = vmul.f32 %v6391_v56, %v6391_v56  ;;  %v6399_v8 = vadd.f32 %v3617_v29, %v3482_v2  ;;  %v3619_v10 = vpop.f32.mrb[63].mxu0 }
0x173f   :  { %v3655_v36 = vmul.f32 0.7978846, %v3647_v6  ;;  %v3649_v37 = vadd.f32 %v3641_v26, %v6380_v51  ;;  %v3627_v38 = vmul.f32 %v6394_v27, %v6394_v27  ;;  %v6404_v41 = vadd.f32 %v3619_v10, %v3486_v3 }
0x1740   :  { %5313 = vtanh.f32 %v3654_v30  ;;  %v3656_v43 = vmul.f32 0.7978846, %v3648_v18  ;;  %v3634_v42 = vmul.f32 %v3626_v28, %v6391_v56  ;;  %v3628_v44 = vmul.f32 %v6399_v8, %v6399_v8 }
0x1741   :  { %5315 = vtanh.f32 %v3655_v36  ;;  %v3657_v47 = vmul.f32 0.7978846, %v3649_v37  ;;  %v3635_v49 = vmul.f32 %v3627_v38, %v6394_v27  ;;  %v3629_v16 = vmul.f32 %v6404_v41, %v6404_v41  ;;  %v4404_v38 = vld [vmem:[%s6525_s13 + $0x1] ss:$0 sm:$0xff] }
0x1742   :  { %5317 = vtanh.f32 %v3656_v43  ;;  %v3642_v45 = vmul.f32 0.044715, %v3634_v42  ;;  %v3636_v20 = vmul.f32 %v3628_v44, %v6399_v8 }
0x1743   :  { %5319 = vtanh.f32 %v3657_v47  ;;  %v3643_v59 = vmul.f32 0.044715, %v3635_v49  ;;  %v3637_v31 = vmul.f32 %v3629_v16, %v6404_v41 }
0x1744   :  { %v3650_v0 = vadd.f32 %v3642_v45, %v6391_v56  ;;  %v3644_v5 = vmul.f32 0.044715, %v3636_v20 }
0x1745   :  { %v3651_v33 = vadd.f32 %v3643_v59, %v6394_v27  ;;  %v3645_v32 = vmul.f32 0.044715, %v3637_v31 }
0x1746   :  { %v3658_v39 = vmul.f32 0.7978846, %v3650_v0  ;;  %v3652_v50 = vadd.f32 %v3644_v5, %v6399_v8 }
0x1747   :  { %v3659_v54 = vmul.f32 0.7978846, %v3651_v33  ;;  %v3653_v57 = vadd.f32 %v3645_v32, %v6404_v41 }
0x1748   :  { %5321 = vtanh.f32 %v3658_v39  ;;  %v3660_v7 = vmul.f32 0.7978846, %v3652_v50 }
0x1749   :  { %5323 = vtanh.f32 %v3659_v54  ;;  %v3661_v58 = vmul.f32 0.7978846, %v3653_v57  ;;  %v5369_v57 = vmov 0.0  }
0x174a   :  { %v5314_v60 = vpop.eup %5313  ;;  %5325 = vtanh.f32 %v3660_v7  ;;  %4865 = vmatprep.subr.bf16.mxu0 %v5369_v57  ;;  %4885 = vmatprep.subr.bf16.mxu1 %v5369_v57  ;;  %v5123_v7 = vld [vmem:[%s6528_s16 + $0x10] sm:$0xff]  }
0x174b   :  { %v5316_v61 = vpop.eup %5315  ;;  %v3670_v62 = vadd.f32 1.0, %v5314_v60  ;;  %5327 = vtanh.f32 %v3661_v58  ;;  %v5124_v58 = vld [vmem:[%s6528_s16 + $0x18] sm:$0xff]   ;;  %v5125_v60 = vld [vmem:[%s6528_s16 + $0x20] sm:$0xff]   ;;  %4881 = vmatprep.mubr.msk.bf16.mxu0 %vm5370_vm1, %v5369_v57 }
0x174c   :  { %v5318_v1 = vpop.eup %5317  ;;  %v3671_v2 = vadd.f32 1.0, %v5316_v61  ;;  %v5126_v61 = vld [vmem:[%s6528_s16 + $0x28] sm:$0xff]  }
0x174d   :  { %v5320_v3 = vpop.eup %5319  ;;  %v3678_v9 = vmul.f32 0.5, %v3670_v62  ;;  %v3672_v13 = vadd.f32 1.0, %v5318_v1  ;;  %v5127_v62 = vld [vmem:[%s6528_s16 + $0x30] sm:$0xff]   ;;  %v5128_v1 = vld [vmem:[%s6528_s16 + $0x38] sm:$0xff]  }
0x174e   :  { %v3673_v52 = vadd.f32 1.0, %v5320_v3  ;;  %v3679_v21 = vmul.f32 0.5, %v3671_v2  ;;  %v5129_v2 = vld [vmem:[%s6530_s18] sm:$0xff]   ;;  %v5130_v3 = vld [vmem:[%s6530_s18 + $0x8] sm:$0xff]  }
0x174f   :  { %v3680_v11 = vmul.f32 0.5, %v3672_v13  ;;  %v3686_v15 = vmul.f32 %v3678_v9, %v6370_v12  ;;  %v5131_v9 = vld [vmem:[%s6530_s18 + $0x10] sm:$0xff]   ;;  %v5132_v13 = vld [vmem:[%s6530_s18 + $0x18] sm:$0xff]  }
0x1750   :  { %v3681_v46 = vmul.f32 0.5, %v3673_v52  ;;  %v3687_v53 = vmul.f32 %v3679_v21, %v6372_v34 }
0x1751   :  { %v3688_v17 = vmul.f32 %v3680_v11, %v6376_v23 }
0x1752   :  { %v5322_v35 = vpop.eup %5321  ;;  %v3689_v48 = vmul.f32 %v3681_v46, %v6380_v51 }
0x1753   :  { %v5324_v63 = vpop.eup %5323  ;;  %v3694_v24 = vpack.c.bf16 %v3688_v17, %v3686_v15  ;;  %v3674_v4 = vadd.f32 1.0, %v5322_v35 }
0x1754   :  { %v5326_v14 = vpop.eup %5325  ;;  %v3695_v19 = vpack.c.bf16 %v3689_v48, %v3687_v53  ;;  %v3675_v25 = vadd.f32 1.0, %v5324_v63  ;;  %v4423_v63 = vld [vmem:[%s6526_s14 + $0x1] ss:$0 sm:$0xff] }
0x1755   :  { %v5328_v55 = vpop.eup %5327  ;;  %v3676_v6 = vadd.f32 1.0, %v5326_v14  ;;  %v3682_v26 = vmul.f32 0.5, %v3674_v4 }
0x1756   :  { %3867 = vmatprep.mubr.bf16.mxu1 %v3695_v19  ;;  %v3677_v29 = vadd.f32 1.0, %v5328_v55  ;;  %v3683_v30 = vmul.f32 0.5, %v3675_v25  ;;  %v4424_v19 = vld [vmem:[%s6527_s15 + $0x1] ss:$0 sm:$0xff] }
0x1757   :  { %3868 = vmatmul.mubr.bf16.vlgmr.msra.gmra.mrb[56].mxu1 %v3694_v24  ;;  %v3684_v12 = vmul.f32 0.5, %v3676_v6  ;;  %v3690_v18 = vmul.f32 %v3682_v26, %v6391_v56 }
0x1758   :  { %v3685_v23 = vmul.f32 0.5, %v3677_v29  ;;  %v3691_v51 = vmul.f32 %v3683_v30, %v6394_v27  ;;  %4886 = vmatpush3.bf16.msra.mxu1 %v5129_v2  ;;  %v5133_v30 = vld [vmem:[%s6530_s18 + $0x20] sm:$0xff]  }
0x1759   :  { %v3692_v34 = vmul.f32 %v3684_v12, %v6399_v8  ;;  %4887 = vmatprep.subr.bf16.mxu1 %v5369_v57  ;;  %v5134_v12 = vld [vmem:[%s6530_s18 + $0x28] sm:$0xff]  }
0x175a   :  { %v3693_v28 = vmul.f32 %v3685_v23, %v6404_v41  ;;  %v5135_v23 = vld [vmem:[%s6530_s18 + $0x30] sm:$0xff]  }
0x175b   :  { %v3696_v10 = vpack.c.bf16 %v3692_v34, %v3690_v18  ;;  %v5136_v18 = vld [vmem:[%s6530_s18 + $0x38] sm:$0xff]   ;;  %v4425_v34 = vld [vmem:[%s6529_s17] ss:$0 sm:$0xff] }
0x175c   :  { %v3697_v36 = vpack.c.bf16 %v3693_v28, %v3691_v51  ;;  %4888 = vmatpush3.bf16.msra.mxu1 %v5130_v3 }
0x175d   :  { %4889 = vmatprep.subr.bf16.mxu1 %v5369_v57 }
0x175e   :  { %3874 = vmatprep.mubr.bf16.mxu1 %v3697_v36 }
0x175f   :  { %3875 = vmatmul.mubr.bf16.gmra.mrb[60].mxu1 %v3696_v10 }
0x1760   :  { %4901 = vmatprep.mubr.msk.bf16.mxu1 %vm5370_vm1, %v5369_v57  ;;  %4890 = vmatpush3.bf16.msra.mxu1 %v5131_v9 }
0x1761   :  { %4891 = vmatprep.subr.bf16.mxu1 %v5369_v57 }
0x1764   :  { %4892 = vmatpush3.bf16.msra.mxu1 %v5132_v13 }
0x1765   :  { %4893 = vmatprep.subr.bf16.mxu1 %v5369_v57 }
0x1768   :  { %4894 = vmatpush3.bf16.msra.mxu1 %v5133_v30 }
0x1769   :  { %4895 = vmatprep.subr.bf16.mxu1 %v5369_v57 }
0x176c   :  { %4896 = vmatpush3.bf16.msra.mxu1 %v5134_v12 }
0x176d   :  { %4897 = vmatprep.subr.bf16.mxu1 %v5369_v57 }
0x1770   :  { %4898 = vmatpush3.bf16.msra.mxu1 %v5135_v23 }
0x1771   :  { %4899 = vmatprep.subr.bf16.mxu1 %v5369_v57 }
0x1774   :  { %4900 = vmatpush3.bf16.msra.mxu1 %v5136_v18 }
0x182a   :  { %v4603_v37 = vpop.f32.mrb[56].mxu1 }
0x182b   :  { %v4604_v43 = vpop.f32.mrb[57].mxu1 }
0x182c   :  { %v4605_v42 = vadd.f32 %v4604_v43, %v4603_v37  ;;  %v4606_v44 = vpop.f32.mrb[58].mxu1 }
0x182d   :  { %v4607_v47 = vpop.f32.mrb[59].mxu1 }
0x182e   :  { %v3870_v56 = vadd.f32 %v4605_v42, %v4404_v38  ;;  %v4434_v42 = vld [vmem:[%s6531_s19] ss:$0 sm:$0xff] }
0x1830   :  { %v3882_v8 = vadd.f32 %v3870_v56, %v6358_v40  ;;  %v5121_v40 = vld [vmem:[%s6528_s16] sm:$0xff]  }
0x1831   :  { %4866 = vmatpush3.bf16.msra.mxu0 %v5121_v40 }
0x1832   :  { %3888 = vadd.xlane.f32.xlu1 %v3882_v8  ;;  %v4609_v27 = vpop.f32.mrb[60].mxu1  ;;  %4867 = vmatprep.subr.bf16.mxu0 %v5369_v57 }
0x1833   :  { %v4610_v49 = vpop.f32.mrb[61].mxu1 }
0x1834   :  { %v4611_v41 = vadd.f32 %v4610_v49, %v4609_v27  ;;  %v4612_v16 = vpop.f32.mrb[62].mxu1 }
0x1835   :  { %v4613_v45 = vpop.f32.mrb[63].mxu1 }
0x1836   :  { %v3877_v20 = vadd.f32 %v4611_v41, %v4404_v38 }
0x1838   :  { %v3883_v59 = vadd.f32 %v3877_v20, %v6362_v22  ;;  %v5122_v22 = vld [vmem:[%s6528_s16 + $0x8] sm:$0xff]  }
0x1839   :  { %4868 = vmatpush3.bf16.msra.mxu0 %v5122_v22 }
0x183a   :  { %3890 = vadd.xlane.f32.xlu0 %v3883_v59  ;;  %4869 = vmatprep.subr.bf16.mxu0 %v5369_v57 }
0x183d   :  { %4870 = vmatpush3.bf16.msra.mxu0 %v5123_v7 }
0x183e   :  { %4871 = vmatprep.subr.bf16.mxu0 %v5369_v57 }
0x1841   :  { %4872 = vmatpush3.bf16.msra.mxu0 %v5124_v58 }
0x1842   :  { %4873 = vmatprep.subr.bf16.mxu0 %v5369_v57 }
0x1845   :  { %4874 = vmatpush3.bf16.msra.mxu0 %v5125_v60 }
0x1846   :  { %4875 = vmatprep.subr.bf16.mxu0 %v5369_v57 }
0x1849   :  { %4876 = vmatpush3.bf16.msra.mxu0 %v5126_v61 }
0x184a   :  { %4877 = vmatprep.subr.bf16.mxu0 %v5369_v57 }
0x184d   :  { %4878 = vmatpush3.bf16.msra.mxu0 %v5127_v62 }
0x184e   :  { %4879 = vmatprep.subr.bf16.mxu0 %v5369_v57 }
0x1851   :  { %4880 = vmatpush3.bf16.msra.mxu0 %v5128_v1 }
0x18bf   :  { %v3889_v31 = vpop.xlane.xlu1 %3888 }
0x18c0   :  { %v3892_v0 = vmul.f32 0.0078125, %v3889_v31 }
0x18c2   :  { %v3894_v5 = vsub.f32 %v3882_v8, %v3892_v0 }
0x18c4   :  { %v3896_v33 = vmul.f32 %v3894_v5, %v3894_v5 }
0x18c6   :  { %3898 = vadd.xlane.f32.xlu1 %v3896_v33 }
0x18c7   :  { %v3891_v32 = vpop.xlane.xlu0 %3890 }
0x18c8   :  { %v3893_v39 = vmul.f32 0.0078125, %v3891_v32 }
0x18ca   :  { %v3895_v50 = vsub.f32 %v3883_v59, %v3893_v39 }
0x18cc   :  { %v3897_v54 = vmul.f32 %v3895_v50, %v3895_v50 }
0x18ce   :  { %3900 = vadd.xlane.f32.xlu0 %v3897_v54 }
0x1953   :  { %v3899_v52 = vpop.xlane.xlu1 %3898 }
0x1954   :  { %v3902_v21 = vmul.f32 0.0078125, %v3899_v52 }
0x1956   :  { %v3904_v11 = vadd.f32 1e-05, %v3902_v21 }
0x1958   :  { %5329 = vrsqrt.f32 %v3904_v11 }
0x195b   :  { %v3901_v46 = vpop.xlane.xlu0 %3900 }
0x195c   :  { %v3903_v15 = vmul.f32 0.0078125, %v3901_v46 }
0x195e   :  { %v3905_v17 = vadd.f32 1e-05, %v3903_v15 }
0x1960   :  { %5331 = vrsqrt.f32 %v3905_v17 }
0x1962   :  { %v5330_v35 = vpop.eup %5329 }
0x1963   :  { %v3908_v53 = vmul.f32 %v5330_v35, %v3894_v5 }
0x1965   :  { %v3916_v4 = vmul.f32 %v4423_v63, %v3908_v53 }
0x1967   :  { %v3924_v55 = vadd.f32 %v4424_v19, %v3916_v4 }
0x196a   :  { %v5332_v48 = vpop.eup %5331 }
0x196b   :  { %v3909_v24 = vmul.f32 %v5332_v48, %v3895_v50 }
0x196d   :  { %v3917_v14 = vmul.f32 %v4423_v63, %v3909_v24 }
0x196f   :  { %v3925_v25 = vadd.f32 %v4424_v19, %v3917_v14 }
0x1971   :  { %v3927_v6 = vrot.slane %v3925_v25, 7 }
0x1973   :  { %v3930_v26 = vsel %vm3929_vm2, %v3924_v55, %v3927_v6 }
0x1974   :  { %v3931_v29 = vpack.c.bf16 %v3930_v26, %v3930_v26 }
0x1976   :  { %4882 = vmatmul.mubr.bf16.vlgmr.msra.gmra.mrb[64].mxu0 %v3931_v29 }
0x1a49   :  { %v4037_v51 = vpop.f32.mrb[64].mxu0 }
0x1a4a   :  { %v4038_v28 = vadd.f32 %v4425_v34, %v4037_v51  ;;  %v4883_v10 = vpop.f32.mrb[65].mxu0 }
0x1a4b   :  { %v4040_v36 = vpop.f32.mrb[66].mxu0 }
0x1a4c   :  { %5333 = vtanh.f32 %v4038_v28  ;;  %v4884_v37 = vpop.f32.mrb[67].mxu0 }
0x1a56   :  { %v5334_v38 = vpop.eup %5333 }
0x1a57   :  { %v4044_v43 = vpack.c.bf16 %v5334_v38, %v5334_v38 }
0x1a59   :  { %4902 = vmatmul.mubr.bf16.vlgmr.msra.gmra.mrb[64].mxu1 %v4044_v43 }
0x1b2c   :  { %v4150_v44 = vpop.f32.mrb[64].mxu1 }
0x1b2d   :  { %v4151_v47 = vadd.f32 %v4434_v42, %v4150_v44  ;;  %v4903_v56 = vpop.f32.mrb[65].mxu1 }
0x1b2e   :  { %v4153_v8 = vpop.f32.mrb[66].mxu1 }
0x1b2f   :  { %4157 = vst.msk [vmem:[%s6532_s20] sm:$0x3] %vm4156_vm3, %v4151_v47  ;;  %v4904_v27 = vpop.f32.mrb[67].mxu1 }
0x1b30   :  { %4162 = vsyncpa [#allocation3], 1 }

</bundles_post_ra>
